<compile_context>
chip_gen: v6e
topology: v6e:2x2x1
jax: 0.10.0
libtpu: 0.0.40
codegen_flags: <defaults>
</compile_context>

<pallas_src>
import math

import jax
import jax.numpy as jnp
from jax import lax
from jax.experimental import pallas as pl
from jax.experimental.pallas import tpu as pltpu

# ----------------------- synthetic configuration -----------------------
C = 32                       # RPN head in_channels
H = W = 16                   # feature-map spatial size
IMG_SHAPE = (256, 256)       # (height, width)  -> stride (16, 16)
ANCHOR_SIZES = (64.0, 128.0)
ANCHOR_RATIOS = (0.5, 1.0, 2.0)
A = len(ANCHOR_SIZES) * len(ANCHOR_RATIOS)   # anchors per location (6)
REG_WEIGHTS = (1.0, 1.0, 1.0, 1.0)
PRE_NMS_TOP_N = 256          # 'testing'
POST_NMS_TOP_N = 64          # 'testing'
NMS_THRESH = 0.7
MIN_SIZE = 1.0
BBOX_XFORM_CLIP = math.log(1000.0 / 16.0)

N_PAD = 128                  # lane-dense padded width of the fused cls+bbox output
HEAD_DTYPE = jnp.bfloat16    # MXU input dtype (f32 accumulation, f32 epilogue)

_ARB = pltpu.CompilerParams(dimension_semantics=("arbitrary",))


def _full_spec(shape):
    zeros = (0,) * len(shape)
    return pl.BlockSpec(shape, lambda i: zeros)


# ============================ Pallas kernels ============================

def _rpn_head_kernel(taps_ref, wconv_ref, bconv_ref, whead_ref, bhead_ref, out_ref):
    # taps:  (H*W, 9*C) bf16 im2col of the zero-padded NHWC feature
    # wconv: (9*C, C)   bf16 3x3 conv weight, tap-major
    # whead: (C, N_PAD) bf16 fused [cls | bbox | zero-pad] 1x1 weights
    acc = jnp.dot(taps_ref[...], wconv_ref[...],
                  preferred_element_type=jnp.float32)            # one K=288 GEMM
    hidden = jnp.maximum(acc + bconv_ref[...], 0.0)              # bias + ReLU in f32
    out_ref[...] = (jnp.dot(hidden.astype(HEAD_DTYPE), whead_ref[...],
                            preferred_element_type=jnp.float32)
                    + bhead_ref[...])                            # single lane-dense store


def _proposal_kernel(shape_ref, delta_ref, anchor_ref, box_ref, keep_ref, iou_sc):
    # delta/anchor: (4, P) coordinate-row layout (proposals on the lane axis)
    # box_ref:      (4, P) decoded + clipped boxes
    # keep_ref:     (1, P) float {0,1} NMS keep mask (rows are score-descending)
    # iou_sc:       (P, P) VMEM scratch for the pairwise IoU matrix
    p = keep_ref.shape[1]
    img_h = shape_ref[0]
    img_w = shape_ref[1]
    wx, wy, ww, wh = REG_WEIGHTS

    # --- BoxCoder.decode fused with process_box clipping ---
    dx = delta_ref[0:1, :] / wx
    dy = delta_ref[1:2, :] / wy
    dw = jnp.minimum(delta_ref[2:3, :] / ww, BBOX_XFORM_CLIP)
    dh = jnp.minimum(delta_ref[3:4, :] / wh, BBOX_XFORM_CLIP)
    ax1 = anchor_ref[0:1, :]
    ay1 = anchor_ref[1:2, :]
    ax2 = anchor_ref[2:3, :]
    ay2 = anchor_ref[3:4, :]
    aw = ax2 - ax1
    ah = ay2 - ay1
    ctr_x = ax1 + 0.5 * aw
    ctr_y = ay1 + 0.5 * ah
    pcx = dx * aw + ctr_x
    pcy = dy * ah + ctr_y
    pw = jnp.exp(dw) * aw
    ph = jnp.exp(dh) * ah
    x1 = jnp.clip(pcx - 0.5 * pw, 0.0, img_w)
    y1 = jnp.clip(pcy - 0.5 * ph, 0.0, img_h)
    x2 = jnp.clip(pcx + 0.5 * pw, 0.0, img_w)
    y2 = jnp.clip(pcy + 0.5 * ph, 0.0, img_h)
    boxes = jnp.concatenate([x1, y1, x2, y2], axis=0)            # (4, P)
    box_ref[...] = boxes                                         # one unmasked store

    bw = x2 - x1
    bh = y2 - y1
    valid = jnp.where((bw >= MIN_SIZE) & (bh >= MIN_SIZE), 1.0, 0.0)   # (1, P)

    # --- pairwise IoU -> VMEM scratch; column operands via ONE XLU transpose ---
    area_r = bw * bh                                             # (1, P)
    rows8 = jnp.concatenate([boxes, area_r, jnp.zeros((3, p), jnp.float32)], axis=0)
    cols8 = jnp.transpose(rows8)                                 # (P, 8)
    x1c = cols8[:, 0:1]
    y1c = cols8[:, 1:2]
    x2c = cols8[:, 2:3]
    y2c = cols8[:, 3:4]
    area_c = cols8[:, 4:5]
    iw = jnp.maximum(jnp.minimum(x2c, x2) - jnp.maximum(x1c, x1), 0.0)
    ih = jnp.maximum(jnp.minimum(y2c, y2) - jnp.maximum(y1c, y1), 0.0)
    inter = iw * ih
    union = jnp.maximum(area_c + area_r - inter, 1e-6)           # eps: no 0/0 NaN
    iou_sc[...] = inter / union                                  # (P, P)

    # --- greedy NMS, fully in-kernel (candidates already score-descending) ---
    # TODO(synk): v7x could split the O(P^2) IoU across both TensorCores, but the
    # sequential greedy suppression keeps this kernel single-core for now.
    col = lax.broadcasted_iota(jnp.int32, (1, p), 1)

    def body(i, keep):
        row = iou_sc[pl.ds(i, 1), :]                             # lane-contiguous row
        hit = jnp.where((row > NMS_THRESH) & (keep > 0.5) & (col < i), 1.0, 0.0)
        sup = jnp.max(hit, axis=1, keepdims=True)                # (1, 1)
        keep_i = valid * (1.0 - sup)                             # (1, P)
        return jnp.where(col == i, keep_i, keep)

    keep_ref[...] = lax.fori_loop(0, p, body, jnp.zeros((1, p), jnp.float32))


# ========================= pallas_call wrappers =========================

def build_taps(feature):
    # feature: (1, C, H, W) NCHW -> NHWC -> (H*W, 9*C) im2col, cast to bf16 for MXU.
    x = jnp.transpose(feature[0], (1, 2, 0))                     # (H, W, C)
    xp = jnp.pad(x, ((1, 1), (1, 1), (0, 0)))
    taps = jnp.concatenate(
        [xp[ky:ky + H, kx:kx + W, :].reshape(H * W, C)
         for ky in range(3) for kx in range(3)], axis=1)         # (H*W, 9*C)
    return taps.astype(HEAD_DTYPE)


def pack_head_params(w_conv, b_conv, w_cls, b_cls, w_box, b_box):
    # 3x3 conv (Cout, Cin, 3, 3) -> (9*Cin, Cout), tap-major (same order as build_taps)
    wconv = jnp.concatenate([w_conv[:, :, ky, kx].T
                             for ky in range(3) for kx in range(3)], axis=0)
    # fused 1x1 heads: [cls | bbox] -> (C, 5A) padded to (C, N_PAD) for lane-dense output
    whead = jnp.concatenate([w_cls[:, :, 0, 0].T, w_box[:, :, 0, 0].T], axis=1)
    bhead = jnp.concatenate([b_cls, b_box]).reshape(1, 5 * A)
    whead = jnp.pad(whead, ((0, 0), (0, N_PAD - 5 * A)))
    bhead = jnp.pad(bhead, ((0, 0), (0, N_PAD - 5 * A)))
    return (wconv.astype(HEAD_DTYPE),
            b_conv.reshape(1, C).astype(jnp.float32),
            whead.astype(HEAD_DTYPE),
            bhead.astype(jnp.float32))


def run_head(feature, params):
    taps = build_taps(feature)
    args = (taps,) + tuple(params)
    hw = H * W
    return pl.pallas_call(
        _rpn_head_kernel,
        grid=(1,),
        in_specs=[_full_spec(a.shape) for a in args],
        out_specs=_full_spec((hw, N_PAD)),
        out_shape=jax.ShapeDtypeStruct((hw, N_PAD), jnp.float32),
        compiler_params=_ARB,
    )(*args)


def run_proposal(delta_t, anchor_t, image_shape):
    # delta_t, anchor_t: (4, P); image_shape (h, w) travels through SMEM (no retrace).
    p = delta_t.shape[1]
    img = jnp.asarray([float(image_shape[0]), float(image_shape[1])], jnp.float32)
    return pl.pallas_call(
        _proposal_kernel,
        grid=(1,),
        in_specs=[pl.BlockSpec(memory_space=pltpu.MemorySpace.SMEM),
                  _full_spec((4, p)),
                  _full_spec((4, p))],
        out_specs=(_full_spec((4, p)), _full_spec((1, p))),
        out_shape=(jax.ShapeDtypeStruct((4, p), jnp.float32),
                   jax.ShapeDtypeStruct((1, p), jnp.float32)),
        scratch_shapes=[pltpu.VMEM((p, p), jnp.float32)],
        compiler_params=_ARB,
    )(img, delta_t, anchor_t)


# ============================ plain-JAX glue ============================

def anchor_generator(grid_h, grid_w, image_shape, dtype=jnp.float32):
    sizes = jnp.asarray(ANCHOR_SIZES, dtype)
    ratios = jnp.asarray(ANCHOR_RATIOS, dtype)
    h_ratios = jnp.sqrt(ratios)
    w_ratios = 1.0 / h_ratios
    hs = (sizes[:, None] * h_ratios[None, :]).reshape(-1)
    ws = (sizes[:, None] * w_ratios[None, :]).reshape(-1)
    cell_anchor = jnp.stack([-ws, -hs, ws, hs], axis=1) / 2.0          # (A, 4)
    stride_h = image_shape[0] // grid_h
    stride_w = image_shape[1] // grid_w
    shift_x = jnp.arange(grid_w, dtype=dtype) * stride_w
    shift_y = jnp.arange(grid_h, dtype=dtype) * stride_h
    y, x = jnp.meshgrid(shift_y, shift_x, indexing="ij")
    x = x.reshape(-1)
    y = y.reshape(-1)
    shift = jnp.stack((x, y, x, y), axis=1).reshape(-1, 1, 4)
    return (shift + cell_anchor).reshape(-1, 4)                        # (H*W*A, 4)


def select_proposals(boxes, keep_b):
    # dynamic-length proposal list -> fixed (POST_NMS_TOP_N, 4) padded + count
    rank = jnp.cumsum(keep_b.astype(jnp.int32)) - 1
    dst = jnp.where(keep_b & (rank < POST_NMS_TOP_N), rank, POST_NMS_TOP_N)
    proposals = jnp.zeros((POST_NMS_TOP_N + 1, 4), boxes.dtype)
    proposals = proposals.at[dst].set(boxes)[:POST_NMS_TOP_N]
    num_valid = jnp.minimum(jnp.sum(keep_b.astype(jnp.int32)), POST_NMS_TOP_N)
    return proposals, num_valid


def rpn_forward(feature, params, image_shape):
    # --- head (single fused Pallas GEMM kernel) + the PyTorch permute/flatten glue ---
    head_out = run_head(feature, params)                  # (HW, N_PAD)
    objectness = head_out[:, :A].reshape(-1)              # == permute(0,2,3,1).flatten()
    pred_delta = head_out[:, A:5 * A].reshape(-1, 4)      # == permute(0,2,3,1).reshape(-1,4)

    anchor = anchor_generator(H, W, image_shape)

    # --- create_proposal: top-k (XLA) then fused decode+clip+IoU+NMS (Pallas) ---
    pre_n = min(int(objectness.shape[0]), PRE_NMS_TOP_N)
    _, top_idx = lax.top_k(objectness, pre_n)
    delta_top = pred_delta[top_idx]                       # (P, 4)
    anchor_top = anchor[top_idx]                          # (P, 4)

    boxes4p, keep = run_proposal(delta_top.T, anchor_top.T, image_shape)
    boxes = boxes4p.T                                     # (P, 4)
    proposals, num_valid = select_proposals(boxes, keep[0] > 0.5)
    # TODO(synk): training branch (compute_loss / Matcher / balanced sampler) not implemented.
    return proposals, num_valid


rpn_forward_jit = jax.jit(rpn_forward, static_argnums=(2,))


# ====================== pure-JAX references (tests) =====================

def head_reference(feature, w_conv, b_conv, w_cls, b_cls, w_box, b_box):
    x = jnp.transpose(feature[0], (1, 2, 0))
    xp = jnp.pad(x, ((1, 1), (1, 1), (0, 0)))
    y = jnp.zeros((H, W, C), jnp.float32)
    for ky in range(3):
        for kx in range(3):
            y = y + jnp.einsum("hwi,oi->hwo", xp[ky:ky + H, kx:kx + W, :],
                               w_conv[:, :, ky, kx])
    y = jnp.maximum(y + b_conv, 0.0)
    obj = jnp.einsum("hwc,oc->hwo", y, w_cls[:, :, 0, 0]) + b_cls
    delta = jnp.einsum("hwc,oc->hwo", y, w_box[:, :, 0, 0]) + b_box
    return obj.reshape(H * W, A), delta.reshape(H * W, 4 * A)


def proposal_reference(delta_top, anchor_top, image_shape):
    wx, wy, ww, wh = REG_WEIGHTS
    dx = delta_top[:, 0] / wx
    dy = delta_top[:, 1] / wy
    dw = jnp.minimum(delta_top[:, 2] / ww, BBOX_XFORM_CLIP)
    dh = jnp.minimum(delta_top[:, 3] / wh, BBOX_XFORM_CLIP)
    aw = anchor_top[:, 2] - anchor_top[:, 0]
    ah = anchor_top[:, 3] - anchor_top[:, 1]
    cx = anchor_top[:, 0] + 0.5 * aw
    cy = anchor_top[:, 1] + 0.5 * ah
    pcx = dx * aw + cx
    pcy = dy * ah + cy
    pw = jnp.exp(dw) * aw
    ph = jnp.exp(dh) * ah
    x1 = jnp.clip(pcx - 0.5 * pw, 0.0, image_shape[1])
    y1 = jnp.clip(pcy - 0.5 * ph, 0.0, image_shape[0])
    x2 = jnp.clip(pcx + 0.5 * pw, 0.0, image_shape[1])
    y2 = jnp.clip(pcy + 0.5 * ph, 0.0, image_shape[0])
    boxes = jnp.stack([x1, y1, x2, y2], axis=1)
    valid = (x2 - x1 >= MIN_SIZE) & (y2 - y1 >= MIN_SIZE)
    area = (x2 - x1) * (y2 - y1)
    iw = jnp.maximum(jnp.minimum(x2[:, None], x2[None, :])
                     - jnp.maximum(x1[:, None], x1[None, :]), 0.0)
    ih = jnp.maximum(jnp.minimum(y2[:, None], y2[None, :])
                     - jnp.maximum(y1[:, None], y1[None, :]), 0.0)
    inter = iw * ih
    iou = inter / jnp.maximum(area[:, None] + area[None, :] - inter, 1e-6)
    p = boxes.shape[0]

    def body(i, keep):
        sup = jnp.any((iou[i, :] > NMS_THRESH) & keep)
        return keep.at[i].set(valid[i] & jnp.logical_not(sup))

    keep = lax.fori_loop(0, p, body, jnp.zeros((p,), jnp.bool_))
    return boxes, keep


# ================================ main =================================

if __name__ == "__main__":
    key = jax.random.PRNGKey(0)
    kf, k1, k2, k3 = jax.random.split(key, 4)

    feature = jax.random.normal(kf, (1, C, H, W), jnp.float32)        # NCHW, batch=1

    # Deterministic RPNHead parameters (normal std=0.01, zero bias, like the repo).
    w_conv = 0.01 * jax.random.normal(k1, (C, C, 3, 3), jnp.float32)
    b_conv = jnp.zeros((C,), jnp.float32)
    w_cls = 0.01 * jax.random.normal(k2, (A, C, 1, 1), jnp.float32)
    b_cls = jnp.zeros((A,), jnp.float32)
    w_box = 0.01 * jax.random.normal(k3, (4 * A, C, 1, 1), jnp.float32)
    b_box = jnp.zeros((4 * A,), jnp.float32)

    params = pack_head_params(w_conv, b_conv, w_cls, b_cls, w_box, b_box)

    proposals, num_valid = rpn_forward_jit(feature, params, IMG_SHAPE)
    proposals = jax.block_until_ready(proposals)
    num_valid = int(jax.block_until_ready(num_valid))

    # --- sanity: fused Pallas head vs plain-JAX reference ---
    head_out = run_head(feature, params)
    obj_r, delta_r = head_reference(feature, w_conv, b_conv, w_cls, b_cls, w_box, b_box)
    assert bool(jnp.allclose(head_out[:, :A], obj_r, atol=1e-2, rtol=1e-2))
    assert bool(jnp.allclose(head_out[:, A:5 * A], delta_r, atol=1e-2, rtol=1e-2))

    # --- sanity: fused decode+IoU+NMS kernel vs plain-JAX reference ---
    objectness = head_out[:, :A].reshape(-1)
    pred_delta = head_out[:, A:5 * A].reshape(-1, 4)
    anchor = anchor_generator(H, W, IMG_SHAPE)
    _, top_idx = lax.top_k(objectness, PRE_NMS_TOP_N)
    delta_top = pred_delta[top_idx]
    anchor_top = anchor[top_idx]
    boxes4p_k, keep_k = run_proposal(delta_top.T, anchor_top.T, IMG_SHAPE)
    boxes_ref, keep_ref_mask = proposal_reference(delta_top, anchor_top, IMG_SHAPE)
    assert bool(jnp.allclose(boxes4p_k.T, boxes_ref, atol=1e-3, rtol=1e-3))
    keep_kernel = keep_k[0] > 0.5
    assert int(jnp.sum(keep_kernel != keep_ref_mask)) <= 2   # allow ulp-level ties at the IoU threshold

    # --- output invariants ---
    assert proposals.shape == (POST_NMS_TOP_N, 4)
    assert 0 < num_valid <= POST_NMS_TOP_N
    assert bool(jnp.all(jnp.isfinite(proposals[:num_valid])))

    print("KERNEL_OK")
</pallas_src>

<mosaic_0001>
module attributes {stable_mosaic.version = 11 : i64} {
  func.func @_rpn_head_kernel(%arg0: i32, %arg1: memref<256x288xbf16, #tpu.memory_space<vmem>>, %arg2: memref<288x32xbf16, #tpu.memory_space<vmem>>, %arg3: memref<1x32xf32, #tpu.memory_space<vmem>>, %arg4: memref<32x128xbf16, #tpu.memory_space<vmem>>, %arg5: memref<1x128xf32, #tpu.memory_space<vmem>>, %arg6: memref<256x128xf32, #tpu.memory_space<vmem>>) attributes {dimension_semantics = [#tpu.dimension_semantics<arbitrary>], iteration_bounds = array<i64: 1>, scalar_prefetch = 0 : i64, scratch_operands = 0 : i64, tpu.core_type = #tpu.core_type<tc>, window_params = [{pipeline_mode = #tpu.pipeline_mode<synchronous>, transform_indices = @transform_0, window_bounds = array<i64: 256, 288>}, {pipeline_mode = #tpu.pipeline_mode<synchronous>, transform_indices = @transform_1, window_bounds = array<i64: 288, 32>}, {pipeline_mode = #tpu.pipeline_mode<synchronous>, transform_indices = @transform_2, window_bounds = array<i64: 1, 32>}, {pipeline_mode = #tpu.pipeline_mode<synchronous>, transform_indices = @transform_3, window_bounds = array<i64: 32, 128>}, {pipeline_mode = #tpu.pipeline_mode<synchronous>, transform_indices = @transform_4, window_bounds = array<i64: 1, 128>}, {pipeline_mode = #tpu.pipeline_mode<synchronous>, transform_indices = @transform_5, window_bounds = array<i64: 256, 128>}]} {
    %c0 = arith.constant 0 : index
    %c0_0 = arith.constant 0 : index
    %0 = vector.load %arg1[%c0, %c0_0] : memref<256x288xbf16, #tpu.memory_space<vmem>>, vector<256x288xbf16>
    %c0_1 = arith.constant 0 : index
    %c0_2 = arith.constant 0 : index
    %1 = vector.load %arg2[%c0_1, %c0_2] : memref<288x32xbf16, #tpu.memory_space<vmem>>, vector<288x32xbf16>
    %cst = arith.constant dense<0.000000e+00> : vector<256x32xf32>
    %2 = tpu.matmul %0, %1, %cst {dimension_numbers = #tpu.dot_dimension_numbers<[1], [0], [0], [1], [0, 0, 1, 1], [], []>} : vector<256x288xbf16>, vector<288x32xbf16>, vector<256x32xf32> -> vector<256x32xf32>
    %c0_3 = arith.constant 0 : index
    %c0_4 = arith.constant 0 : index
    %3 = vector.load %arg3[%c0_3, %c0_4] : memref<1x32xf32, #tpu.memory_space<vmem>>, vector<1x32xf32>
    %4 = vector.broadcast %3 : vector<1x32xf32> to vector<256x32xf32>
    %5 = arith.addf %2, %4 : vector<256x32xf32>
    %cst_5 = arith.constant 0.000000e+00 : f32
    %6 = vector.broadcast %cst_5 : f32 to vector<256x32xf32>
    %7 = arith.maximumf %5, %6 : vector<256x32xf32>
    %8 = arith.truncf %7 : vector<256x32xf32> to vector<256x32xbf16>
    %c0_6 = arith.constant 0 : index
    %c0_7 = arith.constant 0 : index
    %9 = vector.load %arg4[%c0_6, %c0_7] : memref<32x128xbf16, #tpu.memory_space<vmem>>, vector<32x128xbf16>
    %cst_8 = arith.constant dense<0.000000e+00> : vector<256x128xf32>
    %10 = tpu.matmul %8, %9, %cst_8 {dimension_numbers = #tpu.dot_dimension_numbers<[1], [0], [0], [1], [0, 0, 1, 1], [], []>} : vector<256x32xbf16>, vector<32x128xbf16>, vector<256x128xf32> -> vector<256x128xf32>
    %c0_9 = arith.constant 0 : index
    %c0_10 = arith.constant 0 : index
    %11 = vector.load %arg5[%c0_9, %c0_10] : memref<1x128xf32, #tpu.memory_space<vmem>>, vector<1x128xf32>
    %12 = vector.broadcast %11 : vector<1x128xf32> to vector<256x128xf32>
    %13 = arith.addf %10, %12 : vector<256x128xf32>
    %c0_11 = arith.constant 0 : index
    %c0_12 = arith.constant 0 : index
    %14 = vector.load %arg6[%c0_11, %c0_12] : memref<256x128xf32, #tpu.memory_space<vmem>>, vector<256x128xf32>
    tpu.vector_store %arg6[%c0_11, %c0_12], %13 {strides = array<i32>} : memref<256x128xf32, #tpu.memory_space<vmem>>, vector<256x128xf32>,
    return
  }
  func.func @transform_0(%arg0: i32) -> (i32, i32) {
    %c0_i32 = arith.constant 0 : i32
    %c0_i32_0 = arith.constant 0 : i32
    %c0_i32_1 = arith.constant 0 : i32
    return %c0_i32, %c0_i32_0 : i32, i32
  }
  func.func @transform_1(%arg0: i32) -> (i32, i32) {
    %c0_i32 = arith.constant 0 : i32
    %c0_i32_0 = arith.constant 0 : i32
    %c0_i32_1 = arith.constant 0 : i32
    return %c0_i32, %c0_i32_0 : i32, i32
  }
  func.func @transform_2(%arg0: i32) -> (i32, i32) {
    %c0_i32 = arith.constant 0 : i32
    %c0_i32_0 = arith.constant 0 : i32
    %c0_i32_1 = arith.constant 0 : i32
    return %c0_i32, %c0_i32_0 : i32, i32
  }
  func.func @transform_3(%arg0: i32) -> (i32, i32) {
    %c0_i32 = arith.constant 0 : i32
    %c0_i32_0 = arith.constant 0 : i32
    %c0_i32_1 = arith.constant 0 : i32
    return %c0_i32, %c0_i32_0 : i32, i32
  }
  func.func @transform_4(%arg0: i32) -> (i32, i32) {
    %c0_i32 = arith.constant 0 : i32
    %c0_i32_0 = arith.constant 0 : i32
    %c0_i32_1 = arith.constant 0 : i32
    return %c0_i32, %c0_i32_0 : i32, i32
  }
  func.func @transform_5(%arg0: i32) -> (i32, i32) {
    %c0_i32 = arith.constant 0 : i32
    %c0_i32_0 = arith.constant 0 : i32
    %c0_i32_1 = arith.constant 0 : i32
    return %c0_i32, %c0_i32_0 : i32, i32
  }
}

module attributes {stable_mosaic.version = 11 : i64} {
  func.func @_proposal_kernel(%arg0: i32, %arg1: memref<2xf32, #tpu.memory_space<smem>>, %arg2: memref<4x256xf32, #tpu.memory_space<vmem>>, %arg3: memref<4x256xf32, #tpu.memory_space<vmem>>, %arg4: memref<4x256xf32, #tpu.memory_space<vmem>>, %arg5: memref<1x256xf32, #tpu.memory_space<vmem>>, %arg6: memref<256x256xf32, #tpu.memory_space<vmem>>) attributes {dimension_semantics = [#tpu.dimension_semantics<arbitrary>], iteration_bounds = array<i64: 1>, scalar_prefetch = 0 : i64, scratch_operands = 1 : i64, tpu.core_type = #tpu.core_type<tc>, window_params = [{transform_indices = @transform_0, window_bounds = array<i64: 2>}, {pipeline_mode = #tpu.pipeline_mode<synchronous>, transform_indices = @transform_1, window_bounds = array<i64: 4, 256>}, {pipeline_mode = #tpu.pipeline_mode<synchronous>, transform_indices = @transform_2, window_bounds = array<i64: 4, 256>}, {pipeline_mode = #tpu.pipeline_mode<synchronous>, transform_indices = @transform_3, window_bounds = array<i64: 4, 256>}, {pipeline_mode = #tpu.pipeline_mode<synchronous>, transform_indices = @transform_4, window_bounds = array<i64: 1, 256>}]} {
    %c0 = arith.constant 0 : index
    %0 = memref.load %arg1[%c0] : memref<2xf32, #tpu.memory_space<smem>>
    %c1 = arith.constant 1 : index
    %1 = memref.load %arg1[%c1] : memref<2xf32, #tpu.memory_space<smem>>
    %c0_0 = arith.constant 0 : index
    %c0_1 = arith.constant 0 : index
    %2 = vector.load %arg2[%c0_0, %c0_1] : memref<4x256xf32, #tpu.memory_space<vmem>>, vector<1x256xf32>
    %cst = arith.constant 1.000000e+00 : f32
    %3 = vector.broadcast %cst : f32 to vector<1x256xf32>
    %4 = arith.divf %2, %3 : vector<1x256xf32>
    %c1_2 = arith.constant 1 : index
    %c0_3 = arith.constant 0 : index
    %5 = vector.load %arg2[%c1_2, %c0_3] : memref<4x256xf32, #tpu.memory_space<vmem>>, vector<1x256xf32>
    %cst_4 = arith.constant 1.000000e+00 : f32
    %6 = vector.broadcast %cst_4 : f32 to vector<1x256xf32>
    %7 = arith.divf %5, %6 : vector<1x256xf32>
    %c2 = arith.constant 2 : index
    %c0_5 = arith.constant 0 : index
    %8 = vector.load %arg2[%c2, %c0_5] : memref<4x256xf32, #tpu.memory_space<vmem>>, vector<1x256xf32>
    %cst_6 = arith.constant 1.000000e+00 : f32
    %9 = vector.broadcast %cst_6 : f32 to vector<1x256xf32>
    %10 = arith.divf %8, %9 : vector<1x256xf32>
    %cst_7 = arith.constant 4.13516665 : f32
    %11 = vector.broadcast %cst_7 : f32 to vector<1x256xf32>
    %12 = arith.minimumf %10, %11 : vector<1x256xf32>
    %c3 = arith.constant 3 : index
    %c0_8 = arith.constant 0 : index
    %13 = vector.load %arg2[%c3, %c0_8] : memref<4x256xf32, #tpu.memory_space<vmem>>, vector<1x256xf32>
    %cst_9 = arith.constant 1.000000e+00 : f32
    %14 = vector.broadcast %cst_9 : f32 to vector<1x256xf32>
    %15 = arith.divf %13, %14 : vector<1x256xf32>
    %cst_10 = arith.constant 4.13516665 : f32
    %16 = vector.broadcast %cst_10 : f32 to vector<1x256xf32>
    %17 = arith.minimumf %15, %16 : vector<1x256xf32>
    %c0_11 = arith.constant 0 : index
    %c0_12 = arith.constant 0 : index
    %18 = vector.load %arg3[%c0_11, %c0_12] : memref<4x256xf32, #tpu.memory_space<vmem>>, vector<1x256xf32>
    %c1_13 = arith.constant 1 : index
    %c0_14 = arith.constant 0 : index
    %19 = vector.load %arg3[%c1_13, %c0_14] : memref<4x256xf32, #tpu.memory_space<vmem>>, vector<1x256xf32>
    %c2_15 = arith.constant 2 : index
    %c0_16 = arith.constant 0 : index
    %20 = vector.load %arg3[%c2_15, %c0_16] : memref<4x256xf32, #tpu.memory_space<vmem>>, vector<1x256xf32>
    %c3_17 = arith.constant 3 : index
    %c0_18 = arith.constant 0 : index
    %21 = vector.load %arg3[%c3_17, %c0_18] : memref<4x256xf32, #tpu.memory_space<vmem>>, vector<1x256xf32>
    %22 = arith.subf %20, %18 : vector<1x256xf32>
    %23 = arith.subf %21, %19 : vector<1x256xf32>
    %cst_19 = arith.constant 5.000000e-01 : f32
    %24 = vector.broadcast %cst_19 : f32 to vector<1x256xf32>
    %25 = arith.mulf %24, %22 : vector<1x256xf32>
    %26 = arith.addf %18, %25 : vector<1x256xf32>
    %cst_20 = arith.constant 5.000000e-01 : f32
    %27 = vector.broadcast %cst_20 : f32 to vector<1x256xf32>
    %28 = arith.mulf %27, %23 : vector<1x256xf32>
    %29 = arith.addf %19, %28 : vector<1x256xf32>
    %30 = arith.mulf %4, %22 : vector<1x256xf32>
    %31 = arith.addf %30, %26 : vector<1x256xf32>
    %32 = arith.mulf %7, %23 : vector<1x256xf32>
    %33 = arith.addf %32, %29 : vector<1x256xf32>
    %34 = math.exp %12 : vector<1x256xf32>
    %35 = arith.mulf %34, %22 : vector<1x256xf32>
    %36 = math.exp %17 : vector<1x256xf32>
    %37 = arith.mulf %36, %23 : vector<1x256xf32>
    %cst_21 = arith.constant 5.000000e-01 : f32
    %38 = vector.broadcast %cst_21 : f32 to vector<1x256xf32>
    %39 = arith.mulf %38, %35 : vector<1x256xf32>
    %40 = arith.subf %31, %39 : vector<1x256xf32>
    %cst_22 = arith.constant 0.000000e+00 : f32
    %41 = vector.broadcast %cst_22 : f32 to vector<1x256xf32>
    %42 = arith.maximumf %41, %40 : vector<1x256xf32>
    %43 = vector.broadcast %1 : f32 to vector<1x256xf32>
    %44 = arith.minimumf %43, %42 : vector<1x256xf32>
    %cst_23 = arith.constant 5.000000e-01 : f32
    %45 = vector.broadcast %cst_23 : f32 to vector<1x256xf32>
    %46 = arith.mulf %45, %37 : vector<1x256xf32>
    %47 = arith.subf %33, %46 : vector<1x256xf32>
    %cst_24 = arith.constant 0.000000e+00 : f32
    %48 = vector.broadcast %cst_24 : f32 to vector<1x256xf32>
    %49 = arith.maximumf %48, %47 : vector<1x256xf32>
    %50 = vector.broadcast %0 : f32 to vector<1x256xf32>
    %51 = arith.minimumf %50, %49 : vector<1x256xf32>
    %cst_25 = arith.constant 5.000000e-01 : f32
    %52 = vector.broadcast %cst_25 : f32 to vector<1x256xf32>
    %53 = arith.mulf %52, %35 : vector<1x256xf32>
    %54 = arith.addf %31, %53 : vector<1x256xf32>
    %cst_26 = arith.constant 0.000000e+00 : f32
    %55 = vector.broadcast %cst_26 : f32 to vector<1x256xf32>
    %56 = arith.maximumf %55, %54 : vector<1x256xf32>
    %57 = vector.broadcast %1 : f32 to vector<1x256xf32>
    %58 = arith.minimumf %57, %56 : vector<1x256xf32>
    %cst_27 = arith.constant 5.000000e-01 : f32
    %59 = vector.broadcast %cst_27 : f32 to vector<1x256xf32>
    %60 = arith.mulf %59, %37 : vector<1x256xf32>
    %61 = arith.addf %33, %60 : vector<1x256xf32>
    %cst_28 = arith.constant 0.000000e+00 : f32
    %62 = vector.broadcast %cst_28 : f32 to vector<1x256xf32>
    %63 = arith.maximumf %62, %61 : vector<1x256xf32>
    %64 = vector.broadcast %0 : f32 to vector<1x256xf32>
    %65 = arith.minimumf %64, %63 : vector<1x256xf32>
    %66 = tpu.concatenate %44, %51, %58, %65 in 0 : vector<1x256xf32>, vector<1x256xf32>, vector<1x256xf32>, vector<1x256xf32> -> vector<4x256xf32>
    %c0_29 = arith.constant 0 : index
    %c0_30 = arith.constant 0 : index
    %67 = vector.load %arg4[%c0_29, %c0_30] : memref<4x256xf32, #tpu.memory_space<vmem>>, vector<4x256xf32>
    tpu.vector_store %arg4[%c0_29, %c0_30], %66 {strides = array<i32>} : memref<4x256xf32, #tpu.memory_space<vmem>>, vector<4x256xf32>,
    %68 = arith.subf %58, %44 : vector<1x256xf32>
    %69 = arith.subf %65, %51 : vector<1x256xf32>
    %cst_31 = arith.constant 1.000000e+00 : f32
    %70 = vector.broadcast %cst_31 : f32 to vector<1x256xf32>
    %71 = arith.cmpf oge, %68, %70 : vector<1x256xf32>
    %cst_32 = arith.constant 1.000000e+00 : f32
    %72 = vector.broadcast %cst_32 : f32 to vector<1x256xf32>
    %73 = arith.cmpf oge, %69, %72 : vector<1x256xf32>
    %74 = arith.andi %71, %73 : vector<1x256xi1>
    %cst_33 = arith.constant 1.000000e+00 : f32
    %cst_34 = arith.constant 0.000000e+00 : f32
    %75 = vector.broadcast %cst_33 : f32 to vector<1x256xf32>
    %76 = vector.broadcast %cst_34 : f32 to vector<1x256xf32>
    %77 = arith.select %74, %75, %76 : vector<1x256xi1>, vector<1x256xf32>
    %78 = arith.mulf %68, %69 : vector<1x256xf32>
    %cst_35 = arith.constant 0.000000e+00 : f32
    %79 = vector.broadcast %cst_35 : f32 to vector<3x256xf32>
    %80 = tpu.concatenate %66, %78, %79 in 0 : vector<4x256xf32>, vector<1x256xf32>, vector<3x256xf32> -> vector<8x256xf32>
    %81 = tpu.transpose %80, [1, 0] : vector<8x256xf32> -> vector<256x8xf32>
    %82 = vector.extract_strided_slice %81 {offsets = [0, 0], sizes = [256, 1], strides = [1, 1]} : vector<256x8xf32> to vector<256x1xf32>
    %83 = vector.extract_strided_slice %81 {offsets = [0, 1], sizes = [256, 1], strides = [1, 1]} : vector<256x8xf32> to vector<256x1xf32>
    %84 = vector.extract_strided_slice %81 {offsets = [0, 2], sizes = [256, 1], strides = [1, 1]} : vector<256x8xf32> to vector<256x1xf32>
    %85 = vector.extract_strided_slice %81 {offsets = [0, 3], sizes = [256, 1], strides = [1, 1]} : vector<256x8xf32> to vector<256x1xf32>
    %86 = vector.extract_strided_slice %81 {offsets = [0, 4], sizes = [256, 1], strides = [1, 1]} : vector<256x8xf32> to vector<256x1xf32>
    %87 = vector.broadcast %84 : vector<256x1xf32> to vector<256x256xf32>
    %88 = vector.broadcast %58 : vector<1x256xf32> to vector<256x256xf32>
    %89 = arith.minimumf %87, %88 : vector<256x256xf32>
    %90 = vector.broadcast %82 : vector<256x1xf32> to vector<256x256xf32>
    %91 = vector.broadcast %44 : vector<1x256xf32> to vector<256x256xf32>
    %92 = arith.maximumf %90, %91 : vector<256x256xf32>
    %93 = arith.subf %89, %92 : vector<256x256xf32>
    %cst_36 = arith.constant 0.000000e+00 : f32
    %94 = vector.broadcast %cst_36 : f32 to vector<256x256xf32>
    %95 = arith.maximumf %93, %94 : vector<256x256xf32>
    %96 = vector.broadcast %85 : vector<256x1xf32> to vector<256x256xf32>
    %97 = vector.broadcast %65 : vector<1x256xf32> to vector<256x256xf32>
    %98 = arith.minimumf %96, %97 : vector<256x256xf32>
    %99 = vector.broadcast %83 : vector<256x1xf32> to vector<256x256xf32>
    %100 = vector.broadcast %51 : vector<1x256xf32> to vector<256x256xf32>
    %101 = arith.maximumf %99, %100 : vector<256x256xf32>
    %102 = arith.subf %98, %101 : vector<256x256xf32>
    %cst_37 = arith.constant 0.000000e+00 : f32
    %103 = vector.broadcast %cst_37 : f32 to vector<256x256xf32>
    %104 = arith.maximumf %102, %103 : vector<256x256xf32>
    %105 = arith.mulf %95, %104 : vector<256x256xf32>
    %106 = vector.broadcast %86 : vector<256x1xf32> to vector<256x256xf32>
    %107 = vector.broadcast %78 : vector<1x256xf32> to vector<256x256xf32>
    %108 = arith.addf %106, %107 : vector<256x256xf32>
    %109 = arith.subf %108, %105 : vector<256x256xf32>
    %cst_38 = arith.constant 9.99999997E-7 : f32
    %110 = vector.broadcast %cst_38 : f32 to vector<256x256xf32>
    %111 = arith.maximumf %109, %110 : vector<256x256xf32>
    %112 = arith.divf %105, %111 : vector<256x256xf32>
    %c0_39 = arith.constant 0 : index
    %c0_40 = arith.constant 0 : index
    %113 = vector.load %arg6[%c0_39, %c0_40] : memref<256x256xf32, #tpu.memory_space<vmem>>, vector<256x256xf32>
    tpu.vector_store %arg6[%c0_39, %c0_40], %112 {strides = array<i32>} : memref<256x256xf32, #tpu.memory_space<vmem>>, vector<256x256xf32>,
    %114 = tpu.iota {dimensions = array<i32: 1>} : vector<1x256xi32>
    %cst_41 = arith.constant 0.000000e+00 : f32
    %115 = vector.broadcast %cst_41 : f32 to vector<1x256xf32>
    %c0_i32 = arith.constant 0 : i32
    %c256_i32 = arith.constant 256 : i32
    %116 = arith.addi %c0_i32, %c256_i32 : i32
    %c1_i32 = arith.constant 1 : i32
    %117 = scf.for %arg7 = %c0_i32 to %116 step %c1_i32 iter_args(%arg8 = %115) -> (vector<1x256xf32>)  : i32 {
      %119 = arith.index_cast %arg7 : i32 to index
      %c0_45 = arith.constant 0 : index
      %120 = vector.load %arg6[%119, %c0_45] : memref<256x256xf32, #tpu.memory_space<vmem>>, vector<1x256xf32>
      %cst_46 = arith.constant 0.699999988 : f32
      %121 = vector.broadcast %cst_46 : f32 to vector<1x256xf32>
      %122 = arith.cmpf ogt, %120, %121 : vector<1x256xf32>
      %cst_47 = arith.constant 5.000000e-01 : f32
      %123 = vector.broadcast %cst_47 : f32 to vector<1x256xf32>
      %124 = arith.cmpf ogt, %arg8, %123 : vector<1x256xf32>
      %125 = arith.andi %122, %124 : vector<1x256xi1>
      %126 = vector.broadcast %arg7 : i32 to vector<1x256xi32>
      %127 = arith.cmpi slt, %114, %126 : vector<1x256xi32>
      %128 = arith.andi %125, %127 : vector<1x256xi1>
      %cst_48 = arith.constant 1.000000e+00 : f32
      %cst_49 = arith.constant 0.000000e+00 : f32
      %129 = vector.broadcast %cst_48 : f32 to vector<1x256xf32>
      %130 = vector.broadcast %cst_49 : f32 to vector<1x256xf32>
      %131 = arith.select %128, %129, %130 : vector<1x256xi1>, vector<1x256xf32>
      %cst_50 = arith.constant dense<0xFF800000> : vector<1xf32>
      %132 = vector.multi_reduction <maximumf>, %131, %cst_50 [1] : vector<1x256xf32> to vector<1xf32>
      %133 = vector.shape_cast %132 : vector<1xf32> to vector<1x1xf32>
      %cst_51 = arith.constant 1.000000e+00 : f32
      %134 = vector.broadcast %cst_51 : f32 to vector<1x1xf32>
      %135 = arith.subf %134, %133 : vector<1x1xf32>
      %136 = vector.broadcast %135 : vector<1x1xf32> to vector<1x256xf32>
      %137 = arith.mulf %77, %136 : vector<1x256xf32>
      %138 = vector.broadcast %arg7 : i32 to vector<1x256xi32>
      %139 = arith.cmpi eq, %114, %138 : vector<1x256xi32>
      %140 = arith.select %139, %137, %arg8 : vector<1x256xi1>, vector<1x256xf32>
      scf.yield %140 : vector<1x256xf32>
    }
    %c256_i32_42 = arith.constant 256 : i32
    %c0_43 = arith.constant 0 : index
    %c0_44 = arith.constant 0 : index
    %118 = vector.load %arg5[%c0_43, %c0_44] : memref<1x256xf32, #tpu.memory_space<vmem>>, vector<1x256xf32>
    tpu.vector_store %arg5[%c0_43, %c0_44], %117 {strides = array<i32>} : memref<1x256xf32, #tpu.memory_space<vmem>>, vector<1x256xf32>,
    return
  }
  func.func @transform_0(%arg0: i32) -> i32 {
    %c0_i32 = arith.constant 0 : i32
    %c0_i32_0 = arith.constant 0 : i32
    return %c0_i32 : i32
  }
  func.func @transform_1(%arg0: i32) -> (i32, i32) {
    %c0_i32 = arith.constant 0 : i32
    %c0_i32_0 = arith.constant 0 : i32
    %c0_i32_1 = arith.constant 0 : i32
    return %c0_i32, %c0_i32_0 : i32, i32
  }
  func.func @transform_2(%arg0: i32) -> (i32, i32) {
    %c0_i32 = arith.constant 0 : i32
    %c0_i32_0 = arith.constant 0 : i32
    %c0_i32_1 = arith.constant 0 : i32
    return %c0_i32, %c0_i32_0 : i32, i32
  }
  func.func @transform_3(%arg0: i32) -> (i32, i32) {
    %c0_i32 = arith.constant 0 : i32
    %c0_i32_0 = arith.constant 0 : i32
    %c0_i32_1 = arith.constant 0 : i32
    return %c0_i32, %c0_i32_0 : i32, i32
  }
  func.func @transform_4(%arg0: i32) -> (i32, i32) {
    %c0_i32 = arith.constant 0 : i32
    %c0_i32_0 = arith.constant 0 : i32
    %c0_i32_1 = arith.constant 0 : i32
    return %c0_i32, %c0_i32_0 : i32, i32
  }
}

</mosaic_0001>

<bundles_post_ra>
// kernel: rpn_forward.2
= control target key start
LH: loop header
LB: loop body
LE: loop exit
PB: predicated region body
PF: predicated region fallthrough
CT: control target
= control target key end

     0   :  { %vm476_vm0 = vcmask 261120   ;;  %s2005_s1 = inlined_call_operand.vmem [shape: bf16[288,32], index: 1, kind: input, shape index: {}]   ;;  %s2006_s0 = inlined_call_operand.vmem [shape: bf16[256,288], index: 0, kind: input, shape index: {}]   ;;  %s2007_s3 = inlined_call_operand.vmem [shape: bf16[32,128], index: 3, kind: input, shape index: {}]   ;;  %s2008_s2 = inlined_call_operand.vmem [shape: f32[1,32], index: 2, kind: input, shape index: {}]   ;;  %s2009_s4 = inlined_call_operand.vmem [shape: f32[1,128], index: 4, kind: input, shape index: {}]   ;;  %s2010_s5 = inlined_call_operand.vmem [shape: f32[256,128], index: 5, kind: output, shape index: {}]  }
   0x1   :  { %v1485_v0 = vld [vmem:[%s2005_s1 + $0x78] sm:$0xff]   ;;  %v1487_v2 = vld [vmem:[%s2005_s1 + $0x70] sm:$0xff]   ;;  %v1489_v4 = vld [vmem:[%s2005_s1 + $0x68] sm:$0xff]  }
   0x2   :  { %v1486_v1 = vld [vmem:[%s2005_s1 + $0x38] sm:$0xff]   ;;  %1265 = vmatprep.subr.bf16.mxu0 %v1485_v0  ;;  %v1488_v3 = vld [vmem:[%s2005_s1 + $0x30] sm:$0xff]   ;;  %v1490_v5 = vld [vmem:[%s2005_s1 + $0x28] sm:$0xff]  }
   0x3   :  { %1266 = vmatpush3.bf16.msra.mxu0 %v1486_v1  ;;  %v1491_v6 = vld [vmem:[%s2005_s1 + $0x60] sm:$0xff]   ;;  %v1493_v8 = vld [vmem:[%s2005_s1 + $0x58] sm:$0xff]   ;;  %v1500_v10 = vld [vmem:[%s2005_s1 + $0x88] sm:$0xff]  }
   0x4   :  { %1267 = vmatprep.subr.bf16.mxu0 %v1487_v2  ;;  %v1492_v7 = vld [vmem:[%s2005_s1 + $0x20] sm:$0xff]   ;;  %v1494_v9 = vld [vmem:[%s2005_s1 + $0x18] sm:$0xff]   ;;  %v1495_v11 = vld [vmem:[%s2005_s1 + $0x50] sm:$0xff]   ;;  %1413 = vmatprep.subr.bf16.mxu1 %v1500_v10 }
   0x5   :  { %v1496_v12 = vld [vmem:[%s2005_s1 + $0x10] sm:$0xff]   ;;  %v1497_v13 = vld [vmem:[%s2005_s1 + $0x48] sm:$0xff]   ;;  %1414 = vmatpush3.bf16.msra.mxu1 %v1500_v10  ;;  %v1505_v15 = vld [vmem:[%s2005_s1 + $0x80] sm:$0xff]  }
   0x6   :  { %v1504_v14 = vld [vmem:[%s2006_s0 + $0x4] ss:$12 sps:$4 sm:$0xff]   ;;  %v1506_v16 = vld [vmem:[%s2006_s0 + $0x8] ss:$12 sps:$4 sm:$0xff]   ;;  %1415 = vmatprep.subr.bf16.mxu1 %v1505_v15  ;;  %v1507_v17 = vld [vmem:[%s2006_s0 + $0x20] ss:$12 sps:$4 sm:$0xff]  }
   0x7   :  { %1268 = vmatpush3.bf16.msra.mxu0 %v1488_v3  ;;  %557 = vmatprep.mubr.bf16.mxu0 %v1504_v14  ;;  %v1498_v18 = vld [vmem:[%s2005_s1 + $0x8] sm:$0xff]   ;;  %v1499_v19 = vld [vmem:[%s2005_s1 + $0x40] sm:$0xff]   ;;  %v1515_v23 = vld [vmem:[%s2006_s0 + $0x50] ss:$12 sps:$4 sm:$0xff]  }
   0x8   :  { %1269 = vmatprep.subr.bf16.mxu0 %v1489_v4  ;;  %1417 = vmatprep.mubr.msk.bf16.mxu1 %vm476_vm0, %v1506_v16  ;;  %v1514_v20 = vld [vmem:[%s2006_s0 + $0x38] ss:$12 sps:$4 sm:$0xff]   ;;  %v1502_v22 = vld [vmem:[%s2006_s0] ss:$12 sps:$4 sm:$0xff]   ;;  %v1522_v24 = vld [vmem:[%s2006_s0 + $0x68] ss:$12 sps:$4 sm:$0xff]  }
   0x9   :  { %1416 = vmatpush3.bf16.msra.mxu1 %v1505_v15  ;;  %v1501_v21 = vld [vmem:[%s2005_s1] sm:$0xff]   ;;  %v1508_v25 = vld [vmem:[%s2006_s0 + $0x1c] ss:$12 sps:$4 sm:$0xff]   ;;  %v1516_v33 = vld [vmem:[%s2006_s0 + $0x4c] ss:$12 sps:$4 sm:$0xff]  }
   0xa   :  { %v1510_v26 = vld [vmem:[%s2006_s0 + $0x18] ss:$12 sps:$4 sm:$0xff]   ;;  %v1523_v27 = vld [vmem:[%s2006_s0 + $0x80] ss:$12 sps:$4 sm:$0xff]   ;;  %v1513_v30 = vld [vmem:[%s2006_s0 + $0x30] ss:$12 sps:$4 sm:$0xff]  }
   0xb   :  { %1270 = vmatpush3.bf16.msra.mxu0 %v1490_v5  ;;  %v1530_v28 = vld [vmem:[%s2006_s0 + $0x98] ss:$12 sps:$4 sm:$0xff]   ;;  %v1511_v29 = vld [vmem:[%s2006_s0 + $0x34] ss:$12 sps:$4 sm:$0xff]   ;;  %v1531_v31 = vld [vmem:[%s2006_s0 + $0xb0] ss:$12 sps:$4 sm:$0xff]  }
   0xc   :  { %1271 = vmatprep.subr.bf16.mxu0 %v1491_v6  ;;  %1418 = vmatmul.mubr.msk.bf16.vlgmr.msra.gmra.mxu1 %vm476_vm0, %v1507_v17  ;;  %v1538_v32 = vld [vmem:[%s2006_s0 + $0xc8] ss:$12 sps:$4 sm:$0xff]   ;;  %v1539_v35 = vld [vmem:[%s2006_s0 + $0xe0] ss:$12 sps:$4 sm:$0xff]   ;;  %v1546_v36 = vld [vmem:[%s2006_s0 + $0xf8] ss:$12 sps:$4 sm:$0xff]  }
   0xd   :  { %1421 = vmatprep.mubr.msk.bf16.mxu1 %vm476_vm0, %v1514_v20  ;;  %v1518_v34 = vld [vmem:[%s2006_s0 + $0x48] ss:$12 sps:$4 sm:$0xff]   ;;  %v1519_v37 = vld [vmem:[%s2006_s0 + $0x64] ss:$12 sps:$4 sm:$0xff]   ;;  %v1521_v39 = vld [vmem:[%s2006_s0 + $0x60] ss:$12 sps:$4 sm:$0xff]  }
   0xe   :  { %v1547_v38 = vld [vmem:[%s2006_s0 + $0x110] ss:$12 sps:$4 sm:$0xff]   ;;  %v1554_v40 = vld [vmem:[%s2006_s0 + $0x128] ss:$12 sps:$4 sm:$0xff]   ;;  %v1555_v42 = vld [vmem:[%s2006_s0 + $0x140] ss:$12 sps:$4 sm:$0xff]  }
   0xf   :  { %1272 = vmatpush3.bf16.msra.mxu0 %v1492_v7  ;;  %v1524_v41 = vld [vmem:[%s2006_s0 + $0x7c] ss:$12 sps:$4 sm:$0xff]   ;;  %v1526_v43 = vld [vmem:[%s2006_s0 + $0x78] ss:$12 sps:$4 sm:$0xff]   ;;  %v1527_v45 = vld [vmem:[%s2006_s0 + $0x94] ss:$12 sps:$4 sm:$0xff]  }
  0x10   :  { %1273 = vmatprep.subr.bf16.mxu0 %v1493_v8  ;;  %v1562_v44 = vld [vmem:[%s2006_s0 + $0x158] ss:$12 sps:$4 sm:$0xff]   ;;  %v1563_v46 = vld [vmem:[%s2006_s0 + $0x170] ss:$12 sps:$4 sm:$0xff]   ;;  %v1534_v49 = vld [vmem:[%s2006_s0 + $0xa8] ss:$12 sps:$4 sm:$0xff]  }
  0x11   :  { %v1529_v47 = vld [vmem:[%s2006_s0 + $0x90] ss:$12 sps:$4 sm:$0xff]   ;;  %v1532_v48 = vld [vmem:[%s2006_s0 + $0xac] ss:$12 sps:$4 sm:$0xff]   ;;  %v1543_v54 = vld [vmem:[%s2006_s0 + $0xf4] ss:$12 sps:$4 sm:$0xff]  }
  0x12   :  { %v1535_v50 = vld [vmem:[%s2006_s0 + $0xc4] ss:$12 sps:$4 sm:$0xff]   ;;  %v1537_v51 = vld [vmem:[%s2006_s0 + $0xc0] ss:$12 sps:$4 sm:$0xff]   ;;  %v1540_v52 = vld [vmem:[%s2006_s0 + $0xdc] ss:$12 sps:$4 sm:$0xff]  }
  0x13   :  { %1274 = vmatpush3.bf16.msra.mxu0 %v1494_v9  ;;  %v1542_v53 = vld [vmem:[%s2006_s0 + $0xd8] ss:$12 sps:$4 sm:$0xff]   ;;  %v1545_v55 = vld [vmem:[%s2006_s0 + $0xf0] ss:$12 sps:$4 sm:$0xff]   ;;  %v1567_v57 = vld [vmem:[%s2007_s3 + $0x8] sm:$0xff]  }
  0x14   :  { %1275 = vmatprep.subr.bf16.mxu0 %v1495_v11  ;;  %1422 = vmatmul.mubr.msk.bf16.gmra.mxu1 %vm476_vm0, %v1515_v23  ;;  %v1548_v56 = vld [vmem:[%s2006_s0 + $0x10c] ss:$12 sps:$4 sm:$0xff]   ;;  %v1568_v58 = vld [vmem:[%s2007_s3] sm:$0xff]   ;;  %v1550_v59 = vld [vmem:[%s2006_s0 + $0x108] ss:$12 sps:$4 sm:$0xff]  }
  0x15   :  { %1425 = vmatprep.mubr.msk.bf16.mxu1 %vm476_vm0, %v1522_v24  ;;  %1449 = vmatprep.subr.bf16.mxu1 %v1567_v57  ;;  %v1551_v60 = vld [vmem:[%s2006_s0 + $0x124] ss:$12 sps:$4 sm:$0xff]   ;;  %v1553_v61 = vld [vmem:[%s2006_s0 + $0x120] ss:$12 sps:$4 sm:$0xff]   ;;  %v1556_v62 = vld [vmem:[%s2006_s0 + $0x13c] ss:$12 sps:$4 sm:$0xff]  }
  0x16   :  { %1450 = vmatpush3.bf16.msra.mxu1 %v1567_v57  ;;  %v1558_v63 = vld [vmem:[%s2006_s0 + $0x138] ss:$12 sps:$4 sm:$0xff]   ;;  %v1559_v0 = vld [vmem:[%s2006_s0 + $0x154] ss:$12 sps:$4 sm:$0xff]   ;;  %v1561_v1 = vld [vmem:[%s2006_s0 + $0x150] ss:$12 sps:$4 sm:$0xff]  }
  0x17   :  { %1276 = vmatpush3.bf16.msra.mxu0 %v1496_v12  ;;  %1451 = vmatprep.subr.bf16.mxu1 %v1568_v58  ;;  %v1564_v2 = vld [vmem:[%s2006_s0 + $0x16c] ss:$12 sps:$4 sm:$0xff]   ;;  %v1566_v3 = vld [vmem:[%s2006_s0 + $0x168] ss:$12 sps:$4 sm:$0xff]   ;;  %v1822_v8 = vld [vmem:[%s2008_s2] ss:$0 sm:$0xff] }
  0x18   :  { %1277 = vmatprep.subr.bf16.mxu0 %v1497_v13 }
  0x1a   :  { %1452 = vmatpush3.bf16.msra.mxu1 %v1568_v58 }
  0x1b   :  { %1278 = vmatpush3.bf16.msra.mxu0 %v1498_v18 }
  0x1c   :  { %1279 = vmatprep.subr.bf16.mxu0 %v1499_v19  ;;  %1426 = vmatmul.mubr.msk.bf16.gmra.mxu1 %vm476_vm0, %v1523_v27 }
  0x1d   :  { %1429 = vmatprep.mubr.msk.bf16.mxu1 %vm476_vm0, %v1530_v28 }
  0x1f   :  { %1280 = vmatpush3.bf16.msra.mxu0 %v1501_v21 }
  0x22   :  { %558 = vmatmul.mubr.bf16.vlgmr.msra.gmra.mxu0 %v1502_v22 }
  0x23   :  { %565 = vmatprep.mubr.bf16.mxu0 %v1508_v25 }
  0x24   :  { %1430 = vmatmul.mubr.msk.bf16.gmra.mxu1 %vm476_vm0, %v1531_v31 }
  0x25   :  { %1433 = vmatprep.mubr.msk.bf16.mxu1 %vm476_vm0, %v1538_v32 }
  0x2a   :  { %566 = vmatmul.mubr.bf16.gmra.mxu0 %v1510_v26 }
  0x2b   :  { %573 = vmatprep.mubr.bf16.mxu0 %v1511_v29 }
  0x2c   :  { %1434 = vmatmul.mubr.msk.bf16.gmra.mxu1 %vm476_vm0, %v1539_v35 }
  0x2d   :  { %1437 = vmatprep.mubr.msk.bf16.mxu1 %vm476_vm0, %v1546_v36 }
  0x32   :  { %574 = vmatmul.mubr.bf16.gmra.mxu0 %v1513_v30 }
  0x33   :  { %581 = vmatprep.mubr.bf16.mxu0 %v1516_v33 }
  0x34   :  { %1438 = vmatmul.mubr.msk.bf16.gmra.mxu1 %vm476_vm0, %v1547_v38 }
  0x35   :  { %1441 = vmatprep.mubr.msk.bf16.mxu1 %vm476_vm0, %v1554_v40 }
  0x3a   :  { %582 = vmatmul.mubr.bf16.gmra.mxu0 %v1518_v34 }
  0x3b   :  { %589 = vmatprep.mubr.bf16.mxu0 %v1519_v37 }
  0x3c   :  { %1442 = vmatmul.mubr.msk.bf16.gmra.mxu1 %vm476_vm0, %v1555_v42 }
  0x3d   :  { %1445 = vmatprep.mubr.msk.bf16.mxu1 %vm476_vm0, %v1562_v44 }
  0x42   :  { %590 = vmatmul.mubr.bf16.gmra.mxu0 %v1521_v39 }
  0x43   :  { %597 = vmatprep.mubr.bf16.mxu0 %v1524_v41 }
  0x44   :  { %1446 = vmatmul.mubr.msk.bf16.gmra.mxu1 %vm476_vm0, %v1563_v46 }
  0x4a   :  { %598 = vmatmul.mubr.bf16.gmra.mxu0 %v1526_v43 }
  0x4b   :  { %605 = vmatprep.mubr.bf16.mxu0 %v1527_v45 }
  0x52   :  { %606 = vmatmul.mubr.bf16.gmra.mxu0 %v1529_v47 }
  0x53   :  { %613 = vmatprep.mubr.bf16.mxu0 %v1532_v48 }
  0x5a   :  { %614 = vmatmul.mubr.bf16.gmra.mxu0 %v1534_v49 }
  0x5b   :  { %621 = vmatprep.mubr.bf16.mxu0 %v1535_v50 }
  0x62   :  { %622 = vmatmul.mubr.bf16.gmra.mxu0 %v1537_v51 }
  0x63   :  { %629 = vmatprep.mubr.bf16.mxu0 %v1540_v52 }
  0x6a   :  { %630 = vmatmul.mubr.bf16.gmra.mxu0 %v1542_v53 }
  0x6b   :  { %637 = vmatprep.mubr.bf16.mxu0 %v1543_v54 }
  0x72   :  { %638 = vmatmul.mubr.bf16.gmra.mxu0 %v1545_v55 }
  0x73   :  { %645 = vmatprep.mubr.bf16.mxu0 %v1548_v56 }
  0x7a   :  { %646 = vmatmul.mubr.bf16.gmra.mxu0 %v1550_v59 }
  0x7b   :  { %653 = vmatprep.mubr.bf16.mxu0 %v1551_v60 }
  0x82   :  { %654 = vmatmul.mubr.bf16.gmra.mxu0 %v1553_v61 }
  0x83   :  { %661 = vmatprep.mubr.bf16.mxu0 %v1556_v62 }
  0x8a   :  { %662 = vmatmul.mubr.bf16.gmra.mxu0 %v1558_v63 }
  0x8b   :  { %669 = vmatprep.mubr.bf16.mxu0 %v1559_v0 }
  0x92   :  { %670 = vmatmul.mubr.bf16.gmra.mxu0 %v1561_v1 }
  0x93   :  { %677 = vmatprep.mubr.bf16.mxu0 %v1564_v2 }
  0x9a   :  { %678 = vmatmul.mubr.bf16.gmra.mxu0 %v1566_v3 }
  0xcc   :  { %v1419_v4 = vpop.f32.mrf.mxu1 }
  0xce   :  { %v720_v6 = vpop.f32.mrf.mxu1 }
  0xd0   :  { %v1420_v11 = vpop.f32.mrf.mxu1 }
  0xd2   :  { %v723_v16 = vpop.f32.mrf.mxu1 }
  0xd4   :  { %v1423_v23 = vpop.f32.mrf.mxu1 }
  0xd6   :  { %v736_v31 = vpop.f32.mrf.mxu1 }
  0xd8   :  { %v1424_v38 = vpop.f32.mrf.mxu1 }
  0xda   :  { %v739_v46 = vpop.f32.mrf.mxu1 }
  0xdc   :  { %v1427_v53 = vpop.f32.mrf.mxu1 }
  0xde   :  { %v752_v61 = vpop.f32.mrf.mxu1 }
  0xe2   :  { %v1281_v5 = vpop.f32.mrf.mxu0 }
  0xe4   :  { %v1282_v7 = vpop.f32.mrf.mxu0 }
  0xe5   :  { %v1283_v9 = vadd.f32 %v1282_v7, %v1281_v5 }
  0xe6   :  { %v1284_v10 = vpop.f32.mrf.mxu0 }
  0xe7   :  { %v560_v12 = vadd.f32 %v1283_v9, %v1822_v8 }
  0xe8   :  { %v1285_v13 = vpop.f32.mrf.mxu0 }
  0xe9   :  { %v1286_v14 = vadd.f32 %v1285_v13, %v1284_v10  ;;  %v721_v17 = vadd.f32 %v720_v6, %v560_v12 }
  0xea   :  { %v1287_v15 = vpop.f32.mrf.mxu0 }
  0xeb   :  { %v563_v18 = vadd.f32 %v1286_v14, %v1822_v8  ;;  %v847_v24 = vmax.f32 %v721_v17, 0.0 }
  0xec   :  { %v1288_v19 = vpop.f32.mrf.mxu0 }
  0xed   :  { %v1289_v20 = vadd.f32 %v1288_v19, %v1287_v15  ;;  %v724_v21 = vadd.f32 %v723_v16, %v563_v18 }
  0xee   :  { %v1290_v22 = vpop.f32.mrf.mxu0 }
  0xef   :  { %v568_v25 = vadd.f32 %v1289_v20, %v1822_v8  ;;  %v848_v26 = vmax.f32 %v724_v21, 0.0 }
  0xf0   :  { %v1291_v27 = vpop.f32.mrf.mxu0 }
  0xf1   :  { %v879_v28 = vpack.c.bf16 %v848_v26, %v847_v24  ;;  %v1292_v29 = vadd.f32 %v1291_v27, %v1290_v22  ;;  %v729_v32 = vadd.f32 %v1419_v4, %v568_v25  ;;  %v1428_v4 = vpop.f32.mrf.mxu1 }
  0xf2   :  { %v1293_v30 = vpop.f32.mrf.mxu0 }
  0xf3   :  { %v571_v33 = vadd.f32 %v1292_v29, %v1822_v8  ;;  %1453 = vmatprep.mubr.msk.bf16.mxu1 %vm476_vm0, %v879_v28  ;;  %v849_v39 = vmax.f32 %v729_v32, 0.0  ;;  %v755_v13 = vpop.f32.mrf.mxu1 }
  0xf4   :  { %v1294_v34 = vpop.f32.mrf.mxu0 }
  0xf5   :  { %v732_v35 = vadd.f32 %v1420_v11, %v571_v33  ;;  %v1295_v36 = vadd.f32 %v1294_v34, %v1293_v30  ;;  %v1431_v20 = vpop.f32.mrf.mxu1 }
  0xf6   :  { %v1296_v37 = vpop.f32.mrf.mxu0 }
  0xf7   :  { %v850_v40 = vmax.f32 %v732_v35, 0.0  ;;  %v576_v41 = vadd.f32 %v1295_v36, %v1822_v8  ;;  %v768_v28 = vpop.f32.mrf.mxu1 }
  0xf8   :  { %v1297_v42 = vpop.f32.mrf.mxu0 }
  0xf9   :  { %v880_v43 = vpack.c.bf16 %v850_v40, %v849_v39  ;;  %v1298_v44 = vadd.f32 %v1297_v42, %v1296_v37  ;;  %v737_v47 = vadd.f32 %v736_v31, %v576_v41  ;;  %v1432_v35 = vpop.f32.mrf.mxu1 }
  0xfa   :  { %v1299_v45 = vpop.f32.mrf.mxu0 }
  0xfb   :  { %1454 = vmatmul.mubr.msk.bf16.vlgmr.msra.gmra.mxu1 %vm476_vm0, %v880_v43  ;;  %v579_v48 = vadd.f32 %v1298_v44, %v1822_v8  ;;  %v851_v54 = vmax.f32 %v737_v47, 0.0  ;;  %v771_v43 = vpop.f32.mrf.mxu1 }
  0xfc   :  { %v1300_v49 = vpop.f32.mrf.mxu0 }
  0xfd   :  { %v1301_v50 = vadd.f32 %v1300_v49, %v1299_v45  ;;  %v740_v51 = vadd.f32 %v739_v46, %v579_v48 }
  0xfe   :  { %v1302_v52 = vpop.f32.mrf.mxu0 }
  0xff   :  { %v584_v55 = vadd.f32 %v1301_v50, %v1822_v8  ;;  %v852_v56 = vmax.f32 %v740_v51, 0.0  ;;  %v1435_v50 = vpop.f32.mrf.mxu1 }
 0x100   :  { %v1303_v57 = vpop.f32.mrf.mxu0 }
 0x101   :  { %v881_v58 = vpack.c.bf16 %v852_v56, %v851_v54  ;;  %v1304_v59 = vadd.f32 %v1303_v57, %v1302_v52  ;;  %v745_v62 = vadd.f32 %v1423_v23, %v584_v55 }
 0x102   :  { %v1305_v60 = vpop.f32.mrf.mxu0 }
 0x103   :  { %v587_v63 = vadd.f32 %v1304_v59, %v1822_v8  ;;  %1457 = vmatprep.mubr.msk.bf16.mxu1 %vm476_vm0, %v881_v58  ;;  %v853_v5 = vmax.f32 %v745_v62, 0.0  ;;  %v784_v58 = vpop.f32.mrf.mxu1 }
 0x104   :  { %v1306_v0 = vpop.f32.mrf.mxu0 }
 0x105   :  { %v748_v1 = vadd.f32 %v1424_v38, %v587_v63  ;;  %v1307_v2 = vadd.f32 %v1306_v0, %v1305_v60 }
 0x106   :  { %v1308_v3 = vpop.f32.mrf.mxu0 }
 0x107   :  { %v854_v6 = vmax.f32 %v748_v1, 0.0  ;;  %v592_v7 = vadd.f32 %v1307_v2, %v1822_v8  ;;  %v1436_v1 = vpop.f32.mrf.mxu1 }
 0x108   :  { %v1309_v9 = vpop.f32.mrf.mxu0 }
 0x109   :  { %v882_v10 = vpack.c.bf16 %v854_v6, %v853_v5  ;;  %v1310_v11 = vadd.f32 %v1309_v9, %v1308_v3  ;;  %v753_v14 = vadd.f32 %v752_v61, %v592_v7 }
 0x10a   :  { %v1311_v12 = vpop.f32.mrf.mxu0 }
 0x10b   :  { %1458 = vmatmul.mubr.msk.bf16.gmra.mxu1 %vm476_vm0, %v882_v10  ;;  %v595_v15 = vadd.f32 %v1310_v11, %v1822_v8  ;;  %v855_v21 = vmax.f32 %v753_v14, 0.0  ;;  %v787_v10 = vpop.f32.mrf.mxu1 }
 0x10c   :  { %v1312_v16 = vpop.f32.mrf.mxu0 }
 0x10d   :  { %v1313_v17 = vadd.f32 %v1312_v16, %v1311_v12  ;;  %v756_v18 = vadd.f32 %v755_v13, %v595_v15 }
 0x10e   :  { %v1314_v19 = vpop.f32.mrf.mxu0 }
 0x10f   :  { %v600_v22 = vadd.f32 %v1313_v17, %v1822_v8  ;;  %v856_v23 = vmax.f32 %v756_v18, 0.0  ;;  %v1439_v17 = vpop.f32.mrf.mxu1 }
 0x110   :  { %v1315_v24 = vpop.f32.mrf.mxu0 }
 0x111   :  { %v883_v25 = vpack.c.bf16 %v856_v23, %v855_v21  ;;  %v1316_v26 = vadd.f32 %v1315_v24, %v1314_v19  ;;  %v761_v29 = vadd.f32 %v1427_v53, %v600_v22 }
 0x112   :  { %v1317_v27 = vpop.f32.mrf.mxu0 }
 0x113   :  { %v603_v30 = vadd.f32 %v1316_v26, %v1822_v8  ;;  %1461 = vmatprep.mubr.msk.bf16.mxu1 %vm476_vm0, %v883_v25  ;;  %v857_v36 = vmax.f32 %v761_v29, 0.0  ;;  %v800_v25 = vpop.f32.mrf.mxu1 }
 0x114   :  { %v1318_v31 = vpop.f32.mrf.mxu0 }
 0x115   :  { %v764_v32 = vadd.f32 %v1428_v4, %v603_v30  ;;  %v1319_v33 = vadd.f32 %v1318_v31, %v1317_v27 }
 0x116   :  { %v1320_v34 = vpop.f32.mrf.mxu0 }
 0x117   :  { %v858_v37 = vmax.f32 %v764_v32, 0.0  ;;  %v608_v38 = vadd.f32 %v1319_v33, %v1822_v8  ;;  %v1440_v32 = vpop.f32.mrf.mxu1 }
 0x118   :  { %v1321_v39 = vpop.f32.mrf.mxu0 }
 0x119   :  { %v884_v40 = vpack.c.bf16 %v858_v37, %v857_v36  ;;  %v1322_v41 = vadd.f32 %v1321_v39, %v1320_v34  ;;  %v769_v44 = vadd.f32 %v768_v28, %v608_v38 }
 0x11a   :  { %v1323_v42 = vpop.f32.mrf.mxu0 }
 0x11b   :  { %1462 = vmatmul.mubr.msk.bf16.gmra.mxu1 %vm476_vm0, %v884_v40  ;;  %v611_v45 = vadd.f32 %v1322_v41, %v1822_v8  ;;  %v859_v51 = vmax.f32 %v769_v44, 0.0  ;;  %v803_v40 = vpop.f32.mrf.mxu1 }
 0x11c   :  { %v1324_v46 = vpop.f32.mrf.mxu0 }
 0x11d   :  { %v1325_v47 = vadd.f32 %v1324_v46, %v1323_v42  ;;  %v772_v48 = vadd.f32 %v771_v43, %v611_v45 }
 0x11e   :  { %v1326_v49 = vpop.f32.mrf.mxu0 }
 0x11f   :  { %v616_v52 = vadd.f32 %v1325_v47, %v1822_v8  ;;  %v860_v53 = vmax.f32 %v772_v48, 0.0  ;;  %v1443_v47 = vpop.f32.mrf.mxu1 }
 0x120   :  { %v1327_v54 = vpop.f32.mrf.mxu0 }
 0x121   :  { %v885_v55 = vpack.c.bf16 %v860_v53, %v859_v51  ;;  %v1328_v56 = vadd.f32 %v1327_v54, %v1326_v49  ;;  %v777_v59 = vadd.f32 %v1431_v20, %v616_v52 }
 0x122   :  { %v1329_v57 = vpop.f32.mrf.mxu0 }
 0x123   :  { %v619_v60 = vadd.f32 %v1328_v56, %v1822_v8  ;;  %1465 = vmatprep.mubr.msk.bf16.mxu1 %vm476_vm0, %v885_v55  ;;  %v861_v2 = vmax.f32 %v777_v59, 0.0  ;;  %v816_v55 = vpop.f32.mrf.mxu1 }
 0x124   :  { %v1330_v61 = vpop.f32.mrf.mxu0 }
 0x125   :  { %v780_v62 = vadd.f32 %v1432_v35, %v619_v60  ;;  %v1331_v63 = vadd.f32 %v1330_v61, %v1329_v57 }
 0x126   :  { %v1332_v0 = vpop.f32.mrf.mxu0 }
 0x127   :  { %v862_v3 = vmax.f32 %v780_v62, 0.0  ;;  %v624_v4 = vadd.f32 %v1331_v63, %v1822_v8  ;;  %v1444_v62 = vpop.f32.mrf.mxu1 }
 0x128   :  { %v1333_v5 = vpop.f32.mrf.mxu0 }
 0x129   :  { %v886_v6 = vpack.c.bf16 %v862_v3, %v861_v2  ;;  %v1334_v7 = vadd.f32 %v1333_v5, %v1332_v0  ;;  %v785_v11 = vadd.f32 %v784_v58, %v624_v4 }
 0x12a   :  { %v1335_v9 = vpop.f32.mrf.mxu0 }
 0x12b   :  { %1466 = vmatmul.mubr.msk.bf16.gmra.mxu1 %vm476_vm0, %v886_v6  ;;  %v627_v12 = vadd.f32 %v1334_v7, %v1822_v8  ;;  %v863_v18 = vmax.f32 %v785_v11, 0.0  ;;  %v819_v6 = vpop.f32.mrf.mxu1 }
 0x12c   :  { %v1336_v13 = vpop.f32.mrf.mxu0 }
 0x12d   :  { %v1337_v14 = vadd.f32 %v1336_v13, %v1335_v9  ;;  %v788_v15 = vadd.f32 %v787_v10, %v627_v12 }
 0x12e   :  { %v1338_v16 = vpop.f32.mrf.mxu0 }
 0x12f   :  { %v632_v19 = vadd.f32 %v1337_v14, %v1822_v8  ;;  %v864_v20 = vmax.f32 %v788_v15, 0.0  ;;  %v1447_v14 = vpop.f32.mrf.mxu1 }
 0x130   :  { %v1339_v21 = vpop.f32.mrf.mxu0 }
 0x131   :  { %v887_v22 = vpack.c.bf16 %v864_v20, %v863_v18  ;;  %v1340_v23 = vadd.f32 %v1339_v21, %v1338_v16  ;;  %v793_v26 = vadd.f32 %v1435_v50, %v632_v19 }
 0x132   :  { %v1341_v24 = vpop.f32.mrf.mxu0 }
 0x133   :  { %v635_v27 = vadd.f32 %v1340_v23, %v1822_v8  ;;  %1469 = vmatprep.mubr.msk.bf16.mxu1 %vm476_vm0, %v887_v22  ;;  %v865_v33 = vmax.f32 %v793_v26, 0.0  ;;  %v832_v22 = vpop.f32.mrf.mxu1 }
 0x134   :  { %v1342_v28 = vpop.f32.mrf.mxu0 }
 0x135   :  { %v796_v29 = vadd.f32 %v1436_v1, %v635_v27  ;;  %v1343_v30 = vadd.f32 %v1342_v28, %v1341_v24 }
 0x136   :  { %v1344_v31 = vpop.f32.mrf.mxu0 }
 0x137   :  { %v866_v34 = vmax.f32 %v796_v29, 0.0  ;;  %v640_v35 = vadd.f32 %v1343_v30, %v1822_v8  ;;  %v1448_v29 = vpop.f32.mrf.mxu1 }
 0x138   :  { %v1345_v36 = vpop.f32.mrf.mxu0 }
 0x139   :  { %v888_v37 = vpack.c.bf16 %v866_v34, %v865_v33  ;;  %v1346_v38 = vadd.f32 %v1345_v36, %v1344_v31  ;;  %v801_v41 = vadd.f32 %v800_v25, %v640_v35 }
 0x13a   :  { %v1347_v39 = vpop.f32.mrf.mxu0 }
 0x13b   :  { %1470 = vmatmul.mubr.msk.bf16.gmra.mxu1 %vm476_vm0, %v888_v37  ;;  %v643_v42 = vadd.f32 %v1346_v38, %v1822_v8  ;;  %v867_v48 = vmax.f32 %v801_v41, 0.0  ;;  %v835_v37 = vpop.f32.mrf.mxu1 }
 0x13c   :  { %v1348_v43 = vpop.f32.mrf.mxu0 }
 0x13d   :  { %v1349_v44 = vadd.f32 %v1348_v43, %v1347_v39  ;;  %v804_v45 = vadd.f32 %v803_v40, %v643_v42 }
 0x13e   :  { %v1350_v46 = vpop.f32.mrf.mxu0 }
 0x13f   :  { %v648_v49 = vadd.f32 %v1349_v44, %v1822_v8  ;;  %v868_v50 = vmax.f32 %v804_v45, 0.0 }
 0x140   :  { %v1351_v51 = vpop.f32.mrf.mxu0 }
 0x141   :  { %v889_v52 = vpack.c.bf16 %v868_v50, %v867_v48  ;;  %v1352_v53 = vadd.f32 %v1351_v51, %v1350_v46  ;;  %v809_v56 = vadd.f32 %v1439_v17, %v648_v49 }
 0x142   :  { %v1353_v54 = vpop.f32.mrf.mxu0 }
 0x143   :  { %v651_v57 = vadd.f32 %v1352_v53, %v1822_v8  ;;  %1473 = vmatprep.mubr.msk.bf16.mxu1 %vm476_vm0, %v889_v52  ;;  %v869_v63 = vmax.f32 %v809_v56, 0.0  ;;  %v1875_v56 = vld [vmem:[%s2009_s4] ss:$0 sm:$0xff] }
 0x144   :  { %v1354_v58 = vpop.f32.mrf.mxu0 }
 0x145   :  { %v812_v59 = vadd.f32 %v1440_v32, %v651_v57  ;;  %v1355_v60 = vadd.f32 %v1354_v58, %v1353_v54 }
 0x146   :  { %v1356_v61 = vpop.f32.mrf.mxu0 }
 0x147   :  { %v870_v0 = vmax.f32 %v812_v59, 0.0  ;;  %v656_v1 = vadd.f32 %v1355_v60, %v1822_v8 }
 0x148   :  { %v1357_v2 = vpop.f32.mrf.mxu0 }
 0x149   :  { %v890_v3 = vpack.c.bf16 %v870_v0, %v869_v63  ;;  %v1358_v4 = vadd.f32 %v1357_v2, %v1356_v61  ;;  %v817_v7 = vadd.f32 %v816_v55, %v656_v1 }
 0x14a   :  { %v1359_v5 = vpop.f32.mrf.mxu0 }
 0x14b   :  { %1474 = vmatmul.mubr.msk.bf16.gmra.mxu1 %vm476_vm0, %v890_v3  ;;  %v659_v9 = vadd.f32 %v1358_v4, %v1822_v8  ;;  %v871_v15 = vmax.f32 %v817_v7, 0.0 }
 0x14c   :  { %v1360_v10 = vpop.f32.mrf.mxu0 }
 0x14d   :  { %v1361_v11 = vadd.f32 %v1360_v10, %v1359_v5  ;;  %v820_v12 = vadd.f32 %v819_v6, %v659_v9 }
 0x14e   :  { %v1362_v13 = vpop.f32.mrf.mxu0 }
 0x14f   :  { %v664_v16 = vadd.f32 %v1361_v11, %v1822_v8  ;;  %v872_v17 = vmax.f32 %v820_v12, 0.0 }
 0x150   :  { %v1363_v18 = vpop.f32.mrf.mxu0 }
 0x151   :  { %v891_v19 = vpack.c.bf16 %v872_v17, %v871_v15  ;;  %v1364_v20 = vadd.f32 %v1363_v18, %v1362_v13  ;;  %v825_v23 = vadd.f32 %v1443_v47, %v664_v16 }
 0x152   :  { %v1365_v21 = vpop.f32.mrf.mxu0 }
 0x153   :  { %v667_v24 = vadd.f32 %v1364_v20, %v1822_v8  ;;  %1477 = vmatprep.mubr.msk.bf16.mxu1 %vm476_vm0, %v891_v19  ;;  %v873_v30 = vmax.f32 %v825_v23, 0.0 }
 0x154   :  { %v1366_v25 = vpop.f32.mrf.mxu0 }
 0x155   :  { %v828_v26 = vadd.f32 %v1444_v62, %v667_v24  ;;  %v1367_v27 = vadd.f32 %v1366_v25, %v1365_v21 }
 0x156   :  { %v1368_v28 = vpop.f32.mrf.mxu0 }
 0x157   :  { %v874_v31 = vmax.f32 %v828_v26, 0.0  ;;  %v672_v32 = vadd.f32 %v1367_v27, %v1822_v8 }
 0x158   :  { %v1369_v33 = vpop.f32.mrf.mxu0 }
 0x159   :  { %v892_v34 = vpack.c.bf16 %v874_v31, %v873_v30  ;;  %v1370_v35 = vadd.f32 %v1369_v33, %v1368_v28  ;;  %v833_v38 = vadd.f32 %v832_v22, %v672_v32 }
 0x15a   :  { %v1371_v36 = vpop.f32.mrf.mxu0 }
 0x15b   :  { %1478 = vmatmul.mubr.msk.bf16.gmra.mxu1 %vm476_vm0, %v892_v34  ;;  %v675_v39 = vadd.f32 %v1370_v35, %v1822_v8  ;;  %v875_v44 = vmax.f32 %v833_v38, 0.0 }
 0x15c   :  { %v1372_v40 = vpop.f32.mrf.mxu0 }
 0x15d   :  { %v1373_v41 = vadd.f32 %v1372_v40, %v1371_v36  ;;  %v836_v42 = vadd.f32 %v835_v37, %v675_v39 }
 0x15e   :  { %v1374_v43 = vpop.f32.mrf.mxu0 }
 0x15f   :  { %v680_v45 = vadd.f32 %v1373_v41, %v1822_v8  ;;  %v876_v46 = vmax.f32 %v836_v42, 0.0 }
 0x160   :  { %v1375_v47 = vpop.f32.mrf.mxu0 }
 0x161   :  { %v893_v48 = vpack.c.bf16 %v876_v46, %v875_v44  ;;  %v1376_v49 = vadd.f32 %v1375_v47, %v1374_v43  ;;  %v841_v50 = vadd.f32 %v1447_v14, %v680_v45 }
 0x163   :  { %v683_v51 = vadd.f32 %v1376_v49, %v1822_v8  ;;  %1481 = vmatprep.mubr.msk.bf16.mxu1 %vm476_vm0, %v893_v48  ;;  %v877_v53 = vmax.f32 %v841_v50, 0.0 }
 0x165   :  { %v844_v52 = vadd.f32 %v1448_v29, %v683_v51 }
 0x167   :  { %v878_v54 = vmax.f32 %v844_v52, 0.0 }
 0x169   :  { %v894_v55 = vpack.c.bf16 %v878_v54, %v877_v53 }
 0x16b   :  { %1482 = vmatmul.mubr.msk.bf16.gmra.mxu1 %vm476_vm0, %v894_v55 }
 0x1bb   :  { %v1455_v57 = vpop.f32.mrf.mxu1 }
 0x1bc   :  { %v1009_v58 = vadd.f32 %v1455_v57, %v1875_v56 }
 0x1bd   :  { %v1000_v59 = vpop.f32.mrf.mxu1 }
 0x1be   :  { %1129 = vst [vmem:[%s2010_s5 + $0x10] sm:$0xff] %v1009_v58  ;;  %v1001_v8 = vadd.f32 %v1875_v56, %v1000_v59 }
 0x1bf   :  { %v1456_v60 = vpop.f32.mrf.mxu1 }
 0x1c0   :  { %1127 = vst [vmem:[%s2010_s5] sm:$0xff] %v1001_v8  ;;  %v1012_v61 = vadd.f32 %v1456_v60, %v1875_v56 }
 0x1c1   :  { %v1003_v62 = vpop.f32.mrf.mxu1 }
 0x1c2   :  { %1130 = vst [vmem:[%s2010_s5 + $0x18] sm:$0xff] %v1012_v61  ;;  %v1004_v63 = vadd.f32 %v1875_v56, %v1003_v62 }
 0x1c4   :  { %1128 = vst [vmem:[%s2010_s5 + $0x8] sm:$0xff] %v1004_v63 }
 0x1cb   :  { %v1459_v0 = vpop.f32.mrf.mxu1 }
 0x1cc   :  { %v1025_v1 = vadd.f32 %v1459_v0, %v1875_v56 }
 0x1cd   :  { %v1016_v2 = vpop.f32.mrf.mxu1 }
 0x1ce   :  { %1133 = vst [vmem:[%s2010_s5 + $0x30] sm:$0xff] %v1025_v1  ;;  %v1017_v3 = vadd.f32 %v1875_v56, %v1016_v2 }
 0x1cf   :  { %v1460_v4 = vpop.f32.mrf.mxu1 }
 0x1d0   :  { %1131 = vst [vmem:[%s2010_s5 + $0x20] sm:$0xff] %v1017_v3  ;;  %v1028_v5 = vadd.f32 %v1460_v4, %v1875_v56 }
 0x1d1   :  { %v1019_v6 = vpop.f32.mrf.mxu1 }
 0x1d2   :  { %1134 = vst [vmem:[%s2010_s5 + $0x38] sm:$0xff] %v1028_v5  ;;  %v1020_v7 = vadd.f32 %v1875_v56, %v1019_v6 }
 0x1d4   :  { %1132 = vst [vmem:[%s2010_s5 + $0x28] sm:$0xff] %v1020_v7 }
 0x1db   :  { %v1463_v9 = vpop.f32.mrf.mxu1 }
 0x1dc   :  { %v1041_v10 = vadd.f32 %v1463_v9, %v1875_v56 }
 0x1dd   :  { %v1032_v11 = vpop.f32.mrf.mxu1 }
 0x1de   :  { %1137 = vst [vmem:[%s2010_s5 + $0x50] sm:$0xff] %v1041_v10  ;;  %v1033_v12 = vadd.f32 %v1875_v56, %v1032_v11 }
 0x1df   :  { %v1464_v13 = vpop.f32.mrf.mxu1 }
 0x1e0   :  { %1135 = vst [vmem:[%s2010_s5 + $0x40] sm:$0xff] %v1033_v12  ;;  %v1044_v14 = vadd.f32 %v1464_v13, %v1875_v56 }
 0x1e1   :  { %v1035_v15 = vpop.f32.mrf.mxu1 }
 0x1e2   :  { %1138 = vst [vmem:[%s2010_s5 + $0x58] sm:$0xff] %v1044_v14  ;;  %v1036_v16 = vadd.f32 %v1875_v56, %v1035_v15 }
 0x1e4   :  { %1136 = vst [vmem:[%s2010_s5 + $0x48] sm:$0xff] %v1036_v16 }
 0x1eb   :  { %v1467_v17 = vpop.f32.mrf.mxu1 }
 0x1ec   :  { %v1057_v18 = vadd.f32 %v1467_v17, %v1875_v56 }
 0x1ed   :  { %v1048_v19 = vpop.f32.mrf.mxu1 }
 0x1ee   :  { %1141 = vst [vmem:[%s2010_s5 + $0x70] sm:$0xff] %v1057_v18  ;;  %v1049_v20 = vadd.f32 %v1875_v56, %v1048_v19 }
 0x1ef   :  { %v1468_v21 = vpop.f32.mrf.mxu1 }
 0x1f0   :  { %1139 = vst [vmem:[%s2010_s5 + $0x60] sm:$0xff] %v1049_v20  ;;  %v1060_v22 = vadd.f32 %v1468_v21, %v1875_v56 }
 0x1f1   :  { %v1051_v23 = vpop.f32.mrf.mxu1 }
 0x1f2   :  { %1142 = vst [vmem:[%s2010_s5 + $0x78] sm:$0xff] %v1060_v22  ;;  %v1052_v24 = vadd.f32 %v1875_v56, %v1051_v23 }
 0x1f4   :  { %1140 = vst [vmem:[%s2010_s5 + $0x68] sm:$0xff] %v1052_v24 }
 0x1fb   :  { %v1471_v25 = vpop.f32.mrf.mxu1 }
 0x1fc   :  { %v1073_v26 = vadd.f32 %v1471_v25, %v1875_v56 }
 0x1fd   :  { %v1064_v27 = vpop.f32.mrf.mxu1 }
 0x1fe   :  { %1145 = vst [vmem:[%s2010_s5 + $0x90] sm:$0xff] %v1073_v26  ;;  %v1065_v28 = vadd.f32 %v1875_v56, %v1064_v27 }
 0x1ff   :  { %v1472_v29 = vpop.f32.mrf.mxu1 }
 0x200   :  { %1143 = vst [vmem:[%s2010_s5 + $0x80] sm:$0xff] %v1065_v28  ;;  %v1076_v30 = vadd.f32 %v1472_v29, %v1875_v56 }
 0x201   :  { %v1067_v31 = vpop.f32.mrf.mxu1 }
 0x202   :  { %1146 = vst [vmem:[%s2010_s5 + $0x98] sm:$0xff] %v1076_v30  ;;  %v1068_v32 = vadd.f32 %v1875_v56, %v1067_v31 }
 0x204   :  { %1144 = vst [vmem:[%s2010_s5 + $0x88] sm:$0xff] %v1068_v32 }
 0x20b   :  { %v1475_v33 = vpop.f32.mrf.mxu1 }
 0x20c   :  { %v1089_v34 = vadd.f32 %v1475_v33, %v1875_v56 }
 0x20d   :  { %v1080_v35 = vpop.f32.mrf.mxu1 }
 0x20e   :  { %1149 = vst [vmem:[%s2010_s5 + $0xb0] sm:$0xff] %v1089_v34  ;;  %v1081_v36 = vadd.f32 %v1875_v56, %v1080_v35 }
 0x20f   :  { %v1476_v37 = vpop.f32.mrf.mxu1 }
 0x210   :  { %1147 = vst [vmem:[%s2010_s5 + $0xa0] sm:$0xff] %v1081_v36  ;;  %v1092_v38 = vadd.f32 %v1476_v37, %v1875_v56 }
 0x211   :  { %v1083_v39 = vpop.f32.mrf.mxu1 }
 0x212   :  { %1150 = vst [vmem:[%s2010_s5 + $0xb8] sm:$0xff] %v1092_v38  ;;  %v1084_v40 = vadd.f32 %v1875_v56, %v1083_v39 }
 0x214   :  { %1148 = vst [vmem:[%s2010_s5 + $0xa8] sm:$0xff] %v1084_v40 }
 0x21b   :  { %v1479_v41 = vpop.f32.mrf.mxu1 }
 0x21c   :  { %v1105_v42 = vadd.f32 %v1479_v41, %v1875_v56 }
 0x21d   :  { %v1096_v43 = vpop.f32.mrf.mxu1 }
 0x21e   :  { %1153 = vst [vmem:[%s2010_s5 + $0xd0] sm:$0xff] %v1105_v42  ;;  %v1097_v44 = vadd.f32 %v1875_v56, %v1096_v43 }
 0x21f   :  { %v1480_v45 = vpop.f32.mrf.mxu1 }
 0x220   :  { %1151 = vst [vmem:[%s2010_s5 + $0xc0] sm:$0xff] %v1097_v44  ;;  %v1108_v46 = vadd.f32 %v1480_v45, %v1875_v56 }
 0x221   :  { %v1099_v47 = vpop.f32.mrf.mxu1 }
 0x222   :  { %1154 = vst [vmem:[%s2010_s5 + $0xd8] sm:$0xff] %v1108_v46  ;;  %v1100_v48 = vadd.f32 %v1875_v56, %v1099_v47 }
 0x224   :  { %1152 = vst [vmem:[%s2010_s5 + $0xc8] sm:$0xff] %v1100_v48 }
 0x22b   :  { %v1483_v49 = vpop.f32.mrf.mxu1 }
 0x22c   :  { %v1121_v50 = vadd.f32 %v1483_v49, %v1875_v56 }
 0x22d   :  { %v1112_v51 = vpop.f32.mrf.mxu1 }
 0x22e   :  { %1157 = vst [vmem:[%s2010_s5 + $0xf0] sm:$0xff] %v1121_v50  ;;  %v1113_v52 = vadd.f32 %v1875_v56, %v1112_v51 }
 0x22f   :  { %v1484_v53 = vpop.f32.mrf.mxu1 }
 0x230   :  { %1155 = vst [vmem:[%s2010_s5 + $0xe0] sm:$0xff] %v1113_v52  ;;  %v1124_v54 = vadd.f32 %v1484_v53, %v1875_v56 }
 0x231   :  { %v1115_v55 = vpop.f32.mrf.mxu1 }
 0x232   :  { %1158 = vst [vmem:[%s2010_s5 + $0xf8] sm:$0xff] %v1124_v54  ;;  %v1116_v57 = vadd.f32 %v1875_v56, %v1115_v55 }
 0x234   :  { %1156 = vst [vmem:[%s2010_s5 + $0xe8] sm:$0xff] %v1116_v57 }

// kernel: neg.18
= control target key start
LH: loop header
LB: loop body
LE: loop exit
PB: predicated region body
PF: predicated region fallthrough
CT: control target
= control target key end

     0   :  { %s24_s0 = inlined_call_operand.vmem [shape: f32[6,1], index: 0, kind: input, shape index: {}]   ;;  %s25_s1 = inlined_call_operand.vmem [shape: f32[6,1], index: 1, kind: output, shape index: {}]  }
   0x1   :  { %v2_v0 = vld [vmem:[%s24_s0] sm:$0x1] }
   0x2   :  { %v5_v1 = vxor.u32 2147483648, %v2_v0 }
   0x4   :  { %7 = vst [vmem:[%s25_s1] sm:$0x1] %v5_v1 }

// kernel: rpn_forward.3
= control target key start
LH: loop header
LB: loop body
LE: loop exit
PB: predicated region body
PF: predicated region fallthrough
CT: control target
= control target key end

     0   :  { %10 = vsyncpa [#allocation4], 0  ;;  %s4359_s0 = inlined_call_operand.vmem [shape: f32[2], index: 0, kind: input, shape index: {}]   ;;  %s4360_s1 = inlined_call_operand.vmem [shape: f32[4,256], index: 1, kind: input, shape index: {}]   ;;  %s4361_s2 = inlined_call_operand.vmem [shape: f32[4,256], index: 2, kind: input, shape index: {}]   ;;  %s4362_s3 = inlined_call_operand.vmem [shape: f32[4,256], index: 3, kind: output, shape index: {0}]   ;;  %s4363_s4 = inlined_call_operand.vmem [shape: f32[1,256], index: 4, kind: output, shape index: {1}]  }
   0x1   :  { %s17_s17 = sshll.u32 %s4359_s0, 4  ;;  %s18_s17 = int_to_ptr.vmem [resolvable:$true] %s17_s17 }
   0x2   :  { %s2211_s18 = scalar_lea.vmem %s18_s17, 16  ;;  %p2216_p1 = scmp.lt.s32.totalorder %s18_s17, %s18_s17 }
   0x3   :  { %p2212_p0 = scmp.ne.s32.totalorder %s18_s17, %s2211_s18  ;;  %p2217_p2 = scmp.lt.s32.totalorder %s2211_s18, %s2211_s18 }
   0x5   :  { %p2218_p3 = por %p2217_p2, %p2216_p1 }
   0x7   :  { %p2219_p4 = pnand %p2218_p3, %p2212_p0 }
   0x9   :  { %2222 = shalt.err (!%p2219_p4)
}
   0xa   :  { %s2249_s19 = smov [#allocation3]  }
   0xb   :  { %20 = dma.vmem_to_smem %s18_s17, 16, %s2249_s19, [#allocation4]  }
   0xc   :  { %2235 = dma.done.wait [#allocation4], 16  }
   0xd   :  { %2236 = vsyncadd [#allocation4], 4294967280 }
   0xe   :  { %28 = sfence }
   0xf   :  { %v2009_v0 = vld [vmem:[%s4360_s1 + $0x2] ss:$4 sm:$0x3]  ;;  %v2010_v1 = vld [vmem:[%s4360_s1 + $0x3] ss:$4 sm:$0x3]  ;;  %v4364_v7 = vlaneseq }
  0x10   :  { %v36_v2 = vmin.f32 %v2009_v0, 4.1351666  ;;  %v39_v3 = vmin.f32 %v2010_v1, 4.1351666  ;;  %v2250_v15 = vmov 2   ;;  %s2318_s8 = sld [smem:[#allocation3]] }
  0x11   :  { %v40_v6 = vld [vmem:[%s4361_s2] ss:$4 sm:$0x3]  ;;  %v2011_v8 = vld [vmem:[%s4361_s2 + $0x1] ss:$4 sm:$0x3]  ;;  %2051 = vset.pattern.permute.xlu1 %v2250_v15 }
  0x12   :  { %v57_v4 = vmul.f32 1.442695, %v36_v2  ;;  %v60_v5 = vmul.f32 1.442695, %v39_v3  ;;  %v2306_v11 = vand.u32 127, %v4364_v7  ;;  %s2007_s9 = sld [smem:[#allocation3 + $0x1]] }
  0x13   :  { %v2012_v9 = vld [vmem:[%s4361_s2 + $0x2] ss:$4 sm:$0x3]  ;;  %v2013_v10 = vld [vmem:[%s4361_s2 + $0x3] ss:$4 sm:$0x3] }
  0x14   :  { %2079 = vpow2.f32 %v57_v4  ;;  %4541 = vst [vmem:[#allocation6_spill] sm:$0xff] %v2306_v11  ;;  %v47_v12 = vsub.f32 %v2012_v9, %v40_v6  ;;  %v2309_v13 = vadd.s32 128, %v2306_v11  ;;  %v48_v14 = vsub.f32 %v2013_v10, %v2011_v8  ;;  %v31_v17 = vld [vmem:[%s4360_s1] ss:$4 sm:$0x3] }
  0x15   :  { %2081 = vpow2.f32 %v60_v5  ;;  %v2008_v19 = vld [vmem:[%s4360_s1 + $0x1] ss:$4 sm:$0x3]  ;;  %v2321_v31 = vshrl.u32 %v4364_v7, 7  ;;  %vm123_vm0 = vcmask 1040384   ;;  %vm126_vm1 = vcmask 1041408  }
  0x16   :  { %4542 = vst [vmem:[#allocation7_spill] sm:$0xff] %v2309_v13  ;;  %v49_v16 = vmul.f32 0.5, %v47_v12  ;;  %v51_v18 = vmul.f32 0.5, %v48_v14  ;;  %v53_v21 = vmul.f32 %v47_v12, %v31_v17  ;;  %v55_v23 = vmul.f32 %v2008_v19, %v48_v14 }
  0x17   :  { %4543 = vst [vmem:[#allocation8_spill] sm:$0xff] %v2321_v31  ;;  %v71_v37 = vstv %s2318_s8  ;;  %v2325_v41 = vsub.s32 0, %v2321_v31  ;;  %v2328_v42 = vsub.s32 1, %v2321_v31  ;;  %vm129_vm2 = vcmask 1042432  }
  0x18   :  { %v50_v20 = vadd.f32 %v49_v16, %v40_v6  ;;  %v52_v22 = vadd.f32 %v2011_v8, %v51_v18  ;;  %v66_v35 = vstv %s2007_s9  ;;  %vm155_vm6 = vcmask 1043456  }
  0x19   :  { %4544 = vst [vmem:[#allocation9_spill] sm:$0xff] %v2325_v41  ;;  %4545 = vst [vmem:[#allocation10_spill] sm:$0xff] %v2328_v42  ;;  %vm158_vm7 = vcmask 1044480   ;;  %v2251_v1 = vmov 0.0  }
  0x1a   :  { %v54_v26 = vadd.f32 %v53_v21, %v50_v20  ;;  %v56_v28 = vadd.f32 %v55_v23, %v52_v22 }
  0x21   :  { %v2080_v24 = vpop.eup %2079 }
  0x22   :  { %v2082_v25 = vpop.eup %2081  ;;  %v59_v27 = vmul.f32 %v2080_v24, %v47_v12 }
  0x23   :  { %v62_v29 = vmul.f32 %v2082_v25, %v48_v14 }
  0x24   :  { %v63_v30 = vmul.f32 0.5, %v59_v27 }
  0x25   :  { %v68_v32 = vmul.f32 0.5, %v62_v29 }
  0x26   :  { %v64_v33 = vsub.f32 %v54_v26, %v63_v30  ;;  %v73_v34 = vadd.f32 %v63_v30, %v54_v26 }
  0x27   :  { %v69_v36 = vsub.f32 %v56_v28, %v68_v32  ;;  %v76_v38 = vadd.f32 %v68_v32, %v56_v28 }
  0x28   :  { %v65_v39 = vmax.f32 %v64_v33, 0.0  ;;  %v74_v40 = vmax.f32 %v73_v34, 0.0 }
  0x29   :  { %v70_v43 = vmax.f32 %v69_v36, 0.0  ;;  %v77_v44 = vmax.f32 %v76_v38, 0.0 }
  0x2a   :  { %v67_v45 = vmin.f32 %v66_v35, %v65_v39  ;;  %v75_v46 = vmin.f32 %v66_v35, %v74_v40  ;;  %v4367_v35 = vmov 0  }
  0x2b   :  { %v72_v47 = vmin.f32 %v71_v37, %v70_v43  ;;  %v78_v48 = vmin.f32 %v71_v37, %v77_v44 }
  0x2c   :  { %v2331_v49 = vrot.slane %v67_v45, %v2325_v41  ;;  %v2334_v50 = vrot.slane %v75_v46, %v2325_v41  ;;  %v137_v51 = vsub.f32 %v75_v46, %v67_v45  ;;  %v2337_v52 = vrot.slane %v67_v45, %v2328_v42 }
  0x2d   :  { %v2340_v53 = vrot.slane %v72_v47, %v2325_v41  ;;  %v2343_v54 = vrot.slane %v78_v48, %v2325_v41  ;;  %v138_v55 = vsub.f32 %v78_v48, %v72_v47  ;;  %v2346_v56 = vrot.slane %v72_v47, %v2328_v42 }
  0x2e   :  { %4546 = vst [vmem:[#allocation11_spill] sm:$0xff] %v2331_v49  ;;  %4547 = vst [vmem:[#allocation12_spill] sm:$0xff] %v2334_v50  ;;  %vm139_vm3 = vcmp.ge.f32.partialorder %v137_v51, 1.0  ;;  %v2349_v57 = vrot.slane %v75_v46, %v2328_v42  ;;  %v2352_v58 = vrot.slane %v78_v48, %v2328_v42 }
  0x2f   :  { %4548 = vst [vmem:[#allocation13_spill] sm:$0xff] %v2337_v52  ;;  %4549 = vst [vmem:[#allocation14_spill] sm:$0xff] %v2340_v53  ;;  %v124_v59 = vsel %vm123_vm0, %v2331_v49, %v2340_v53  ;;  %vm140_vm4 = vcmp.ge.f32.partialorder %v138_v55, 1.0  ;;  %v143_v60 = vmul.f32 %v138_v55, %v137_v51  ;;  %v125_v61 = vsel %vm123_vm0, %v2337_v52, %v2346_v56 }
  0x30   :  { %4550 = vst [vmem:[#allocation15_spill] sm:$0xff] %v2343_v54  ;;  %4551 = vst [vmem:[#allocation16_spill] sm:$0xff] %v2346_v56  ;;  %v127_v62 = vsel %vm126_vm1, %v124_v59, %v2334_v50  ;;  %v128_v63 = vsel %vm126_vm1, %v125_v61, %v2349_v57  ;;  %v4366_v55 = vmov 3   ;;  %v4576_v56 = vmov 0  }
  0x31   :  { %4552 = vst [vmem:[#allocation17_spill] sm:$0xff] %v2349_v57  ;;  %4553 = vst [vmem:[#allocation18_spill] sm:$0xff] %v2352_v58  ;;  %v130_v0 = vsel %vm129_vm2, %v127_v62, %v2343_v54  ;;  %v2369_v3 = vrot.slane %v143_v60, %v2325_v41  ;;  %v131_v4 = vsel %vm129_vm2, %v128_v63, %v2352_v58  ;;  %v4365_v62 = vmov 1  }
  0x32   :  { %vm141_vm5 = vmand %vm139_vm3, %vm140_vm4  ;;  %v134_v5 = vcombine.low %v130_v0, %v131_v4  ;;  %v2378_v9 = vrot.slane %v143_v60, %v2328_v42 }
  0x33   :  { %v2366_v2 = vsel %vm141_vm5, 1.0, %v2251_v1  ;;  %4555 = vst [vmem:[#allocation20_spill] sm:$0xff] %v2369_v3  ;;  %v156_v6 = vsel %vm155_vm6, %v130_v0, %v2369_v3 }
  0x34   :  { %4554 = vst [vmem:[#allocation19_spill] sm:$0xff] %v2366_v2  ;;  %v159_v8 = vsel %vm158_vm7, %v156_v6, 0.0  ;;  %136 = vst [vmem:[%s4362_s3] sm:$0xff] %v134_v5  ;;  %v157_v10 = vsel %vm155_vm6, %v131_v4, %v2378_v9  ;;  %s4331_s3 = smov 0  }
  0x35   :  { %161 = vxpose.xlu0.b32.start.end [1/1] (short) %v159_v8, 128  ;;  %4556 = vst [vmem:[#allocation21_spill] sm:$0xff] %v2378_v9  ;;  %v160_v12 = vsel %vm158_vm7, %v157_v10, 0.0 }
  0x72   :  { %193 = vxpose.xlu0.b32.start.end [1/1] (short) %v160_v12, 128 }
  0x9b   :  { %2052 = vset.pattern.permute.xlu0 %v2250_v15 }
  0xb1   :  { %v2382_v14 = vpop.trf.xlu0 }
  0xb2   :  { %227 = vperm.xlu1 %2051, %v2382_v14  }
  0xb5   :  { %v2385_v16 = vpop.trf.xlu0 }
  0xb6   :  { %4557 = vst [vmem:[#allocation22_spill] sm:$0xff] %v2385_v16 }
  0xb9   :  { %v2387_v17 = vpop.trf.xlu0 }
  0xbd   :  { %v2389_v18 = vpop.trf.xlu0 }
  0xc1   :  { %v2391_v19 = vpop.trf.xlu0 }
  0xc2   :  { %4558 = vst [vmem:[#allocation23_spill] sm:$0xff] %v2391_v19 }
  0xc5   :  { %v2393_v20 = vpop.trf.xlu0 }
  0xc9   :  { %v2395_v21 = vpop.trf.xlu0 }
  0xca   :  { %4559 = vst [vmem:[#allocation24_spill] sm:$0xff] %v2395_v21 }
  0xcd   :  { %v2397_v22 = vpop.trf.xlu0 }
  0xd1   :  { %v2399_v23 = vpop.trf.xlu0 }
  0xd2   :  { %4560 = vst [vmem:[#allocation25_spill] sm:$0xff] %v2399_v23 }
  0xd5   :  { %v2401_v24 = vpop.trf.xlu0 }
  0xd9   :  { %v2403_v25 = vpop.trf.xlu0 }
  0xda   :  { %4561 = vst [vmem:[#allocation26_spill] sm:$0xff] %v2403_v25 }
  0xdd   :  { %v2405_v26 = vpop.trf.xlu0 }
  0xe1   :  { %v2407_v27 = vpop.trf.xlu0 }
  0xe2   :  { %4562 = vst [vmem:[#allocation27_spill] sm:$0xff] %v2407_v27 }
  0xe5   :  { %v2409_v28 = vpop.trf.xlu0 }
  0xe9   :  { %v2411_v29 = vpop.trf.xlu0 }
  0xea   :  { %4563 = vst [vmem:[#allocation28_spill] sm:$0xff] %v2411_v29 }
  0xed   :  { %v2413_v30 = vpop.trf.xlu0 }
  0xf1   :  { %v2415_v32 = vpop.trf.xlu0 }
  0xf2   :  { %4564 = vst [vmem:[#allocation29_spill] sm:$0xff] %v2415_v32  ;;  %307 = vperm.xlu1 %2051, %v2415_v32  }
  0xf5   :  { %v2418_v33 = vpop.trf.xlu0 }
  0xf6   :  { %232 = vperm.xlu1 %2051, %v2385_v16   ;;  %312 = vperm.xlu0 %2052, %v2418_v33  }
  0xf9   :  { %v2422_v34 = vpop.trf.xlu0 }
  0xfa   :  { %4565 = vst [vmem:[#allocation30_spill] sm:$0xff] %v2422_v34  ;;  %2053 = vset.pattern.permute.xlu1 %v4367_v35  ;;  %2072 = vset.pattern.permute.xlu0 %v4367_v35 }
  0xfb   :  { %450 = vperm.xlu1 %2053, %v2382_v14   ;;  %494 = vperm.xlu0 %2072, %v2405_v26  }
  0xfd   :  { %v2428_v36 = vpop.trf.xlu0 }
  0xff   :  { %454 = vperm.xlu1 %2053, %v2385_v16   ;;  %506 = vperm.xlu0 %2072, %v2411_v29  }
 0x101   :  { %v2432_v37 = vpop.trf.xlu0 }
 0x102   :  { %4566 = vst [vmem:[#allocation31_spill] sm:$0xff] %v2432_v37 }
 0x103   :  { %2054 = vset.pattern.permute.xlu1 %v2250_v15  ;;  %514 = vperm.xlu0 %2072, %v2415_v32  }
 0x104   :  { %237 = vperm.xlu1 %2054, %v2387_v17  }
 0x105   :  { %v2437_v38 = vpop.trf.xlu0 }
 0x107   :  { %522 = vperm.xlu0 %2072, %v2422_v34  }
 0x108   :  { %317 = vperm.xlu1 %2054, %v2422_v34  }
 0x109   :  { %v2441_v39 = vpop.trf.xlu0 }
 0x10a   :  { %4567 = vst [vmem:[#allocation32_spill] sm:$0xff] %v2441_v39 }
 0x10b   :  { %530 = vperm.xlu0 %2072, %v2432_v37  }
 0x10c   :  { %2055 = vset.pattern.permute.xlu1 %v4367_v35 }
 0x10d   :  { %458 = vperm.xlu1 %2055, %v2387_v17   ;;  %v2446_v40 = vpop.trf.xlu0 }
 0x10f   :  { %538 = vperm.xlu0 %2072, %v2441_v39  }
 0x111   :  { %2056 = vset.pattern.permute.xlu1 %v2250_v15  ;;  %v2450_v43 = vpop.trf.xlu0 }
 0x112   :  { %4568 = vst [vmem:[#allocation33_spill] sm:$0xff] %v2450_v43  ;;  %242 = vperm.xlu1 %2056, %v2389_v18  }
 0x113   :  { %546 = vperm.xlu0 %2072, %v2450_v43  }
 0x115   :  { %v2454_v44 = vpop.trf.xlu0 }
 0x116   :  { %322 = vperm.xlu1 %2056, %v2428_v36  }
 0x119   :  { %v2457_v45 = vpop.trf.xlu0 }
 0x11a   :  { %4569 = vst [vmem:[#allocation34_spill] sm:$0xff] %v2457_v45  ;;  %2057 = vset.pattern.permute.xlu1 %v4367_v35  ;;  %554 = vperm.xlu0 %2072, %v2457_v45  }
 0x11b   :  { %462 = vperm.xlu1 %2057, %v2389_v18  }
 0x11d   :  { %v2462_v46 = vpop.trf.xlu0 }
 0x11f   :  { %2058 = vset.pattern.permute.xlu1 %v2250_v15 }
 0x120   :  { %247 = vperm.xlu1 %2058, %v2391_v19  }
 0x121   :  { %v2466_v47 = vpop.trf.xlu0 }
 0x122   :  { %4570 = vst [vmem:[#allocation35_spill] sm:$0xff] %v2466_v47  ;;  %562 = vperm.xlu0 %2072, %v2466_v47  }
 0x124   :  { %327 = vperm.xlu1 %2058, %v2432_v37  }
 0x125   :  { %v2470_v48 = vpop.trf.xlu0 }
 0x128   :  { %2059 = vset.pattern.permute.xlu1 %v4367_v35 }
 0x129   :  { %466 = vperm.xlu1 %2059, %v2391_v19   ;;  %v2474_v51 = vpop.trf.xlu0 }
 0x12a   :  { %4571 = vst [vmem:[#allocation36_spill] sm:$0xff] %v2474_v51  ;;  %570 = vperm.xlu0 %2072, %v2474_v51  }
 0x12d   :  { %2060 = vset.pattern.permute.xlu1 %v2250_v15  ;;  %v2515_v59 = vpop.trf.xlu0  ;;  %v2517_v60 = vpop.permute.xlu1 %227 }
 0x12e   :  { %252 = vperm.xlu1 %2060, %v2393_v20   ;;  %2073 = vset.pattern.permute.xlu0 %v4366_v55 }
 0x12f   :  { %770 = vperm.xlu0 %2073, %v2382_v14  }
 0x132   :  { %332 = vperm.xlu1 %2060, %v2437_v38  }
 0x133   :  { %782 = vperm.xlu0 %2073, %v2389_v18  }
 0x136   :  { %2061 = vset.pattern.permute.xlu1 %v4367_v35 }
 0x137   :  { %470 = vperm.xlu1 %2061, %v2393_v20   ;;  %790 = vperm.xlu0 %2073, %v2393_v20  }
 0x13b   :  { %2062 = vset.pattern.permute.xlu1 %v2250_v15  ;;  %798 = vperm.xlu0 %2073, %v2397_v22  }
 0x13c   :  { %257 = vperm.xlu1 %2062, %v2395_v21  }
 0x13f   :  { %806 = vperm.xlu0 %2073, %v2401_v24  }
 0x140   :  { %337 = vperm.xlu1 %2062, %v2441_v39  }
 0x143   :  { %814 = vperm.xlu0 %2073, %v2405_v26  }
 0x144   :  { %2063 = vset.pattern.permute.xlu1 %v4367_v35 }
 0x145   :  { %474 = vperm.xlu1 %2063, %v2395_v21  }
 0x147   :  { %822 = vperm.xlu0 %2073, %v2409_v28  }
 0x149   :  { %2064 = vset.pattern.permute.xlu1 %v2250_v15 }
 0x14a   :  { %262 = vperm.xlu1 %2064, %v2397_v22  }
 0x14b   :  { %830 = vperm.xlu0 %2073, %v2413_v30  }
 0x14e   :  { %342 = vperm.xlu1 %2064, %v2446_v40  }
 0x14f   :  { %838 = vperm.xlu0 %2073, %v2418_v33  }
 0x152   :  { %2065 = vset.pattern.permute.xlu1 %v4367_v35 }
 0x153   :  { %478 = vperm.xlu1 %2065, %v2397_v22   ;;  %846 = vperm.xlu0 %2073, %v2428_v36  }
 0x157   :  { %2066 = vset.pattern.permute.xlu1 %v2250_v15  ;;  %854 = vperm.xlu0 %2073, %v2437_v38  }
 0x158   :  { %267 = vperm.xlu1 %2066, %v2399_v23  }
 0x15b   :  { %862 = vperm.xlu0 %2073, %v2446_v40  }
 0x15c   :  { %347 = vperm.xlu1 %2066, %v2450_v43  }
 0x15f   :  { %870 = vperm.xlu0 %2073, %v2454_v44  }
 0x160   :  { %2067 = vset.pattern.permute.xlu1 %v4367_v35 }
 0x161   :  { %482 = vperm.xlu1 %2067, %v2399_v23  }
 0x163   :  { %878 = vperm.xlu0 %2073, %v2462_v46  }
 0x165   :  { %2068 = vset.pattern.permute.xlu1 %v2250_v15 }
 0x166   :  { %272 = vperm.xlu1 %2068, %v2401_v24  }
 0x167   :  { %886 = vperm.xlu0 %2073, %v2470_v48  }
 0x16a   :  { %352 = vperm.xlu1 %2068, %v2454_v44  }
 0x16b   :  { %894 = vperm.xlu0 %2073, %v2515_v59  }
 0x16d   :  { %v2521_v61 = vpop.permute.xlu1 %307 }
 0x16e   :  { %2069 = vset.pattern.permute.xlu1 %v4367_v35 }
 0x16f   :  { %486 = vperm.xlu1 %2069, %v2401_v24   ;;  %2076 = vset.pattern.permute.xlu0 %v4365_v62 }
 0x170   :  { %966 = vperm.xlu0 %2076, %v2385_v16  }
 0x171   :  { %v2527_v63 = vpop.permute.xlu1 %232  ;;  %v2529_v0 = vpop.permute.xlu0 %312 }
 0x173   :  { %2070 = vset.pattern.permute.xlu1 %v2250_v15 }
 0x174   :  { %277 = vperm.xlu1 %2070, %v2403_v25   ;;  %978 = vperm.xlu0 %2076, %v2391_v19  }
 0x176   :  { %v2534_v1 = vpop.permute.xlu1 %450  ;;  %v2536_v4 = vpop.permute.xlu0 %494 }
 0x178   :  { %357 = vperm.xlu1 %2070, %v2457_v45   ;;  %986 = vperm.xlu0 %2076, %v2395_v21  }
 0x17a   :  { %v2540_v5 = vpop.permute.xlu1 %454  ;;  %v2542_v6 = vpop.permute.xlu0 %506 }
 0x17c   :  { %282 = vperm.xlu1 %2070, %v2405_v26   ;;  %994 = vperm.xlu0 %2076, %v2399_v23  }
 0x17e   :  { %v2546_v15 = vpop.permute.xlu0 %514 }
 0x17f   :  { %v2548_v8 = vpop.permute.xlu1 %237 }
 0x180   :  { %362 = vperm.xlu1 %2070, %v2462_v46   ;;  %1002 = vperm.xlu0 %2076, %v2403_v25  }
 0x182   :  { %v2554_v12 = vpop.permute.xlu0 %522 }
 0x183   :  { %v2552_v10 = vpop.permute.xlu1 %317 }
 0x184   :  { %287 = vperm.xlu1 %2070, %v2407_v27   ;;  %1010 = vperm.xlu0 %2076, %v2407_v27  }
 0x186   :  { %v2558_v7 = vpop.permute.xlu0 %530 }
 0x188   :  { %v2560_v62 = vpop.permute.xlu1 %458  ;;  %367 = vperm.xlu1 %2070, %v2466_v47   ;;  %1018 = vperm.xlu0 %2076, %v2411_v29  }
 0x18a   :  { %v2568_v35 = vpop.permute.xlu0 %538 }
 0x18c   :  { %292 = vperm.xlu1 %2070, %v2409_v28   ;;  %1026 = vperm.xlu0 %2076, %v2415_v32  }
 0x18d   :  { %v2566_v55 = vpop.permute.xlu1 %242 }
 0x18e   :  { %v2574_v42 = vpop.permute.xlu0 %546 }
 0x18f   :  { %4573 = vst [vmem:[#allocation38_spill] sm:$0xff] %v2574_v42 }
 0x190   :  { %372 = vperm.xlu1 %2070, %v2470_v48   ;;  %1034 = vperm.xlu0 %2076, %v2422_v34  }
 0x191   :  { %v2572_v2 = vpop.permute.xlu1 %322 }
 0x192   :  { %4572 = vst [vmem:[#allocation37_spill] sm:$0xff] %v2572_v2 }
 0x194   :  { %297 = vperm.xlu1 %2070, %v2411_v29   ;;  %1042 = vperm.xlu0 %2076, %v2432_v37  }
 0x195   :  { %v2582_v31 = vpop.permute.xlu0 %554 }
 0x196   :  { %v2578_v41 = vpop.permute.xlu1 %462  ;;  %4574 = vst [vmem:[#allocation39_spill] sm:$0xff] %v2582_v31 }
 0x198   :  { %377 = vperm.xlu1 %2070, %v2474_v51   ;;  %1050 = vperm.xlu0 %2076, %v2441_v39  }
 0x19b   :  { %v2584_v13 = vpop.permute.xlu1 %247 }
 0x19c   :  { %302 = vperm.xlu1 %2070, %v2413_v30   ;;  %1058 = vperm.xlu0 %2076, %v2450_v43  }
 0x19d   :  { %v2590_v9 = vpop.permute.xlu0 %562 }
 0x19e   :  { %4575 = vst [vmem:[#allocation40_spill] sm:$0xff] %v2590_v9  ;;  %v4392_v9 = vmov 4  }
 0x19f   :  { %v2588_v11 = vpop.permute.xlu1 %327 }
 0x1a0   :  { %1066 = vperm.xlu0 %2076, %v2457_v45   ;;  %382 = vperm.xlu1 %2070, %v2515_v59  }
 0x1a4   :  { %v2594_v3 = vpop.permute.xlu1 %466  ;;  %1074 = vperm.xlu0 %2076, %v2466_v47   ;;  %2071 = vset.pattern.permute.xlu1 %v4576_v56 }
 0x1a5   :  { %490 = vperm.xlu1 %2071, %v2403_v25   ;;  %v2599_v53 = vpop.permute.xlu0 %570 }
 0x1a6   :  { %4577 = vst [vmem:[#allocation41_spill] sm:$0xff] %v2599_v53 }
 0x1a8   :  { %1082 = vperm.xlu0 %2076, %v2474_v51  }
 0x1a9   :  { %v2602_v58 = vpop.permute.xlu1 %252  ;;  %498 = vperm.xlu1 %2071, %v2407_v27  }
 0x1aa   :  { %4578 = vst [vmem:[#allocation42_spill] sm:$0xff] %v2602_v58  ;;  %v2605_v54 = vpop.permute.xlu0 %770 }
 0x1ab   :  { %4579 = vst [vmem:[#allocation43_spill] sm:$0xff] %v2605_v54 }
 0x1ac   :  { %2077 = vset.pattern.permute.xlu0 %v4392_v9 }
 0x1ad   :  { %v2608_v31 = vpop.permute.xlu1 %332  ;;  %1346 = vperm.xlu0 %2077, %v2382_v14   ;;  %502 = vperm.xlu1 %2071, %v2409_v28  }
 0x1ae   :  { %4580 = vst [vmem:[#allocation44_spill] sm:$0xff] %v2608_v31  ;;  %v2612_v56 = vpop.permute.xlu0 %782 }
 0x1af   :  { %4581 = vst [vmem:[#allocation45_spill] sm:$0xff] %v2612_v56 }
 0x1b1   :  { %1358 = vperm.xlu0 %2077, %v2389_v18   ;;  %510 = vperm.xlu1 %2071, %v2413_v30  }
 0x1b2   :  { %v2616_v53 = vpop.permute.xlu1 %470  ;;  %v2618_v58 = vpop.permute.xlu0 %790 }
 0x1b3   :  { %4582 = vst [vmem:[#allocation46_spill] sm:$0xff] %v2616_v53  ;;  %4583 = vst [vmem:[#allocation47_spill] sm:$0xff] %v2618_v58 }
 0x1b5   :  { %1366 = vperm.xlu0 %2077, %v2393_v20   ;;  %518 = vperm.xlu1 %2071, %v2418_v33  }
 0x1b6   :  { %v2622_v9 = vpop.permute.xlu0 %798 }
 0x1b7   :  { %4584 = vst [vmem:[#allocation48_spill] sm:$0xff] %v2622_v9  ;;  %v2624_v31 = vpop.permute.xlu1 %257 }
 0x1b8   :  { %4585 = vst [vmem:[#allocation49_spill] sm:$0xff] %v2624_v31 }
 0x1b9   :  { %1374 = vperm.xlu0 %2077, %v2397_v22   ;;  %526 = vperm.xlu1 %2071, %v2428_v36  }
 0x1ba   :  { %v2628_v56 = vpop.permute.xlu0 %806 }
 0x1bb   :  { %4586 = vst [vmem:[#allocation50_spill] sm:$0xff] %v2628_v56  ;;  %v2630_v54 = vpop.permute.xlu1 %337 }
 0x1bc   :  { %4587 = vst [vmem:[#allocation51_spill] sm:$0xff] %v2630_v54 }
 0x1bd   :  { %1382 = vperm.xlu0 %2077, %v2401_v24   ;;  %534 = vperm.xlu1 %2071, %v2437_v38  }
 0x1be   :  { %v2634_v58 = vpop.permute.xlu0 %814 }
 0x1bf   :  { %4588 = vst [vmem:[#allocation52_spill] sm:$0xff] %v2634_v58 }
 0x1c0   :  { %v2636_v53 = vpop.permute.xlu1 %474 }
 0x1c1   :  { %4589 = vst [vmem:[#allocation53_spill] sm:$0xff] %v2636_v53  ;;  %1390 = vperm.xlu0 %2077, %v2405_v26   ;;  %542 = vperm.xlu1 %2071, %v2446_v40   ;;  %v4598_v53 = vmov 3  }
 0x1c2   :  { %v2640_v9 = vpop.permute.xlu0 %822 }
 0x1c3   :  { %4590 = vst [vmem:[#allocation54_spill] sm:$0xff] %v2640_v9 }
 0x1c5   :  { %v2642_v31 = vpop.permute.xlu1 %262  ;;  %1398 = vperm.xlu0 %2077, %v2409_v28   ;;  %550 = vperm.xlu1 %2071, %v2454_v44  }
 0x1c6   :  { %4591 = vst [vmem:[#allocation55_spill] sm:$0xff] %v2642_v31  ;;  %v2646_v56 = vpop.permute.xlu0 %830 }
 0x1c7   :  { %4592 = vst [vmem:[#allocation56_spill] sm:$0xff] %v2646_v56 }
 0x1c9   :  { %v2648_v54 = vpop.permute.xlu1 %342  ;;  %558 = vperm.xlu1 %2071, %v2462_v46   ;;  %1406 = vperm.xlu0 %2077, %v2413_v30  }
 0x1ca   :  { %4593 = vst [vmem:[#allocation57_spill] sm:$0xff] %v2648_v54  ;;  %v2652_v58 = vpop.permute.xlu0 %838 }
 0x1cb   :  { %4594 = vst [vmem:[#allocation58_spill] sm:$0xff] %v2652_v58 }
 0x1cd   :  { %566 = vperm.xlu1 %2071, %v2470_v48   ;;  %1414 = vperm.xlu0 %2077, %v2418_v33  }
 0x1ce   :  { %v2656_v9 = vpop.permute.xlu1 %478  ;;  %v2658_v31 = vpop.permute.xlu0 %846 }
 0x1cf   :  { %4595 = vst [vmem:[#allocation59_spill] sm:$0xff] %v2656_v9  ;;  %4596 = vst [vmem:[#allocation60_spill] sm:$0xff] %v2658_v31 }
 0x1d1   :  { %574 = vperm.xlu1 %2071, %v2515_v59   ;;  %1422 = vperm.xlu0 %2077, %v2428_v36  }
 0x1d2   :  { %v2662_v56 = vpop.permute.xlu0 %854 }
 0x1d3   :  { %4597 = vst [vmem:[#allocation61_spill] sm:$0xff] %v2662_v56  ;;  %v2664_v54 = vpop.permute.xlu1 %267 }
 0x1d5   :  { %2074 = vset.pattern.permute.xlu1 %v4598_v53  ;;  %1430 = vperm.xlu0 %2077, %v2437_v38  }
 0x1d6   :  { %774 = vperm.xlu1 %2074, %v2385_v16   ;;  %v2669_v58 = vpop.permute.xlu0 %862 }
 0x1d7   :  { %4599 = vst [vmem:[#allocation62_spill] sm:$0xff] %v2669_v58  ;;  %v2671_v2 = vpop.permute.xlu1 %347 }
 0x1d8   :  { %4600 = vst [vmem:[#allocation63_spill] sm:$0xff] %v2671_v2 }
 0x1d9   :  { %1438 = vperm.xlu0 %2077, %v2446_v40  }
 0x1da   :  { %778 = vperm.xlu1 %2074, %v2387_v17   ;;  %v2677_v9 = vpop.permute.xlu0 %870 }
 0x1db   :  { %4601 = vst [vmem:[#allocation64_spill] sm:$0xff] %v2677_v9 }
 0x1dc   :  { %v2675_v31 = vpop.permute.xlu1 %482 }
 0x1dd   :  { %1446 = vperm.xlu0 %2077, %v2454_v44  }
 0x1de   :  { %786 = vperm.xlu1 %2074, %v2391_v19   ;;  %v2685_v58 = vpop.permute.xlu0 %878 }
 0x1df   :  { %4603 = vst [vmem:[#allocation66_spill] sm:$0xff] %v2685_v58 }
 0x1e1   :  { %v2681_v53 = vpop.permute.xlu1 %272  ;;  %1454 = vperm.xlu0 %2077, %v2462_v46  }
 0x1e2   :  { %4602 = vst [vmem:[#allocation65_spill] sm:$0xff] %v2681_v53  ;;  %794 = vperm.xlu1 %2074, %v2395_v21   ;;  %v2691_v16 = vpop.permute.xlu0 %886 }
 0x1e3   :  { %4605 = vst [vmem:[#allocation68_spill] sm:$0xff] %v2691_v16 }
 0x1e5   :  { %v2687_v2 = vpop.permute.xlu1 %352  ;;  %1462 = vperm.xlu0 %2077, %v2470_v48  }
 0x1e6   :  { %4604 = vst [vmem:[#allocation67_spill] sm:$0xff] %v2687_v2  ;;  %802 = vperm.xlu1 %2074, %v2399_v23   ;;  %v2698_v19 = vpop.permute.xlu0 %894 }
 0x1e7   :  { %4606 = vst [vmem:[#allocation69_spill] sm:$0xff] %v2698_v19 }
 0x1e9   :  { %1470 = vperm.xlu0 %2077, %v2515_v59  }
 0x1ea   :  { %v2694_v9 = vpop.permute.xlu1 %486  ;;  %810 = vperm.xlu1 %2074, %v2403_v25  }
 0x1eb   :  { %v2705_v53 = vpop.permute.xlu0 %966 }
 0x1ee   :  { %818 = vperm.xlu1 %2074, %v2407_v27  }
 0x1ef   :  { %v2700_v21 = vpop.permute.xlu1 %277  ;;  %v2711_v16 = vpop.permute.xlu0 %978 }
 0x1f0   :  { %4607 = vst [vmem:[#allocation70_spill] sm:$0xff] %v2700_v21 }
 0x1f2   :  { %826 = vperm.xlu1 %2074, %v2411_v29  }
 0x1f3   :  { %v2703_v2 = vpop.permute.xlu1 %357  ;;  %v2718_v21 = vpop.permute.xlu0 %986 }
 0x1f4   :  { %4608 = vst [vmem:[#allocation71_spill] sm:$0xff] %v2703_v2 }
 0x1f6   :  { %834 = vperm.xlu1 %2074, %v2415_v32  }
 0x1f7   :  { %v2708_v23 = vpop.permute.xlu1 %282  ;;  %v2724_v32 = vpop.permute.xlu0 %994 }
 0x1fa   :  { %842 = vperm.xlu1 %2074, %v2422_v34  }
 0x1fb   :  { %v2713_v25 = vpop.permute.xlu1 %362 }
 0x1fc   :  { %4609 = vst [vmem:[#allocation72_spill] sm:$0xff] %v2713_v25  ;;  %v2731_v25 = vpop.permute.xlu0 %1002 }
 0x1fe   :  { %850 = vperm.xlu1 %2074, %v2432_v37  }
 0x1ff   :  { %v2716_v27 = vpop.permute.xlu1 %287 }
 0x200   :  { %4610 = vst [vmem:[#allocation73_spill] sm:$0xff] %v2716_v27 }
 0x202   :  { %858 = vperm.xlu1 %2074, %v2441_v39   ;;  %v2737_v39 = vpop.permute.xlu0 %1010 }
 0x203   :  { %v2721_v2 = vpop.permute.xlu1 %367 }
 0x204   :  { %4611 = vst [vmem:[#allocation74_spill] sm:$0xff] %v2721_v2 }
 0x206   :  { %866 = vperm.xlu1 %2074, %v2450_v43   ;;  %v4614_v43 = vmov 1  }
 0x207   :  { %v2726_v29 = vpop.permute.xlu1 %292 }
 0x208   :  { %4612 = vst [vmem:[#allocation75_spill] sm:$0xff] %v2726_v29 }
 0x20a   :  { %874 = vperm.xlu1 %2074, %v2457_v45   ;;  %v2745_v45 = vpop.permute.xlu0 %1018 }
 0x20b   :  { %v2729_v34 = vpop.permute.xlu1 %372 }
 0x20c   :  { %4613 = vst [vmem:[#allocation76_spill] sm:$0xff] %v2729_v34 }
 0x20e   :  { %882 = vperm.xlu1 %2074, %v2466_v47   ;;  %v2750_v47 = vpop.permute.xlu0 %1026 }
 0x20f   :  { %v2734_v37 = vpop.permute.xlu1 %297  ;;  %4617 = vst [vmem:[#allocation79_spill] sm:$0xff] %v2750_v47  ;;  %v617_v47 = vmax.f32 %v2558_v7, %v2331_v49 }
 0x212   :  { %890 = vperm.xlu1 %2074, %v2474_v51  }
 0x213   :  { %v2739_v27 = vpop.permute.xlu1 %377 }
 0x216   :  { %2075 = vset.pattern.permute.xlu1 %v4614_v43  ;;  %v2758_v43 = vpop.permute.xlu0 %1034 }
 0x217   :  { %v2742_v2 = vpop.permute.xlu1 %302  ;;  %962 = vperm.xlu1 %2075, %v2382_v14   ;;  %4620 = vst [vmem:[#allocation82_spill] sm:$0xff] %v2758_v43  ;;  %v422_v43 = vmin.f32 %v2552_v10, %v2349_v57 }
 0x218   :  { %4615 = vst [vmem:[#allocation77_spill] sm:$0xff] %v2742_v2 }
 0x21a   :  { %v2763_v2 = vpop.permute.xlu0 %1042 }
 0x21b   :  { %970 = vperm.xlu1 %2075, %v2387_v17   ;;  %v2748_v34 = vpop.permute.xlu1 %382  ;;  %4622 = vst [vmem:[#allocation84_spill] sm:$0xff] %v2763_v2  ;;  %v387_v2 = vmin.f32 %v2527_v63, %v2334_v50 }
 0x21c   :  { %4616 = vst [vmem:[#allocation78_spill] sm:$0xff] %v2748_v34 }
 0x21f   :  { %974 = vperm.xlu1 %2075, %v2389_v18  }
 0x220   :  { %v2753_v51 = vpop.permute.xlu1 %490 }
 0x221   :  { %4618 = vst [vmem:[#allocation80_spill] sm:$0xff] %v2753_v51  ;;  %v2771_v51 = vpop.permute.xlu0 %1050 }
 0x222   :  { %4625 = vst [vmem:[#allocation87_spill] sm:$0xff] %v2771_v51 }
 0x223   :  { %982 = vperm.xlu1 %2075, %v2393_v20  }
 0x224   :  { %v2756_v29 = vpop.permute.xlu1 %498 }
 0x225   :  { %4619 = vst [vmem:[#allocation81_spill] sm:$0xff] %v2756_v29  ;;  %v578_v29 = vmax.f32 %v2534_v1, %v2337_v52 }
 0x227   :  { %990 = vperm.xlu1 %2075, %v2397_v22   ;;  %v577_v22 = vmax.f32 %v2534_v1, %v2331_v49  ;;  %v580_v1 = vmax.f32 %v2540_v5, %v2337_v52 }
 0x228   :  { %v2761_v14 = vpop.permute.xlu1 %502 }
 0x229   :  { %4621 = vst [vmem:[#allocation83_spill] sm:$0xff] %v2761_v14  ;;  %v609_v14 = vmax.f32 %v2546_v15, %v2331_v49 }
 0x22b   :  { %998 = vperm.xlu1 %2075, %v2401_v24   ;;  %v385_v24 = vmin.f32 %v2517_v60, %v2334_v50 }
 0x22c   :  { %v2766_v34 = vpop.permute.xlu1 %510 }
 0x22d   :  { %4623 = vst [vmem:[#allocation85_spill] sm:$0xff] %v2766_v34  ;;  %v2788_v34 = vpop.permute.xlu0 %1058 }
 0x22e   :  { %4627 = vst [vmem:[#allocation89_spill] sm:$0xff] %v2788_v34  ;;  %v2805_v34 = vsub.f32 %v385_v24, %v577_v22 }
 0x22f   :  { %1006 = vperm.xlu1 %2075, %v2405_v26   ;;  %v386_v26 = vmin.f32 %v2517_v60, %v2349_v57  ;;  %v610_v60 = vmax.f32 %v2546_v15, %v2337_v52  ;;  %v613_v15 = vmax.f32 %v2554_v12, %v2331_v49 }
 0x230   :  { %v2769_v18 = vpop.permute.xlu1 %518  ;;  %4629 = vst [vmem:[#allocation91_spill] sm:$0xff] %v2805_v34 }
 0x231   :  { %4624 = vst [vmem:[#allocation86_spill] sm:$0xff] %v2769_v18  ;;  %v417_v18 = vmin.f32 %v2521_v61, %v2334_v50 }
 0x233   :  { %1014 = vperm.xlu1 %2075, %v2409_v28   ;;  %v579_v28 = vmax.f32 %v2540_v5, %v2331_v49  ;;  %v421_v5 = vmin.f32 %v2552_v10, %v2334_v50  ;;  %v2826_v24 = vsub.f32 %v417_v18, %v609_v14  ;;  %v2841_v14 = vpop.permute.xlu0 %1066 }
 0x234   :  { %v2774_v20 = vpop.permute.xlu1 %526 }
 0x235   :  { %4626 = vst [vmem:[#allocation88_spill] sm:$0xff] %v2774_v20  ;;  %v418_v20 = vmin.f32 %v2521_v61, %v2349_v57  ;;  %v2807_v61 = vsub.f32 %v386_v26, %v578_v29  ;;  %v2821_v29 = vsub.f32 %v387_v2, %v579_v28  ;;  %4633 = vst [vmem:[#allocation95_spill] sm:$0xff] %v2826_v24  ;;  %v4658_v24 = vld [vmem:[#allocation44_spill] sm:$0xff] }
 0x236   :  { %v581_v26 = vmax.f32 %v2560_v62, %v2331_v49  ;;  %v2846_v28 = vsub.f32 %v421_v5, %v613_v15  ;;  %v621_v5 = vmax.f32 %v2568_v35, %v2331_v49 }
 0x237   :  { %1022 = vperm.xlu1 %2075, %v2413_v30   ;;  %v388_v30 = vmin.f32 %v2527_v63, %v2349_v57  ;;  %4630 = vst [vmem:[#allocation92_spill] sm:$0xff] %v2807_v61  ;;  %4631 = vst [vmem:[#allocation93_spill] sm:$0xff] %v2821_v29  ;;  %v2828_v10 = vsub.f32 %v418_v20, %v610_v60  ;;  %v389_v20 = vmin.f32 %v2548_v8, %v2334_v50  ;;  %v2887_v18 = vpop.permute.xlu0 %1074  ;;  %v4666_v61 = vld [vmem:[#allocation14_spill] sm:$0xff] }
 0x238   :  { %v2799_v51 = vpop.permute.xlu1 %534  ;;  %4635 = vst [vmem:[#allocation97_spill] sm:$0xff] %v2846_v28 }
 0x239   :  { %4628 = vst [vmem:[#allocation90_spill] sm:$0xff] %v2799_v51  ;;  %v614_v51 = vmax.f32 %v2554_v12, %v2337_v52  ;;  %v2824_v22 = vsub.f32 %v388_v30, %v580_v1  ;;  %4634 = vst [vmem:[#allocation96_spill] sm:$0xff] %v2828_v10  ;;  %v622_v30 = vmax.f32 %v2568_v35, %v2337_v52  ;;  %v4651_v35 = vld [vmem:[#allocation15_spill] sm:$0xff] }
 0x23b   :  { %1030 = vperm.xlu1 %2075, %v2418_v33   ;;  %4632 = vst [vmem:[#allocation94_spill] sm:$0xff] %v2824_v22  ;;  %v582_v33 = vmax.f32 %v2560_v62, %v2337_v52  ;;  %v2848_v1 = vsub.f32 %v422_v43, %v614_v51  ;;  %v390_v62 = vmin.f32 %v2548_v8, %v2349_v57 }
 0x23c   :  { %v2832_v12 = vpop.permute.xlu1 %542  ;;  %v2861_v43 = vsub.f32 %v389_v20, %v581_v26  ;;  %v583_v8 = vmax.f32 %v2578_v41, %v2331_v49  ;;  %v618_v26 = vmax.f32 %v2558_v7, %v2337_v52  ;;  %v391_v20 = vmin.f32 %v2566_v55, %v2334_v50  ;;  %v4650_v7 = vld [vmem:[#allocation41_spill] sm:$0xff] }
 0x23d   :  { %4636 = vst [vmem:[#allocation98_spill] sm:$0xff] %v2848_v1  ;;  %v2865_v60 = vsub.f32 %v390_v62, %v582_v33  ;;  %v425_v33 = vmin.f32 %v2588_v11, %v2334_v50  ;;  %v392_v62 = vmin.f32 %v2566_v55, %v2349_v57  ;;  %v426_v51 = vmin.f32 %v2588_v11, %v2349_v57  ;;  %v4642_v11 = vld [vmem:[#allocation37_spill] sm:$0xff] }
 0x23e   :  { %4637 = vst [vmem:[#allocation99_spill] sm:$0xff] %v2861_v43  ;;  %v586_v55 = vmax.f32 %v2594_v3, %v2337_v52  ;;  %v2900_v63 = vsub.f32 %v391_v20, %v583_v8 }
 0x23f   :  { %1038 = vperm.xlu1 %2075, %v2428_v36   ;;  %4638 = vst [vmem:[#allocation100_spill] sm:$0xff] %v2865_v60  ;;  %v584_v36 = vmax.f32 %v2578_v41, %v2337_v52  ;;  %v585_v41 = vmax.f32 %v2594_v3, %v2331_v49  ;;  %v394_v3 = vmin.f32 %v2584_v13, %v2349_v57 }
 0x240   :  { %v2863_v15 = vpop.permute.xlu1 %550  ;;  %4639 = vst [vmem:[#allocation101_spill] sm:$0xff] %v2900_v63  ;;  %v2912_v28 = vsub.f32 %v425_v33, %v617_v47  ;;  %v2918_v20 = vsub.f32 %v426_v51, %v618_v26 }
 0x241   :  { %v2902_v1 = vsub.f32 %v392_v62, %v584_v36  ;;  %v2925_v42 = vsub.f32 %v394_v3, %v586_v55  ;;  %v2939_v55 = vpop.permute.xlu0 %1082  ;;  %v4657_v3 = vld [vmem:[#allocation53_spill] sm:$0xff] }
 0x242   :  { %4641 = vst [vmem:[#allocation103_spill] sm:$0xff] %v2912_v28  ;;  %4643 = vst [vmem:[#allocation37_spill] sm:$0xff] %v2918_v20  ;;  %v4652_v28 = vld [vmem:[#allocation43_spill] sm:$0xff]  ;;  %v589_v10 = vmax.f32 %v4657_v3, %v2331_v49  ;;  %v4667_v20 = vld [vmem:[#allocation16_spill] sm:$0xff] }
 0x243   :  { %1046 = vperm.xlu1 %2075, %v2437_v38   ;;  %4640 = vst [vmem:[#allocation102_spill] sm:$0xff] %v2902_v1  ;;  %v393_v38 = vmin.f32 %v2584_v13, %v2334_v50  ;;  %4646 = vst [vmem:[#allocation105_spill] sm:$0xff] %v2925_v42  ;;  %v4647_v13 = vld [vmem:[#allocation46_spill] sm:$0xff]  ;;  %v4661_v1 = vld [vmem:[#allocation49_spill] sm:$0xff] }
 0x244   :  { %v2897_v2 = vpop.permute.xlu1 %558  ;;  %v587_v47 = vmax.f32 %v4647_v13, %v2331_v49  ;;  %v588_v33 = vmax.f32 %v4647_v13, %v2337_v52  ;;  %v4649_v13 = vld [vmem:[#allocation42_spill] sm:$0xff]  ;;  %v397_v63 = vmin.f32 %v4661_v1, %v2334_v50  ;;  %v398_v42 = vmin.f32 %v4661_v1, %v2349_v57  ;;  %v4674_v1 = vld [vmem:[#allocation55_spill] sm:$0xff] }
 0x245   :  { %v2920_v62 = vsub.f32 %v393_v38, %v585_v41  ;;  %v4648_v41 = vld [vmem:[#allocation40_spill] sm:$0xff]  ;;  %v395_v36 = vmin.f32 %v4649_v13, %v2334_v50  ;;  %v396_v51 = vmin.f32 %v4649_v13, %v2349_v57  ;;  %v4656_v38 = vld [vmem:[#allocation51_spill] sm:$0xff]  ;;  %v2988_v22 = vpop.permute.xlu0 %1346 }
 0x246   :  { %v429_v43 = vmin.f32 %v4656_v38, %v2334_v50 }
 0x247   :  { %4644 = vst [vmem:[#allocation104_spill] sm:$0xff] %v2920_v62  ;;  %1054 = vperm.xlu1 %2075, %v2446_v40   ;;  %v2958_v60 = vsub.f32 %v395_v36, %v587_v47  ;;  %v2960_v13 = vsub.f32 %v396_v51, %v588_v33  ;;  %v4655_v40 = vld [vmem:[#allocation18_spill] sm:$0xff]  ;;  %v590_v36 = vmax.f32 %v4657_v3, %v2337_v52 }
 0x248   :  { %v2931_v8 = vpop.permute.xlu1 %566  ;;  %v2999_v29 = vsub.f32 %v429_v43, %v621_v5  ;;  %v3003_v33 = vsub.f32 %v397_v63, %v589_v10  ;;  %v1091_v51 = vmax.f32 %v2705_v53, %v4666_v61 }
 0x249   :  { %4653 = vst [vmem:[#allocation46_spill] sm:$0xff] %v2958_v60  ;;  %4654 = vst [vmem:[#allocation40_spill] sm:$0xff] %v2960_v13  ;;  %v1092_v13 = vmax.f32 %v2705_v53, %v4667_v20  ;;  %v3013_v5 = vsub.f32 %v398_v42, %v590_v36  ;;  %v3035_v34 = vpop.permute.xlu0 %1358  ;;  %v1098_v42 = vmax.f32 %v2711_v16, %v4667_v20 }
 0x24a   :  { %4663 = vst [vmem:[#allocation42_spill] sm:$0xff] %v2999_v29  ;;  %4665 = vst [vmem:[#allocation15_spill] sm:$0xff] %v3003_v33  ;;  %v1097_v29 = vmax.f32 %v2711_v16, %v4666_v61 }
 0x24b   :  { %1062 = vperm.xlu1 %2075, %v2454_v44   ;;  %v430_v44 = vmin.f32 %v4656_v38, %v2349_v57  ;;  %4669 = vst [vmem:[#allocation43_spill] sm:$0xff] %v3013_v5  ;;  %v594_v5 = vmax.f32 %v2675_v31, %v2337_v52 }
 0x24c   :  { %v2962_v26 = vpop.permute.xlu1 %574 }
 0x24d   :  { %v3001_v3 = vsub.f32 %v430_v44, %v622_v30  ;;  %v4670_v30 = vld [vmem:[#allocation59_spill] sm:$0xff]  ;;  %v3081_v33 = vpop.permute.xlu0 %1366  ;;  %v402_v44 = vmin.f32 %v2664_v54, %v2349_v57 }
 0x24e   :  { %v591_v63 = vmax.f32 %v4670_v30, %v2331_v49  ;;  %v592_v10 = vmax.f32 %v4670_v30, %v2337_v52  ;;  %v399_v30 = vmin.f32 %v4674_v1, %v2334_v50 }
 0x24f   :  { %1070 = vperm.xlu1 %2075, %v2462_v46   ;;  %4664 = vst [vmem:[#allocation41_spill] sm:$0xff] %v3001_v3 }
 0x251   :  { %v775_v46 = vpop.permute.xlu1 %774 }
 0x252   :  { %v899_v62 = vmin.f32 %v775_v46, %v4651_v35  ;;  %v900_v38 = vmin.f32 %v775_v46, %v4655_v40 }
 0x253   :  { %1078 = vperm.xlu1 %2075, %v2470_v48   ;;  %v400_v48 = vmin.f32 %v4674_v1, %v2349_v57  ;;  %v3048_v1 = vsub.f32 %v399_v30, %v591_v63  ;;  %v4686_v30 = vld [vmem:[#allocation22_spill] sm:$0xff] }
 0x254   :  { %v3024_v46 = vsub.f32 %v899_v62, %v1091_v51  ;;  %v3026_v60 = vsub.f32 %v900_v38, %v1092_v13  ;;  %v4680_v13 = vld [vmem:[#allocation57_spill] sm:$0xff]  ;;  %v3131_v51 = vpop.permute.xlu0 %1374 }
 0x255   :  { %v3037_v53 = vpop.permute.xlu1 %778  ;;  %4678 = vst [vmem:[#allocation44_spill] sm:$0xff] %v3048_v1  ;;  %v3050_v43 = vsub.f32 %v400_v48, %v592_v10  ;;  %v593_v48 = vmax.f32 %v2675_v31, %v2331_v49  ;;  %v4683_v10 = vmov 4  }
 0x256   :  { %4672 = vst [vmem:[#allocation18_spill] sm:$0xff] %v3024_v46  ;;  %4673 = vst [vmem:[#allocation51_spill] sm:$0xff] %v3026_v60 }
 0x257   :  { %4675 = vst [vmem:[#allocation53_spill] sm:$0xff] %v3037_v53  ;;  %4679 = vst [vmem:[#allocation49_spill] sm:$0xff] %v3050_v43  ;;  %1086 = vperm.xlu1 %2075, %v2515_v59   ;;  %v401_v59 = vmin.f32 %v2664_v54, %v2334_v50  ;;  %v408_v54 = vmin.f32 %v2708_v23, %v2349_v57  ;;  %v4737_v43 = vld [vmem:[#allocation89_spill] sm:$0xff] }
 0x259   :  { %v787_v62 = vpop.permute.xlu1 %786  ;;  %v3099_v47 = vsub.f32 %v401_v59, %v593_v48  ;;  %v596_v59 = vmax.f32 %v2694_v9, %v2337_v52  ;;  %v407_v48 = vmin.f32 %v2708_v23, %v2334_v50  ;;  %v4701_v23 = vmax.f32 %v2536_v4, %v2331_v49 }
 0x25a   :  { %v905_v3 = vmin.f32 %v787_v62, %v4651_v35  ;;  %v906_v63 = vmin.f32 %v787_v62, %v4655_v40 }
 0x25b   :  { %2078 = vset.pattern.permute.xlu1 %v4683_v10  ;;  %4688 = vst [vmem:[#allocation59_spill] sm:$0xff] %v3099_v47  ;;  %v3111_v10 = vsub.f32 %v402_v44, %v594_v5  ;;  %v4693_v5 = vld [vmem:[#allocation65_spill] sm:$0xff]  ;;  %v3164_v31 = vsub.f32 %v407_v48, %v4701_v23  ;;  %v4705_v48 = vld [vmem:[#allocation74_spill] sm:$0xff]  ;;  %v3183_v47 = vpop.permute.xlu0 %1382 }
 0x25c   :  { %v3088_v36 = vsub.f32 %v905_v3, %v1097_v29  ;;  %v3090_v38 = vsub.f32 %v906_v63, %v1098_v42  ;;  %1350 = vperm.xlu1 %2078, %v4686_v30   ;;  %v1101_v29 = vmax.f32 %v2718_v21, %v4666_v61  ;;  %v1102_v3 = vmax.f32 %v2718_v21, %v4667_v20 }
 0x25d   :  { %v795_v16 = vpop.permute.xlu1 %794  ;;  %4690 = vst [vmem:[#allocation55_spill] sm:$0xff] %v3111_v10  ;;  %v595_v21 = vmax.f32 %v2694_v9, %v2331_v49  ;;  %v403_v44 = vmin.f32 %v4693_v5, %v2334_v50  ;;  %v404_v9 = vmin.f32 %v4693_v5, %v2349_v57  ;;  %v442_v23 = vmin.f32 %v4705_v48, %v2349_v57 }
 0x25e   :  { %4684 = vst [vmem:[#allocation14_spill] sm:$0xff] %v3088_v36  ;;  %4685 = vst [vmem:[#allocation16_spill] sm:$0xff] %v3090_v38  ;;  %v909_v42 = vmin.f32 %v795_v16, %v4651_v35  ;;  %v910_v63 = vmin.f32 %v795_v16, %v4655_v40 }
 0x25f   :  { %v3148_v56 = vsub.f32 %v403_v44, %v595_v21  ;;  %v3159_v10 = vsub.f32 %v404_v9, %v596_v59  ;;  %v1109_v44 = vmax.f32 %v2731_v25, %v4666_v61 }
 0x260   :  { %v3119_v62 = vsub.f32 %v909_v42, %v1101_v29  ;;  %v3121_v16 = vsub.f32 %v910_v63, %v1102_v3  ;;  %1354 = vperm.xlu1 %2078, %v2387_v17   ;;  %v1105_v29 = vmax.f32 %v2724_v32, %v4666_v61  ;;  %v1106_v17 = vmax.f32 %v2724_v32, %v4667_v20  ;;  %v4699_v63 = vld [vmem:[#allocation67_spill] sm:$0xff] }
 0x261   :  { %v803_v58 = vpop.permute.xlu1 %802  ;;  %4695 = vst [vmem:[#allocation65_spill] sm:$0xff] %v3148_v56  ;;  %4702 = vst [vmem:[#allocation67_spill] sm:$0xff] %v3164_v31  ;;  %v4724_v31 = vld [vmem:[#allocation76_spill] sm:$0xff] }
 0x262   :  { %4691 = vst [vmem:[#allocation57_spill] sm:$0xff] %v3119_v62  ;;  %4692 = vst [vmem:[#allocation22_spill] sm:$0xff] %v3121_v16  ;;  %v913_v3 = vmin.f32 %v803_v58, %v4651_v35  ;;  %v914_v42 = vmin.f32 %v803_v58, %v4655_v40  ;;  %v4698_v58 = vld [vmem:[#allocation23_spill] sm:$0xff] }
 0x263   :  { %4700 = vst [vmem:[#allocation23_spill] sm:$0xff] %v3159_v10  ;;  %v4725_v10 = vmax.f32 %v4650_v7, %v2331_v49  ;;  %v4734_v62 = vld [vmem:[#allocation87_spill] sm:$0xff] }
 0x264   :  { %v3150_v32 = vsub.f32 %v913_v3, %v1105_v29  ;;  %v3152_v16 = vsub.f32 %v914_v42, %v1106_v17  ;;  %1362 = vperm.xlu1 %2078, %v4698_v58   ;;  %v1110_v29 = vmax.f32 %v2731_v25, %v4667_v20  ;;  %v4703_v42 = vmax.f32 %v2536_v4, %v2337_v52  ;;  %v4708_v4 = vld [vmem:[#allocation24_spill] sm:$0xff] }
 0x265   :  { %v811_v21 = vpop.permute.xlu1 %810  ;;  %v441_v58 = vmin.f32 %v4705_v48, %v2334_v50  ;;  %v1113_v25 = vmax.f32 %v2737_v39, %v4666_v61  ;;  %v4712_v48 = vmax.f32 %v4648_v41, %v2337_v52  ;;  %v1134_v1 = vmax.f32 %v4734_v62, %v4667_v20 }
 0x266   :  { %4696 = vst [vmem:[#allocation106_spill] sm:$0xff] %v3150_v32  ;;  %4697 = vst [vmem:[#allocation107_spill] sm:$0xff] %v3152_v16  ;;  %v917_v17 = vmin.f32 %v811_v21, %v4651_v35  ;;  %v918_v3 = vmin.f32 %v811_v21, %v4655_v40  ;;  %v3177_v9 = vsub.f32 %v408_v54, %v4703_v42  ;;  %v4709_v42 = vld [vmem:[#allocation70_spill] sm:$0xff]  ;;  %v4715_v54 = vld [vmem:[#allocation25_spill] sm:$0xff] }
 0x267   :  { %v4711_v21 = vmax.f32 %v4648_v41, %v2331_v49  ;;  %v3216_v16 = vsub.f32 %v442_v23, %v4712_v48  ;;  %v1117_v23 = vmax.f32 %v2745_v45, %v4666_v61  ;;  %v445_v48 = vmin.f32 %v2739_v27, %v2334_v50  ;;  %v4722_v41 = vld [vmem:[#allocation26_spill] sm:$0xff] }
 0x268   :  { %4704 = vst [vmem:[#allocation108_spill] sm:$0xff] %v3177_v9  ;;  %v3188_v5 = vsub.f32 %v917_v17, %v1109_v44  ;;  %v3190_v59 = vsub.f32 %v918_v3, %v1110_v29  ;;  %1370 = vperm.xlu1 %2078, %v4708_v4   ;;  %v1114_v44 = vmax.f32 %v2737_v39, %v4667_v20  ;;  %v4710_v4 = vld [vmem:[#allocation72_spill] sm:$0xff]  ;;  %v3235_v39 = vpop.permute.xlu0 %1390 }
 0x269   :  { %v819_v32 = vpop.permute.xlu1 %818  ;;  %v3211_v30 = vsub.f32 %v441_v58, %v4711_v21  ;;  %v4723_v21 = vld [vmem:[#allocation79_spill] sm:$0xff] }
 0x26a   :  { %4706 = vst [vmem:[#allocation74_spill] sm:$0xff] %v3188_v5  ;;  %4707 = vst [vmem:[#allocation109_spill] sm:$0xff] %v3190_v59  ;;  %v921_v29 = vmin.f32 %v819_v32, %v4651_v35  ;;  %v922_v17 = vmin.f32 %v819_v32, %v4655_v40  ;;  %v413_v32 = vmin.f32 %v2734_v37, %v2334_v50 }
 0x26b   :  { %v1121_v9 = vmax.f32 %v4723_v21, %v4666_v61  ;;  %v1122_v5 = vmax.f32 %v4723_v21, %v4667_v20 }
 0x26c   :  { %v3222_v3 = vsub.f32 %v921_v29, %v1113_v25  ;;  %v3224_v59 = vsub.f32 %v922_v17, %v1114_v44  ;;  %1378 = vperm.xlu1 %2078, %v4715_v54   ;;  %v1118_v44 = vmax.f32 %v2745_v45, %v4667_v20  ;;  %v446_v54 = vmin.f32 %v2739_v27, %v2349_v57 }
 0x26d   :  { %v827_v25 = vpop.permute.xlu1 %826  ;;  %v414_v45 = vmin.f32 %v2734_v37, %v2349_v57  ;;  %v4718_v27 = vmax.f32 %v2542_v6, %v2331_v49 }
 0x26e   :  { %4713 = vst [vmem:[#allocation24_spill] sm:$0xff] %v3222_v3  ;;  %4714 = vst [vmem:[#allocation70_spill] sm:$0xff] %v3224_v59  ;;  %v925_v29 = vmin.f32 %v827_v25, %v4651_v35  ;;  %v926_v17 = vmin.f32 %v827_v25, %v4655_v40  ;;  %v4717_v59 = vld [vmem:[#allocation75_spill] sm:$0xff] }
 0x26f   :  { %v411_v3 = vmin.f32 %v4717_v59, %v2334_v50  ;;  %v3254_v58 = vsub.f32 %v413_v32, %v4718_v27  ;;  %v3270_v32 = vsub.f32 %v445_v48, %v4725_v10  ;;  %v4727_v27 = vld [vmem:[#allocation82_spill] sm:$0xff]  ;;  %v4728_v48 = vld [vmem:[#allocation84_spill] sm:$0xff] }
 0x270   :  { %v3256_v19 = vsub.f32 %v925_v29, %v1117_v23  ;;  %v3258_v25 = vsub.f32 %v926_v17, %v1118_v44  ;;  %1386 = vperm.xlu1 %2078, %v4722_v41   ;;  %v4726_v41 = vmax.f32 %v4650_v7, %v2337_v52  ;;  %v1125_v37 = vmax.f32 %v4727_v27, %v4666_v61 }
 0x271   :  { %4719 = vst [vmem:[#allocation72_spill] sm:$0xff] %v3254_v58  ;;  %v835_v23 = vpop.permute.xlu1 %834  ;;  %v1126_v10 = vmax.f32 %v4727_v27, %v4667_v20  ;;  %v1130_v44 = vmax.f32 %v4728_v48, %v4667_v20  ;;  %v4729_v7 = vmax.f32 %v2542_v6, %v2337_v52  ;;  %v4733_v27 = vld [vmem:[#allocation27_spill] sm:$0xff]  ;;  %v4735_v6 = vld [vmem:[#allocation80_spill] sm:$0xff]  ;;  %v1137_v58 = vmax.f32 %v4737_v43, %v4666_v61 }
 0x272   :  { %4720 = vst [vmem:[#allocation25_spill] sm:$0xff] %v3256_v19  ;;  %4721 = vst [vmem:[#allocation75_spill] sm:$0xff] %v3258_v25  ;;  %v3277_v29 = vsub.f32 %v446_v54, %v4726_v41  ;;  %v929_v17 = vmin.f32 %v835_v23, %v4651_v35  ;;  %v930_v21 = vmin.f32 %v835_v23, %v4655_v40  ;;  %v3289_v19 = vpop.permute.xlu0 %1398  ;;  %v4738_v23 = vld [vmem:[#allocation78_spill] sm:$0xff] }
 0x273   :  { %v1129_v25 = vmax.f32 %v4728_v48, %v4666_v61  ;;  %v3294_v54 = vsub.f32 %v414_v45, %v4729_v7  ;;  %v1133_v48 = vmax.f32 %v4734_v62, %v4666_v61  ;;  %v597_v45 = vmax.f32 %v4735_v6, %v2331_v49 }
 0x274   :  { %v3297_v41 = vsub.f32 %v929_v17, %v1121_v9  ;;  %v3299_v56 = vsub.f32 %v930_v21, %v1122_v5  ;;  %1394 = vperm.xlu1 %2078, %v4733_v27   ;;  %v4736_v9 = vld [vmem:[#allocation77_spill] sm:$0xff]  ;;  %v1138_v62 = vmax.f32 %v4737_v43, %v4667_v20  ;;  %v4754_v43 = vld [vmem:[#allocation20_spill] sm:$0xff] }
 0x275   :  { %4730 = vst [vmem:[#allocation26_spill] sm:$0xff] %v3294_v54  ;;  %v843_v7 = vpop.permute.xlu1 %842  ;;  %v415_v5 = vmin.f32 %v4736_v9, %v2334_v50  ;;  %v416_v27 = vmin.f32 %v4736_v9, %v2349_v57  ;;  %v4742_v9 = vld [vmem:[#allocation28_spill] sm:$0xff] }
 0x276   :  { %4731 = vst [vmem:[#allocation79_spill] sm:$0xff] %v3297_v41  ;;  %4732 = vst [vmem:[#allocation76_spill] sm:$0xff] %v3299_v56  ;;  %v933_v17 = vmin.f32 %v843_v7, %v4651_v35  ;;  %v934_v21 = vmin.f32 %v843_v7, %v4655_v40  ;;  %v598_v56 = vmax.f32 %v4735_v6, %v2337_v52  ;;  %v4739_v41 = vld [vmem:[#allocation83_spill] sm:$0xff] }
 0x277   :  { %v603_v38 = vmax.f32 %v4739_v41, %v2331_v49  ;;  %v4743_v6 = vmin.f32 %v4709_v42, %v2334_v50  ;;  %v604_v54 = vmax.f32 %v4739_v41, %v2337_v52 }
 0x278   :  { %v3326_v36 = vsub.f32 %v933_v17, %v1125_v37  ;;  %v3328_v7 = vsub.f32 %v934_v21, %v1126_v10  ;;  %1402 = vperm.xlu1 %2078, %v4742_v9   ;;  %v3342_v37 = vpop.permute.xlu0 %1406  ;;  %v4747_v17 = vld [vmem:[#allocation85_spill] sm:$0xff] }
 0x279   :  { %v3338_v46 = vsub.f32 %v4743_v6, %v597_v45  ;;  %v851_v10 = vpop.permute.xlu1 %850  ;;  %v4745_v6 = vmin.f32 %v4709_v42, %v2349_v57  ;;  %v608_v21 = vmax.f32 %v4747_v17, %v2337_v52  ;;  %v4750_v45 = vld [vmem:[#allocation29_spill] sm:$0xff]  ;;  %v3390_v42 = vadd.f32 %v2988_v22, %v4754_v43 }
 0x27a   :  { %4740 = vst [vmem:[#allocation82_spill] sm:$0xff] %v3326_v36  ;;  %4741 = vst [vmem:[#allocation84_spill] sm:$0xff] %v3328_v7  ;;  %v937_v9 = vmin.f32 %v851_v10, %v4651_v35  ;;  %v938_v60 = vmin.f32 %v851_v10, %v4655_v40  ;;  %v607_v7 = vmax.f32 %v4747_v17, %v2331_v49 }
 0x27b   :  { %4744 = vst [vmem:[#allocation27_spill] sm:$0xff] %v3338_v46  ;;  %v3355_v41 = vsub.f32 %v4745_v6, %v598_v56  ;;  %v3361_v36 = vsub.f32 %v411_v3, %v603_v38  ;;  %v4752_v38 = vmin.f32 %v4717_v59, %v2349_v57  ;;  %v4755_v59 = vld [vmem:[#allocation21_spill] sm:$0xff]  ;;  %v4758_v56 = vld [vmem:[#allocation30_spill] sm:$0xff] }
 0x27c   :  { %v3365_v10 = vsub.f32 %v937_v9, %v1129_v25  ;;  %v3367_v53 = vsub.f32 %v938_v60, %v1130_v44  ;;  %1410 = vperm.xlu1 %2078, %v4750_v45   ;;  %v4753_v25 = vld [vmem:[#allocation86_spill] sm:$0xff] }
 0x27d   :  { %4746 = vst [vmem:[#allocation87_spill] sm:$0xff] %v3355_v41  ;;  %v3378_v3 = vsub.f32 %v4752_v38, %v604_v54  ;;  %v859_v17 = vpop.permute.xlu1 %858  ;;  %v611_v60 = vmax.f32 %v4753_v25, %v2331_v49  ;;  %v612_v44 = vmax.f32 %v4753_v25, %v2337_v52  ;;  %v3394_v54 = vadd.f32 %v2988_v22, %v4755_v59 }
 0x27e   :  { %4748 = vst [vmem:[#allocation80_spill] sm:$0xff] %v3365_v10  ;;  %4749 = vst [vmem:[#allocation77_spill] sm:$0xff] %v3367_v53  ;;  %v941_v9 = vmin.f32 %v859_v17, %v4651_v35  ;;  %v942_v45 = vmin.f32 %v859_v17, %v4655_v40  ;;  %v3396_v38 = vsub.f32 %v415_v5, %v607_v7  ;;  %v3398_v53 = vpop.permute.xlu0 %1414  ;;  %v4759_v5 = vld [vmem:[#allocation88_spill] sm:$0xff] }
 0x27f   :  { %v3401_v10 = vsub.f32 %v416_v27, %v608_v21  ;;  %v3411_v22 = vadd.f32 %v3035_v34, %v4754_v43  ;;  %v615_v7 = vmax.f32 %v4759_v5, %v2331_v49  ;;  %v616_v25 = vmax.f32 %v4759_v5, %v2337_v52 }
 0x280   :  { %v3403_v17 = vsub.f32 %v941_v9, %v1133_v48  ;;  %v3405_v46 = vsub.f32 %v942_v45, %v1134_v1  ;;  %1418 = vperm.xlu1 %2078, %v4758_v56   ;;  %v4760_v48 = vmin.f32 %v2529_v0, %v2334_v50  ;;  %v4761_v21 = vmin.f32 %v2529_v0, %v2349_v57 }
 0x281   :  { %v867_v27 = vpop.permute.xlu1 %866  ;;  %v3432_v5 = vadd.f32 %v3035_v34, %v4755_v59  ;;  %v3448_v34 = vadd.f32 %v3081_v33, %v4754_v43  ;;  %v3452_v41 = vadd.f32 %v3081_v33, %v4755_v59 }
 0x282   :  { %4756 = vst [vmem:[#allocation89_spill] sm:$0xff] %v3403_v17  ;;  %4757 = vst [vmem:[#allocation78_spill] sm:$0xff] %v3405_v46  ;;  %v3420_v1 = vsub.f32 %v4760_v48, %v611_v60  ;;  %v3425_v56 = vsub.f32 %v4761_v21, %v612_v44  ;;  %v945_v9 = vmin.f32 %v867_v27, %v4651_v35  ;;  %v4763_v46 = vld [vmem:[#allocation90_spill] sm:$0xff]  ;;  %v4766_v21 = vld [vmem:[#allocation31_spill] sm:$0xff] }
 0x283   :  { %v946_v45 = vmin.f32 %v867_v27, %v4655_v40  ;;  %v619_v17 = vmax.f32 %v4763_v46, %v2331_v49  ;;  %v620_v60 = vmax.f32 %v4763_v46, %v2337_v52  ;;  %v623_v44 = vmax.f32 %v2832_v12, %v2331_v49 }
 0x284   :  { %4762 = vst [vmem:[#allocation83_spill] sm:$0xff] %v3425_v56  ;;  %v3441_v48 = vsub.f32 %v945_v9, %v1137_v58  ;;  %1426 = vperm.xlu1 %2078, %v4766_v21   ;;  %v4767_v46 = vmin.f32 %v4642_v11, %v2334_v50  ;;  %v4769_v58 = vmin.f32 %v4642_v11, %v2349_v57  ;;  %v3464_v9 = vpop.permute.xlu0 %1422 }
 0x285   :  { %v3443_v27 = vsub.f32 %v946_v45, %v1138_v62  ;;  %v875_v45 = vpop.permute.xlu1 %874  ;;  %v4771_v11 = vmin.f32 %v4658_v24, %v2334_v50  ;;  %v4775_v21 = vmin.f32 %v4680_v13, %v2334_v50 }
 0x286   :  { %4764 = vst [vmem:[#allocation28_spill] sm:$0xff] %v3441_v48  ;;  %v3457_v0 = vsub.f32 %v4767_v46, %v615_v7  ;;  %v3462_v62 = vsub.f32 %v4769_v58, %v616_v25  ;;  %v949_v33 = vmin.f32 %v875_v45, %v4651_v35  ;;  %v950_v48 = vmin.f32 %v875_v45, %v4655_v40 }
 0x287   :  { %4765 = vst [vmem:[#allocation85_spill] sm:$0xff] %v3443_v27  ;;  %v3472_v7 = vadd.f32 %v3131_v51, %v4754_v43  ;;  %v3477_v25 = vsub.f32 %v4771_v11, %v619_v17  ;;  %v4773_v46 = vmin.f32 %v4658_v24, %v2349_v57  ;;  %v624_v27 = vmax.f32 %v2832_v12, %v2337_v52  ;;  %v4781_v12 = vld [vmem:[#allocation32_spill] sm:$0xff] }
 0x288   :  { %4768 = vst [vmem:[#allocation29_spill] sm:$0xff] %v3457_v0  ;;  %4770 = vst [vmem:[#allocation86_spill] sm:$0xff] %v3462_v62  ;;  %v3488_v45 = vadd.f32 %v3131_v51, %v4755_v59  ;;  %v3493_v6 = vsub.f32 %v4775_v21, %v623_v44  ;;  %v4777_v17 = vmax.f32 %v2841_v14, %v4666_v61  ;;  %1434 = vperm.xlu1 %2078, %v4781_v12  }
 0x289   :  { %4772 = vst [vmem:[#allocation20_spill] sm:$0xff] %v3477_v25  ;;  %v3482_v58 = vsub.f32 %v4773_v46, %v620_v60  ;;  %v4779_v24 = vmax.f32 %v2841_v14, %v4667_v20  ;;  %v627_v44 = vmax.f32 %v2863_v15, %v2331_v49  ;;  %v628_v21 = vmax.f32 %v2863_v15, %v2337_v52  ;;  %v883_v56 = vpop.permute.xlu1 %882 }
 0x28a   :  { %4776 = vst [vmem:[#allocation30_spill] sm:$0xff] %v3493_v6  ;;  %v3498_v11 = vsub.f32 %v949_v33, %v4777_v17  ;;  %v3514_v33 = vadd.f32 %v3183_v47, %v4754_v43  ;;  %v3518_v14 = vadd.f32 %v3183_v47, %v4755_v59  ;;  %v954_v17 = vmin.f32 %v883_v56, %v4655_v40 }
 0x28b   :  { %4774 = vst [vmem:[#allocation21_spill] sm:$0xff] %v3482_v58  ;;  %v3503_v60 = vsub.f32 %v950_v48, %v4779_v24  ;;  %v953_v48 = vmin.f32 %v883_v56, %v4651_v35  ;;  %v4782_v15 = vmin.f32 %v4680_v13, %v2349_v57  ;;  %v3531_v51 = vadd.f32 %v3235_v39, %v4754_v43 }
 0x28c   :  { %4778 = vst [vmem:[#allocation88_spill] sm:$0xff] %v3498_v11  ;;  %v3538_v56 = vadd.f32 %v3235_v39, %v4755_v59  ;;  %v4784_v12 = vmax.f32 %v2887_v18, %v4666_v61  ;;  %v4785_v13 = vmax.f32 %v2887_v18, %v4667_v20  ;;  %v4787_v11 = vmin.f32 %v4699_v63, %v2334_v50 }
 0x28d   :  { %4780 = vst [vmem:[#allocation90_spill] sm:$0xff] %v3503_v60  ;;  %v3527_v46 = vsub.f32 %v4782_v15, %v624_v27  ;;  %v3533_v60 = vpop.permute.xlu0 %1430  ;;  %v4786_v15 = vld [vmem:[#allocation33_spill] sm:$0xff]  ;;  %v4788_v47 = vmin.f32 %v4699_v63, %v2349_v57  ;;  %v631_v6 = vmax.f32 %v2897_v2, %v2331_v49  ;;  %v891_v18 = vpop.permute.xlu1 %890  ;;  %v3566_v63 = vadd.f32 %v3289_v19, %v4754_v43 }
 0x28e   :  { %v1209_v24 = vsub.f32 %v953_v48, %v4784_v12  ;;  %v1210_v27 = vsub.f32 %v954_v17, %v4785_v13  ;;  %1442 = vperm.xlu1 %2078, %v4786_v15   ;;  %v3550_v58 = vsub.f32 %v4787_v11, %v627_v44  ;;  %v632_v48 = vmax.f32 %v2897_v2, %v2337_v52 }
 0x28f   :  { %4783 = vst [vmem:[#allocation31_spill] sm:$0xff] %v3527_v46  ;;  %v3555_v39 = vsub.f32 %v4788_v47, %v628_v21  ;;  %v957_v13 = vmin.f32 %v891_v18, %v4651_v35  ;;  %v958_v15 = vmin.f32 %v891_v18, %v4655_v40  ;;  %v3570_v44 = vadd.f32 %v3289_v19, %v4755_v59  ;;  %v4791_v18 = vld [vmem:[#allocation34_spill] sm:$0xff] }
 0x290   :  { %v1273_v17 = vmax.f32 %v1209_v24, 0.0  ;;  %v1274_v12 = vmax.f32 %v1210_v27, 0.0  ;;  %v635_v2 = vmax.f32 %v2931_v8, %v2331_v49  ;;  %v4789_v21 = vmax.f32 %v2939_v55, %v4666_v61 }
 0x291   :  { %v4790_v47 = vmax.f32 %v2939_v55, %v4667_v20  ;;  %v4792_v11 = vmax.f32 %v3211_v30, 0.0  ;;  %v4794_v19 = vmax.f32 %v3216_v16, 0.0  ;;  %v4797_v55 = vmin.f32 %v4710_v4, %v2349_v57  ;;  %v1439_v30 = vpop.permute.xlu0 %1438 }
 0x292   :  { %v1213_v24 = vsub.f32 %v957_v13, %v4789_v21  ;;  %1450 = vperm.xlu1 %2078, %v4791_v18   ;;  %v4796_v13 = vmin.f32 %v4710_v4, %v2334_v50  ;;  %v636_v16 = vmax.f32 %v2931_v8, %v2337_v52  ;;  %v3607_v18 = vadd.f32 %v3342_v37, %v4754_v43 }
 0x293   :  { %v1214_v27 = vsub.f32 %v958_v15, %v4790_v47  ;;  %v3583_v46 = vmul.f32 %v1273_v17, %v4792_v11  ;;  %v3587_v25 = vmul.f32 %v1274_v12, %v4794_v19  ;;  %v3599_v15 = vsub.f32 %v4797_v55, %v632_v48  ;;  %v963_v47 = vpop.permute.xlu1 %962 }
 0x294   :  { %v3594_v21 = vsub.f32 %v4796_v13, %v631_v6  ;;  %v639_v17 = vmax.f32 %v2962_v26, %v2331_v49  ;;  %v1277_v12 = vmax.f32 %v1213_v24, 0.0  ;;  %v3611_v6 = vadd.f32 %v3342_v37, %v4755_v59 }
 0x295   :  { %4793 = vst [vmem:[#allocation32_spill] sm:$0xff] %v3583_v46  ;;  %4795 = vst [vmem:[#allocation33_spill] sm:$0xff] %v3587_v25  ;;  %v1278_v11 = vmax.f32 %v1214_v27, 0.0  ;;  %v1089_v4 = vmax.f32 %v963_v47, %v4666_v61  ;;  %v1090_v48 = vmax.f32 %v963_v47, %v4667_v20  ;;  %v4799_v8 = vmin.f32 %v4724_v31, %v2334_v50  ;;  %v4801_v27 = vld [vmem:[#allocation35_spill] sm:$0xff]  ;;  %v1447_v62 = vpop.permute.xlu0 %1446 }
 0x296   :  { %4798 = vst [vmem:[#allocation34_spill] sm:$0xff] %v3599_v15  ;;  %v640_v24 = vmax.f32 %v2962_v26, %v2337_v52  ;;  %1458 = vperm.xlu1 %2078, %v4801_v27   ;;  %v4802_v13 = vmax.f32 %v3270_v32, 0.0  ;;  %v4804_v37 = vmax.f32 %v3277_v29, 0.0  ;;  %v4807_v26 = vmin.f32 %v4652_v28, %v4655_v40 }
 0x297   :  { %v3618_v19 = vsub.f32 %v4799_v8, %v635_v2  ;;  %v4806_v2 = vmin.f32 %v4652_v28, %v4651_v35  ;;  %v4808_v32 = vmin.f32 %v4724_v31, %v2349_v57  ;;  %v4810_v29 = vmin.f32 %v4738_v23, %v2334_v50 }
 0x298   :  { %v3625_v55 = vmul.f32 %v1277_v12, %v4802_v13  ;;  %v3629_v0 = vmul.f32 %v1278_v11, %v4804_v37  ;;  %v1154_v27 = vsub.f32 %v4807_v26, %v1090_v48  ;;  %v4812_v13 = vld [vmem:[#allocation53_spill] sm:$0xff] }
 0x299   :  { %4800 = vst [vmem:[#allocation110_spill] sm:$0xff] %v3618_v19  ;;  %v1153_v8 = vsub.f32 %v4806_v2, %v1089_v4  ;;  %v3642_v12 = vsub.f32 %v4808_v32, %v636_v16  ;;  %v3647_v11 = vsub.f32 %v4810_v29, %v639_v17  ;;  %v901_v37 = vmin.f32 %v4812_v13, %v4651_v35  ;;  %v971_v2 = vpop.permute.xlu1 %970  ;;  %v4818_v16 = vld [vmem:[#allocation92_spill] sm:$0xff]  ;;  %v4832_v19 = vld [vmem:[#allocation14_spill] sm:$0xff] }
 0x29a   :  { %4803 = vst [vmem:[#allocation35_spill] sm:$0xff] %v3625_v55  ;;  %4805 = vst [vmem:[#allocation111_spill] sm:$0xff] %v3629_v0  ;;  %v902_v4 = vmin.f32 %v4812_v13, %v4655_v40  ;;  %v1218_v48 = vmax.f32 %v1154_v27, 0.0  ;;  %v1093_v26 = vmax.f32 %v971_v2, %v4666_v61  ;;  %v1094_v31 = vmax.f32 %v971_v2, %v4667_v20  ;;  %v4816_v27 = vld [vmem:[#allocation91_spill] sm:$0xff] }
 0x29b   :  { %4809 = vst [vmem:[#allocation112_spill] sm:$0xff] %v3642_v12  ;;  %4811 = vst [vmem:[#allocation113_spill] sm:$0xff] %v3647_v11  ;;  %v1217_v28 = vmax.f32 %v1153_v8, 0.0  ;;  %v3658_v17 = vadd.f32 %v3398_v53, %v4754_v43  ;;  %v3662_v32 = vadd.f32 %v3398_v53, %v4755_v59  ;;  %v4813_v29 = vmin.f32 %v4738_v23, %v2349_v57  ;;  %v4815_v8 = vld [vmem:[#allocation36_spill] sm:$0xff] }
 0x29c   :  { %1466 = vperm.xlu1 %2078, %v4815_v8   ;;  %v4817_v47 = vmax.f32 %v4816_v27, 0.0  ;;  %v4819_v0 = vmax.f32 %v4818_v16, 0.0  ;;  %v3678_v25 = vsub.f32 %v901_v37, %v1093_v26  ;;  %v3680_v46 = vsub.f32 %v902_v4, %v1094_v31 }
 0x29d   :  { %v3667_v13 = vsub.f32 %v4813_v29, %v640_v24  ;;  %v3685_v23 = vadd.f32 %v3464_v9, %v4754_v43  ;;  %v3689_v24 = vadd.f32 %v3464_v9, %v4755_v59  ;;  %v975_v29 = vpop.permute.xlu1 %974  ;;  %v3701_v16 = vadd.f32 %v3533_v60, %v4754_v43 }
 0x29e   :  { %v3672_v2 = vmul.f32 %v1217_v28, %v4817_v47  ;;  %v3676_v55 = vmul.f32 %v1218_v48, %v4819_v0  ;;  %4820 = vst [vmem:[#allocation36_spill] sm:$0xff] %v3680_v46  ;;  %v4821_v47 = vld [vmem:[#allocation18_spill] sm:$0xff]  ;;  %v4822_v48 = vld [vmem:[#allocation51_spill] sm:$0xff]  ;;  %v1095_v9 = vmax.f32 %v975_v29, %v4666_v61  ;;  %v1096_v8 = vmax.f32 %v975_v29, %v4667_v20  ;;  %v4823_v0 = vld [vmem:[#allocation45_spill] sm:$0xff] }
 0x29f   :  { %4814 = vst [vmem:[#allocation53_spill] sm:$0xff] %v3667_v13  ;;  %v1219_v28 = vmax.f32 %v4821_v47, 0.0  ;;  %v1220_v37 = vmax.f32 %v4822_v48, 0.0  ;;  %v3707_v27 = vadd.f32 %v3533_v60, %v4755_v59  ;;  %v3710_v47 = vadd.f32 %v1439_v30, %v4754_v43  ;;  %v4826_v60 = vld [vmem:[#allocation93_spill] sm:$0xff] }
 0x2a0   :  { %v1537_v4 = vsub.f32 %v3390_v42, %v3672_v2  ;;  %v1538_v26 = vsub.f32 %v3394_v54, %v3676_v55  ;;  %v1455_v42 = vpop.permute.xlu0 %1454  ;;  %v3713_v31 = vadd.f32 %v1439_v30, %v4755_v59  ;;  %v4824_v53 = vmin.f32 %v4823_v0, %v4651_v35  ;;  %v4829_v30 = vld [vmem:[#allocation94_spill] sm:$0xff] }
 0x2a1   :  { %v4825_v29 = vmin.f32 %v4823_v0, %v4655_v40  ;;  %v983_v50 = vpop.permute.xlu1 %982  ;;  %v4827_v49 = vmax.f32 %v4826_v60, 0.0  ;;  %v4830_v11 = vmax.f32 %v4829_v30, 0.0  ;;  %v4840_v30 = vld [vmem:[#allocation102_spill] sm:$0xff] }
 0x2a2   :  { %v1601_v48 = vmax.f32 %v1537_v4, 1e-06  ;;  %v1602_v54 = vmax.f32 %v1538_v26, 1e-06  ;;  %v1159_v57 = vsub.f32 %v4824_v53, %v1095_v9  ;;  %v1099_v4 = vmax.f32 %v983_v50, %v4666_v61 }
 0x2a3   :  { %v1160_v52 = vsub.f32 %v4825_v29, %v1096_v8  ;;  %v3723_v13 = vmul.f32 %v1219_v28, %v4827_v49  ;;  %v1100_v26 = vmax.f32 %v983_v50, %v4667_v20  ;;  %v3729_v12 = vmul.f32 %v1220_v37, %v4830_v11  ;;  %v4833_v28 = vld [vmem:[#allocation47_spill] sm:$0xff]  ;;  %v4836_v37 = vld [vmem:[#allocation16_spill] sm:$0xff] }
 0x2a4   :  { %2083 = vrcp.f32 %v1601_v48  ;;  %v1225_v53 = vmax.f32 %v4832_v19, 0.0  ;;  %v1223_v9 = vmax.f32 %v1159_v57, 0.0  ;;  %v3733_v8 = vadd.f32 %v1447_v62, %v4754_v43  ;;  %v1463_v46 = vpop.permute.xlu0 %1462 }
 0x2a5   :  { %4828 = vst [vmem:[#allocation91_spill] sm:$0xff] %v3723_v13  ;;  %4831 = vst [vmem:[#allocation92_spill] sm:$0xff] %v3729_v12  ;;  %2085 = vrcp.f32 %v1602_v54  ;;  %v1224_v0 = vmax.f32 %v1160_v52, 0.0  ;;  %v3736_v49 = vadd.f32 %v1447_v62, %v4755_v59  ;;  %v4834_v48 = vmin.f32 %v4833_v28, %v4651_v35  ;;  %v4838_v52 = vld [vmem:[#allocation101_spill] sm:$0xff]  ;;  %v991_v13 = vpop.permute.xlu1 %990 }
 0x2a6   :  { %v4835_v50 = vmin.f32 %v4833_v28, %v4655_v40  ;;  %v1226_v60 = vmax.f32 %v4836_v37, 0.0  ;;  %v3746_v19 = vadd.f32 %v1455_v42, %v4754_v43  ;;  %v4839_v57 = vmax.f32 %v4838_v52, 0.0  ;;  %v4843_v52 = vld [vmem:[#allocation104_spill] sm:$0xff] }
 0x2a7   :  { %v1163_v29 = vsub.f32 %v4834_v48, %v1099_v4  ;;  %v4841_v62 = vmax.f32 %v4840_v30, 0.0  ;;  %v1103_v28 = vmax.f32 %v991_v13, %v4666_v61  ;;  %v4846_v30 = vld [vmem:[#allocation46_spill] sm:$0xff] }
 0x2a8   :  { %v1164_v11 = vsub.f32 %v4835_v50, %v1100_v26  ;;  %4837 = vst [vmem:[#allocation18_spill] sm:$0xff] %v3746_v19  ;;  %v3750_v54 = vmul.f32 %v1223_v9, %v4839_v57  ;;  %v1104_v26 = vmax.f32 %v991_v13, %v4667_v20  ;;  %v3759_v50 = vadd.f32 %v1455_v42, %v4755_v59  ;;  %v4850_v42 = vld [vmem:[#allocation48_spill] sm:$0xff] }
 0x2a9   :  { %v3754_v12 = vmul.f32 %v1224_v0, %v4841_v62  ;;  %v1227_v4 = vmax.f32 %v1163_v29, 0.0  ;;  %v4844_v0 = vmax.f32 %v4843_v52, 0.0  ;;  %v4847_v29 = vmax.f32 %v4846_v30, 0.0  ;;  %v4848_v62 = vld [vmem:[#allocation40_spill] sm:$0xff]  ;;  %v999_v30 = vpop.permute.xlu1 %998 }
 0x2aa   :  { %v1228_v48 = vmax.f32 %v1164_v11, 0.0  ;;  %4842 = vst [vmem:[#allocation51_spill] sm:$0xff] %v3759_v50  ;;  %v1543_v37 = vsub.f32 %v3411_v22, %v3750_v54  ;;  %v4849_v19 = vmax.f32 %v4848_v62, 0.0  ;;  %v4851_v50 = vmin.f32 %v4850_v42, %v4651_v35 }
 0x2ab   :  { %v1544_v9 = vsub.f32 %v3432_v5, %v3754_v12  ;;  %v3767_v57 = vmul.f32 %v1225_v53, %v4844_v0  ;;  %v3771_v11 = vmul.f32 %v1227_v4, %v4847_v29  ;;  %v4852_v22 = vmin.f32 %v4850_v42, %v4655_v40  ;;  %v4854_v4 = vld [vmem:[#allocation105_spill] sm:$0xff]  ;;  %v4858_v42 = vld [vmem:[#allocation44_spill] sm:$0xff] }
 0x2ac   :  { %v3775_v13 = vmul.f32 %v1228_v48, %v4849_v19  ;;  %v1167_v15 = vsub.f32 %v4851_v50, %v1103_v28  ;;  %v3784_v52 = vadd.f32 %v1463_v46, %v4754_v43  ;;  %v1607_v53 = vmax.f32 %v1543_v37, 1e-06 }
 0x2ad   :  { %4845 = vst [vmem:[#allocation45_spill] sm:$0xff] %v3767_v57  ;;  %v1168_v5 = vsub.f32 %v4852_v22, %v1104_v26  ;;  %v1608_v0 = vmax.f32 %v1544_v9, 1e-06  ;;  %v4855_v29 = vmax.f32 %v4854_v4, 0.0  ;;  %v1547_v19 = vsub.f32 %v3448_v34, %v3771_v11  ;;  %v4869_v34 = vld [vmem:[#allocation65_spill] sm:$0xff] }
 0x2ae   :  { %4853 = vst [vmem:[#allocation93_spill] sm:$0xff] %v3784_v52  ;;  %v1548_v48 = vsub.f32 %v3452_v41, %v3775_v13  ;;  %v1231_v28 = vmax.f32 %v1167_v15, 0.0  ;;  %v3795_v26 = vadd.f32 %v1463_v46, %v4755_v59  ;;  %2087 = vrcp.f32 %v1607_v53  ;;  %v4861_v41 = vld [vmem:[#allocation49_spill] sm:$0xff]  ;;  %v4863_v46 = vld [vmem:[#allocation50_spill] sm:$0xff] }
 0x2af   :  { %v3788_v57 = vmul.f32 %v1226_v60, %v4855_v29  ;;  %v1232_v50 = vmax.f32 %v1168_v5, 0.0  ;;  %v1107_v37 = vmax.f32 %v999_v30, %v4666_v61  ;;  %v1108_v9 = vmax.f32 %v999_v30, %v4667_v20 }
 0x2b0   :  { %4857 = vst [vmem:[#allocation14_spill] sm:$0xff] %v3795_v26  ;;  %2089 = vrcp.f32 %v1608_v0  ;;  %v1611_v62 = vmax.f32 %v1547_v19, 1e-06  ;;  %v1612_v60 = vmax.f32 %v1548_v48, 1e-06  ;;  %v4859_v22 = vmax.f32 %v4858_v42, 0.0  ;;  %v1007_v19 = vpop.permute.xlu1 %1006 }
 0x2b1   :  { %4856 = vst [vmem:[#allocation94_spill] sm:$0xff] %v3788_v57  ;;  %v4862_v15 = vmax.f32 %v4861_v41, 0.0  ;;  %v4864_v53 = vmin.f32 %v4863_v46, %v4651_v35  ;;  %v4865_v30 = vmin.f32 %v4863_v46, %v4655_v40  ;;  %v1112_v42 = vmax.f32 %v1007_v19, %v4667_v20 }
 0x2b2   :  { %v3801_v4 = vmul.f32 %v1231_v28, %v4859_v22  ;;  %2091 = vrcp.f32 %v1611_v62  ;;  %v1111_v28 = vmax.f32 %v1007_v19, %v4666_v61  ;;  %v2084_v22 = vpop.eup %2083  ;;  %v4870_v26 = vmax.f32 %v4869_v34, 0.0 }
 0x2b3   :  { %v3806_v5 = vmul.f32 %v1232_v50, %v4862_v15  ;;  %v1171_v57 = vsub.f32 %v4864_v53, %v1107_v37  ;;  %v1172_v0 = vsub.f32 %v4865_v30, %v1108_v9  ;;  %2093 = vrcp.f32 %v1612_v60  ;;  %v2086_v15 = vpop.eup %2085  ;;  %v4866_v53 = vld [vmem:[#allocation52_spill] sm:$0xff] }
 0x2b4   :  { %v1551_v48 = vsub.f32 %v3472_v7, %v3801_v4  ;;  %v1666_v46 = vmul.f32 %v2084_v22, %v3672_v2  ;;  %v4867_v62 = vmin.f32 %v4866_v53, %v4651_v35  ;;  %v4868_v7 = vmin.f32 %v4866_v53, %v4655_v40  ;;  %v1015_v2 = vpop.permute.xlu1 %1014 }
 0x2b5   :  { %v1552_v50 = vsub.f32 %v3488_v45, %v3806_v5  ;;  %v1235_v41 = vmax.f32 %v1171_v57, 0.0  ;;  %v1236_v37 = vmax.f32 %v1172_v0, 0.0  ;;  %v1668_v19 = vmul.f32 %v2086_v15, %v3676_v55  ;;  %v4871_v57 = vld [vmem:[#allocation23_spill] sm:$0xff] }
 0x2b6   :  { %v1615_v9 = vmax.f32 %v1551_v48, 1e-06  ;;  %v1175_v30 = vsub.f32 %v4867_v62, %v1111_v28  ;;  %v1176_v29 = vsub.f32 %v4868_v7, %v1112_v42  ;;  %v4872_v0 = vmax.f32 %v4871_v57, 0.0  ;;  %v1471_v48 = vpop.permute.xlu0 %1470  ;;  %1793 = vst [vmem:[#allocation2] sm:$0xff] %v1666_v46  ;;  %v4873_v42 = vld [vmem:[#allocation22_spill] sm:$0xff]  ;;  %v4876_v46 = vld [vmem:[#allocation108_spill] sm:$0xff] }
 0x2b7   :  { %v1616_v60 = vmax.f32 %v1552_v50, 1e-06  ;;  %v3830_v45 = vmul.f32 %v1235_v41, %v4870_v26  ;;  %v1115_v53 = vmax.f32 %v1015_v2, %v4666_v61  ;;  %1794 = vst [vmem:[#allocation2 + $0x8] sm:$0xff] %v1668_v19  ;;  %v1116_v34 = vmax.f32 %v1015_v2, %v4667_v20  ;;  %v4874_v41 = vld [vmem:[#allocation67_spill] sm:$0xff]  ;;  %v4878_v62 = vld [vmem:[#allocation54_spill] sm:$0xff] }
 0x2b8   :  { %v3834_v52 = vmul.f32 %v1236_v37, %v4872_v0  ;;  %2095 = vrcp.f32 %v1615_v9  ;;  %v1239_v28 = vmax.f32 %v1175_v30, 0.0  ;;  %v1240_v22 = vmax.f32 %v1176_v29, 0.0  ;;  %v1023_v0 = vpop.permute.xlu1 %1022 }
 0x2b9   :  { %2097 = vrcp.f32 %v1616_v60  ;;  %v1555_v55 = vsub.f32 %v3514_v33, %v3830_v45  ;;  %v1230_v50 = vmax.f32 %v4873_v42, 0.0  ;;  %v4875_v37 = vmax.f32 %v4874_v41, 0.0 }
 0x2ba   :  { %v1556_v26 = vsub.f32 %v3518_v14, %v3834_v52  ;;  %v4877_v29 = vmax.f32 %v4876_v46, 0.0  ;;  %v4879_v30 = vmin.f32 %v4878_v62, %v4651_v35  ;;  %v3855_v33 = vadd.f32 %v1471_v48, %v4754_v43 }
 0x2bb   :  { %v3845_v15 = vmul.f32 %v1239_v28, %v4875_v37  ;;  %v1619_v14 = vmax.f32 %v1555_v55, 1e-06  ;;  %v4880_v60 = vmin.f32 %v4878_v62, %v4655_v40  ;;  %v1119_v41 = vmax.f32 %v1023_v0, %v4666_v61  ;;  %v2088_v37 = vpop.eup %2087 }
 0x2bc   :  { %v3849_v9 = vmul.f32 %v1240_v22, %v4877_v29  ;;  %v1179_v7 = vsub.f32 %v4879_v30, %v1115_v53  ;;  %v1620_v19 = vmax.f32 %v1556_v26, 1e-06  ;;  %v3866_v53 = vadd.f32 %v1471_v48, %v4755_v59  ;;  %v4883_v48 = vld [vmem:[#allocation56_spill] sm:$0xff] }
 0x2bd   :  { %v1180_v57 = vsub.f32 %v4880_v60, %v1116_v34  ;;  %v1559_v2 = vsub.f32 %v3531_v51, %v3845_v15  ;;  %2099 = vrcp.f32 %v1619_v14  ;;  %v1120_v26 = vmax.f32 %v1023_v0, %v4667_v20  ;;  %v2090_v62 = vpop.eup %2089  ;;  %v1031_v0 = vpop.permute.xlu1 %1030 }
 0x2be   :  { %v1560_v28 = vsub.f32 %v3538_v56, %v3849_v9  ;;  %v1243_v22 = vmax.f32 %v1179_v7, 0.0  ;;  %2101 = vrcp.f32 %v1620_v19  ;;  %v4881_v29 = vmax.f32 %v3361_v36, 0.0 }
 0x2bf   :  { %v1244_v55 = vmax.f32 %v1180_v57, 0.0  ;;  %v1623_v34 = vmax.f32 %v1559_v2, 1e-06  ;;  %v1678_v56 = vmul.f32 %v2088_v37, %v3750_v54  ;;  %v4882_v30 = vmax.f32 %v3378_v3, 0.0  ;;  %v2092_v3 = vpop.eup %2091 }
 0x2c0   :  { %v1624_v46 = vmax.f32 %v1560_v28, 1e-06  ;;  %v3871_v51 = vmul.f32 %v1243_v22, %v4881_v29  ;;  %v4884_v14 = vmin.f32 %v4883_v48, %v4651_v35  ;;  %v4885_v19 = vmin.f32 %v4883_v48, %v4655_v40 }
 0x2c1   :  { %v3876_v7 = vmul.f32 %v1244_v55, %v4882_v30  ;;  %v1680_v36 = vmul.f32 %v2090_v62, %v3754_v12  ;;  %2103 = vrcp.f32 %v1623_v34  ;;  %v1123_v54 = vmax.f32 %v1031_v0, %v4666_v61  ;;  %1799 = vst [vmem:[#allocation2 + $0x30] sm:$0xff] %v1678_v56  ;;  %v2094_v55 = vpop.eup %2093  ;;  %v4886_v34 = vld [vmem:[#allocation58_spill] sm:$0xff] }
 0x2c2   :  { %v1183_v60 = vsub.f32 %v4884_v14, %v1119_v41  ;;  %v1184_v57 = vsub.f32 %v4885_v19, %v1120_v26  ;;  %v1563_v2 = vsub.f32 %v3566_v63, %v3871_v51  ;;  %2105 = vrcp.f32 %v1624_v46  ;;  %v1039_v14 = vpop.permute.xlu1 %1038 }
 0x2c3   :  { %v1564_v28 = vsub.f32 %v3570_v44, %v3876_v7  ;;  %1800 = vst [vmem:[#allocation2 + $0x38] sm:$0xff] %v1680_v36  ;;  %v1686_v26 = vmul.f32 %v2092_v3, %v3771_v11  ;;  %v1124_v12 = vmax.f32 %v1031_v0, %v4667_v20  ;;  %v4887_v63 = vmin.f32 %v4886_v34, %v4651_v35 }
 0x2c4   :  { %v1247_v22 = vmax.f32 %v1183_v60, 0.0  ;;  %v1248_v41 = vmax.f32 %v1184_v57, 0.0  ;;  %v1627_v37 = vmax.f32 %v1563_v2, 1e-06  ;;  %v1688_v62 = vmul.f32 %v2094_v55, %v3775_v13 }
 0x2c5   :  { %v1187_v29 = vsub.f32 %v4887_v63, %v1123_v54  ;;  %v1628_v56 = vmax.f32 %v1564_v28, 1e-06  ;;  %v4888_v46 = vmax.f32 %v3396_v38, 0.0  ;;  %v4889_v44 = vmax.f32 %v3401_v10, 0.0  ;;  %1803 = vst [vmem:[#allocation2 + $0x50] sm:$0xff] %v1686_v26  ;;  %v2096_v13 = vpop.eup %2095 }
 0x2c6   :  { %2107 = vrcp.f32 %v1627_v37  ;;  %v4890_v11 = vmin.f32 %v4886_v34, %v4655_v40  ;;  %v1127_v57 = vmax.f32 %v1039_v14, %v4666_v61  ;;  %1804 = vst [vmem:[#allocation2 + $0x58] sm:$0xff] %v1688_v62  ;;  %v1128_v0 = vmax.f32 %v1039_v14, %v4667_v20  ;;  %v2098_v36 = vpop.eup %2097  ;;  %v1047_v34 = vpop.permute.xlu1 %1046 }
 0x2c7   :  { %v3898_v30 = vmul.f32 %v1247_v22, %v4888_v46  ;;  %v3902_v48 = vmul.f32 %v1248_v41, %v4889_v44  ;;  %v1251_v19 = vmax.f32 %v1187_v29, 0.0  ;;  %2109 = vrcp.f32 %v1628_v56  ;;  %v4892_v22 = vld [vmem:[#allocation60_spill] sm:$0xff]  ;;  %v4897_v46 = vld [vmem:[#allocation106_spill] sm:$0xff] }
 0x2c8   :  { %v1188_v60 = vsub.f32 %v4890_v11, %v1124_v12  ;;  %v1694_v2 = vmul.f32 %v2096_v13, %v3801_v4  ;;  %v4891_v3 = vmax.f32 %v3420_v1, 0.0  ;;  %v4893_v41 = vmin.f32 %v4892_v22, %v4651_v35  ;;  %v4895_v4 = vld [vmem:[#allocation83_spill] sm:$0xff] }
 0x2c9   :  { %v1567_v38 = vsub.f32 %v3607_v18, %v3898_v30  ;;  %v1568_v10 = vsub.f32 %v3611_v6, %v3902_v48  ;;  %v1696_v26 = vmul.f32 %v2098_v36, %v3806_v5  ;;  %v4894_v6 = vmin.f32 %v4892_v22, %v4655_v40 }
 0x2ca   :  { %v1252_v54 = vmax.f32 %v1188_v60, 0.0  ;;  %v3916_v28 = vmul.f32 %v1251_v19, %v4891_v3  ;;  %v1191_v55 = vsub.f32 %v4893_v41, %v1127_v57  ;;  %1807 = vst [vmem:[#allocation2 + $0x70] sm:$0xff] %v1694_v2  ;;  %v4896_v63 = vmax.f32 %v4895_v4, 0.0  ;;  %v2100_v11 = vpop.eup %2099  ;;  %v4898_v57 = vld [vmem:[#allocation29_spill] sm:$0xff] }
 0x2cb   :  { %v1631_v18 = vmax.f32 %v1567_v38, 1e-06  ;;  %v1632_v37 = vmax.f32 %v1568_v10, 1e-06  ;;  %v1192_v12 = vsub.f32 %v4894_v6, %v1128_v0  ;;  %v1131_v56 = vmax.f32 %v1047_v34, %v4666_v61  ;;  %1808 = vst [vmem:[#allocation2 + $0x78] sm:$0xff] %v1696_v26  ;;  %v4900_v0 = vld [vmem:[#allocation86_spill] sm:$0xff] }
 0x2cc   :  { %v3927_v29 = vmul.f32 %v1252_v54, %v4896_v63  ;;  %v1571_v1 = vsub.f32 %v3658_v17, %v3916_v28  ;;  %v1255_v62 = vmax.f32 %v1191_v55, 0.0  ;;  %v1233_v5 = vmax.f32 %v4897_v46, 0.0  ;;  %v2102_v17 = vpop.eup %2101  ;;  %v4902_v54 = vld [vmem:[#allocation61_spill] sm:$0xff]  ;;  %v1055_v55 = vpop.permute.xlu1 %1054 }
 0x2cd   :  { %2111 = vrcp.f32 %v1631_v18  ;;  %v1256_v44 = vmax.f32 %v1192_v12, 0.0  ;;  %v1132_v14 = vmax.f32 %v1047_v34, %v4667_v20  ;;  %v4899_v13 = vmax.f32 %v4898_v57, 0.0 }
 0x2ce   :  { %2113 = vrcp.f32 %v1632_v37  ;;  %v1572_v60 = vsub.f32 %v3662_v32, %v3927_v29  ;;  %v1635_v19 = vmax.f32 %v1571_v1, 1e-06  ;;  %v1702_v10 = vmul.f32 %v2100_v11, %v3830_v45  ;;  %v2104_v37 = vpop.eup %2103 }
 0x2cf   :  { %v3938_v38 = vmul.f32 %v1255_v62, %v4899_v13  ;;  %v4901_v36 = vmax.f32 %v4900_v0, 0.0  ;;  %v4903_v3 = vmin.f32 %v4902_v54, %v4651_v35  ;;  %v4904_v41 = vmin.f32 %v4902_v54, %v4655_v40  ;;  %v2106_v63 = vpop.eup %2105  ;;  %v4909_v13 = vld [vmem:[#allocation62_spill] sm:$0xff] }
 0x2d0   :  { %v1704_v26 = vmul.f32 %v2102_v17, %v3834_v52  ;;  %v1636_v18 = vmax.f32 %v1572_v60, 1e-06  ;;  %2115 = vrcp.f32 %v1635_v19  ;;  %1811 = vst [vmem:[#allocation2 + $0x90] sm:$0xff] %v1702_v10  ;;  %v1135_v4 = vmax.f32 %v1055_v55, %v4666_v61  ;;  %v1063_v57 = vpop.permute.xlu1 %1062 }
 0x2d1   :  { %v3943_v2 = vmul.f32 %v1256_v44, %v4901_v36  ;;  %v1195_v22 = vsub.f32 %v4903_v3, %v1131_v56  ;;  %v1196_v32 = vsub.f32 %v4904_v41, %v1132_v14  ;;  %v1575_v45 = vsub.f32 %v3685_v23, %v3938_v38  ;;  %v4905_v44 = vld [vmem:[#allocation20_spill] sm:$0xff] }
 0x2d2   :  { %1812 = vst [vmem:[#allocation2 + $0x98] sm:$0xff] %v1704_v26  ;;  %v1710_v1 = vmul.f32 %v2104_v37, %v3845_v15  ;;  %2117 = vrcp.f32 %v1636_v18  ;;  %v1136_v62 = vmax.f32 %v1055_v55, %v4667_v20  ;;  %v1712_v56 = vmul.f32 %v2106_v63, %v3849_v9  ;;  %v4912_v18 = vld [vmem:[#allocation64_spill] sm:$0xff]  ;;  %v4915_v63 = vld [vmem:[#allocation30_spill] sm:$0xff] }
 0x2d3   :  { %v1576_v6 = vsub.f32 %v3689_v24, %v3943_v2  ;;  %v1259_v12 = vmax.f32 %v1195_v22, 0.0  ;;  %v1260_v34 = vmax.f32 %v1196_v32, 0.0  ;;  %v1639_v52 = vmax.f32 %v1575_v45, 1e-06  ;;  %v4907_v24 = vld [vmem:[#allocation21_spill] sm:$0xff]  ;;  %v2108_v36 = vpop.eup %2107 }
 0x2d4   :  { %v4906_v14 = vmax.f32 %v4905_v44, 0.0  ;;  %v4908_v60 = vmax.f32 %v4907_v24, 0.0  ;;  %1815 = vst [vmem:[#allocation2 + $0xb0] sm:$0xff] %v1710_v1  ;;  %v4910_v15 = vmin.f32 %v4909_v13, %v4651_v35  ;;  %v4911_v10 = vmin.f32 %v4909_v13, %v4655_v40  ;;  %1816 = vst [vmem:[#allocation2 + $0xb8] sm:$0xff] %v1712_v56  ;;  %v2110_v41 = vpop.eup %2109 }
 0x2d5   :  { %v1640_v23 = vmax.f32 %v1576_v6, 1e-06  ;;  %2119 = vrcp.f32 %v1639_v52  ;;  %v1139_v0 = vmax.f32 %v1063_v57, %v4666_v61  ;;  %v1140_v22 = vmax.f32 %v1063_v57, %v4667_v20 }
 0x2d6   :  { %v3962_v11 = vmul.f32 %v1259_v12, %v4906_v14  ;;  %v3966_v19 = vmul.f32 %v1260_v34, %v4908_v60  ;;  %v1199_v17 = vsub.f32 %v4910_v15, %v1135_v4  ;;  %v1200_v9 = vsub.f32 %v4911_v10, %v1136_v62 }
 0x2d7   :  { %2121 = vrcp.f32 %v1640_v23  ;;  %v1718_v32 = vmul.f32 %v2108_v36, %v3871_v51  ;;  %v4913_v45 = vmin.f32 %v4912_v18, %v4651_v35  ;;  %v1720_v6 = vmul.f32 %v2110_v41, %v3876_v7  ;;  %v4917_v51 = vld [vmem:[#allocation31_spill] sm:$0xff] }
 0x2d8   :  { %v1579_v54 = vsub.f32 %v3701_v16, %v3962_v11  ;;  %v1580_v3 = vsub.f32 %v3707_v27, %v3966_v19  ;;  %v1263_v55 = vmax.f32 %v1199_v17, 0.0  ;;  %v1264_v26 = vmax.f32 %v1200_v9, 0.0  ;;  %v1071_v27 = vpop.permute.xlu1 %1070 }
 0x2d9   :  { %v1203_v37 = vsub.f32 %v4913_v45, %v1139_v0  ;;  %v4914_v16 = vmin.f32 %v4912_v18, %v4655_v40  ;;  %1819 = vst [vmem:[#allocation2 + $0xd0] sm:$0xff] %v1718_v32  ;;  %v4916_v1 = vmax.f32 %v4915_v63, 0.0  ;;  %v4918_v62 = vmax.f32 %v4917_v51, 0.0  ;;  %1820 = vst [vmem:[#allocation2 + $0xd8] sm:$0xff] %v1720_v6 }
 0x2da   :  { %v1643_v12 = vmax.f32 %v1579_v54, 1e-06  ;;  %v1644_v34 = vmax.f32 %v1580_v3, 1e-06  ;;  %v1143_v44 = vmax.f32 %v1071_v27, %v4666_v61  ;;  %v1221_v7 = vmax.f32 %v3678_v25, 0.0  ;;  %v2112_v60 = vpop.eup %2111  ;;  %v4921_v54 = vld [vmem:[#allocation66_spill] sm:$0xff] }
 0x2db   :  { %v1204_v4 = vsub.f32 %v4914_v16, %v1140_v22  ;;  %v3990_v52 = vmul.f32 %v1263_v55, %v4916_v1  ;;  %v3994_v56 = vmul.f32 %v1264_v26, %v4918_v62  ;;  %v1267_v23 = vmax.f32 %v1203_v37, 0.0  ;;  %v2114_v10 = vpop.eup %2113 }
 0x2dc   :  { %2123 = vrcp.f32 %v1643_v12  ;;  %v1144_v24 = vmax.f32 %v1071_v27, %v4667_v20  ;;  %v4919_v15 = vmax.f32 %v3550_v58, 0.0  ;;  %v1726_v9 = vmul.f32 %v2112_v60, %v3898_v30  ;;  %v4925_v27 = vld [vmem:[#allocation34_spill] sm:$0xff] }
 0x2dd   :  { %v1268_v14 = vmax.f32 %v1204_v4, 0.0  ;;  %2125 = vrcp.f32 %v1644_v34  ;;  %v1583_v57 = vsub.f32 %v3710_v47, %v3990_v52  ;;  %v1584_v13 = vsub.f32 %v3713_v31, %v3994_v56  ;;  %v1079_v31 = vpop.permute.xlu1 %1078  ;;  %v2116_v26 = vpop.eup %2115 }
 0x2de   :  { %v4005_v17 = vmul.f32 %v1267_v23, %v4919_v15  ;;  %v4920_v0 = vmax.f32 %v3555_v39, 0.0  ;;  %v4922_v3 = vmin.f32 %v4921_v54, %v4651_v35  ;;  %v4923_v47 = vmin.f32 %v4921_v54, %v4655_v40  ;;  %1823 = vst [vmem:[#allocation2 + $0xf0] sm:$0xff] %v1726_v9 }
 0x2df   :  { %v1728_v58 = vmul.f32 %v2114_v10, %v3902_v48  ;;  %v1647_v32 = vmax.f32 %v1583_v57, 1e-06  ;;  %v1648_v55 = vmax.f32 %v1584_v13, 1e-06  ;;  %v1147_v37 = vmax.f32 %v1079_v31, %v4666_v61  ;;  %v2118_v34 = vpop.eup %2117  ;;  %v4931_v57 = vld [vmem:[#allocation51_spill] sm:$0xff] }
 0x2e0   :  { %v4010_v36 = vmul.f32 %v1268_v14, %v4920_v0  ;;  %v1207_v22 = vsub.f32 %v4922_v3, %v1143_v44  ;;  %v1208_v41 = vsub.f32 %v4923_v47, %v1144_v24  ;;  %v1587_v30 = vsub.f32 %v3733_v8, %v4005_v17  ;;  %v4930_v24 = vld [vmem:[#allocation18_spill] sm:$0xff] }
 0x2e1   :  { %1824 = vst [vmem:[#allocation2 + $0xf8] sm:$0xff] %v1728_v58  ;;  %v1734_v6 = vmul.f32 %v2116_v26, %v3916_v28  ;;  %2127 = vrcp.f32 %v1647_v32  ;;  %v1148_v48 = vmax.f32 %v1079_v31, %v4667_v20  ;;  %v4924_v8 = vmax.f32 %v3594_v21, 0.0  ;;  %v1087_v1 = vpop.permute.xlu1 %1086  ;;  %v4927_v28 = vld [vmem:[#allocation68_spill] sm:$0xff] }
 0x2e2   :  { %v1588_v39 = vsub.f32 %v3736_v49, %v4010_v36  ;;  %v1271_v18 = vmax.f32 %v1207_v22, 0.0  ;;  %v1272_v45 = vmax.f32 %v1208_v41, 0.0  ;;  %v1651_v12 = vmax.f32 %v1587_v30, 1e-06  ;;  %v2120_v21 = vpop.eup %2119  ;;  %v4932_v41 = vld [vmem:[#allocation69_spill] sm:$0xff]  ;;  %v4934_v32 = vld [vmem:[#allocation36_spill] sm:$0xff] }
 0x2e3   :  { %2129 = vrcp.f32 %v1648_v55  ;;  %v4926_v49 = vmax.f32 %v4925_v27, 0.0  ;;  %v1736_v51 = vmul.f32 %v2118_v34, %v3927_v29  ;;  %1827 = vst [vmem:[#allocation2 + $0x110] sm:$0xff] %v1734_v6  ;;  %v4928_v62 = vmin.f32 %v4927_v28, %v4651_v35 }
 0x2e4   :  { %v1652_v16 = vmax.f32 %v1588_v39, 1e-06  ;;  %v4028_v4 = vmul.f32 %v1271_v18, %v4924_v8  ;;  %2131 = vrcp.f32 %v1651_v12  ;;  %v4929_v44 = vmin.f32 %v4927_v28, %v4655_v40  ;;  %v2122_v15 = vpop.eup %2121 }
 0x2e5   :  { %v4032_v63 = vmul.f32 %v1272_v45, %v4926_v49  ;;  %v1211_v23 = vsub.f32 %v4928_v62, %v1147_v37  ;;  %v1151_v29 = vmax.f32 %v1087_v1, %v4666_v61  ;;  %1828 = vst [vmem:[#allocation2 + $0x118] sm:$0xff] %v1736_v51  ;;  %v1742_v10 = vmul.f32 %v2120_v21, %v3938_v38  ;;  %v4935_v61 = vld [vmem:[#allocation110_spill] sm:$0xff]  ;;  %v4937_v38 = vld [vmem:[#allocation112_spill] sm:$0xff]  ;;  %v1351_v45 = vpop.permute.xlu1 %1350  ;;  %v4944_v62 = vld [vmem:[#allocation91_spill] sm:$0xff] }
 0x2e6   :  { %v1212_v14 = vsub.f32 %v4929_v44, %v1148_v48  ;;  %2133 = vrcp.f32 %v1652_v16  ;;  %v1591_v60 = vsub.f32 %v4930_v24, %v4028_v4  ;;  %v1152_v54 = vmax.f32 %v1087_v1, %v4667_v20  ;;  %v4940_v48 = vld [vmem:[#allocation93_spill] sm:$0xff]  ;;  %v4941_v16 = vld [vmem:[#allocation14_spill] sm:$0xff]  ;;  %v4945_v44 = vld [vmem:[#allocation92_spill] sm:$0xff] }
 0x2e7   :  { %v1592_v13 = vsub.f32 %v4931_v57, %v4032_v63  ;;  %v1275_v9 = vmax.f32 %v1211_v23, 0.0  ;;  %v1744_v3 = vmul.f32 %v2122_v15, %v3943_v2  ;;  %v4933_v31 = vmin.f32 %v4932_v41, %v4651_v35  ;;  %1831 = vst [vmem:[#allocation2 + $0x130] sm:$0xff] %v1742_v10  ;;  %v4942_v1 = vld [vmem:[#allocation113_spill] sm:$0xff] }
 0x2e8   :  { %v1276_v0 = vmax.f32 %v1212_v14, 0.0  ;;  %v1655_v22 = vmax.f32 %v1591_v60, 1e-06  ;;  %v1222_v55 = vmax.f32 %v4934_v32, 0.0  ;;  %v4936_v30 = vmax.f32 %v4935_v61, 0.0  ;;  %v4946_v57 = vld [vmem:[#allocation53_spill] sm:$0xff] }
 0x2e9   :  { %v1656_v47 = vmax.f32 %v1592_v13, 1e-06  ;;  %v1215_v58 = vsub.f32 %v4933_v31, %v1151_v29  ;;  %v4938_v39 = vmax.f32 %v4937_v38, 0.0  ;;  %v4939_v20 = vmin.f32 %v4932_v41, %v4655_v40  ;;  %1832 = vst [vmem:[#allocation2 + $0x138] sm:$0xff] %v1744_v3  ;;  %v2124_v12 = vpop.eup %2123  ;;  %v1355_v15 = vpop.permute.xlu1 %1354 }
 0x2ea   :  { %v4055_v26 = vmul.f32 %v1275_v9, %v4936_v30  ;;  %2135 = vrcp.f32 %v1655_v22  ;;  %v1475_v37 = vadd.f32 %v1351_v45, %v4754_v43  ;;  %v1476_v6 = vadd.f32 %v1351_v45, %v4755_v59  ;;  %v2126_v49 = vpop.eup %2125  ;;  %v4948_v9 = vld [vmem:[#allocation99_spill] sm:$0xff]  ;;  %v4950_v22 = vld [vmem:[#allocation100_spill] sm:$0xff] }
 0x2eb   :  { %v4059_v18 = vmul.f32 %v1276_v0, %v4938_v39  ;;  %v1216_v2 = vsub.f32 %v4939_v20, %v1152_v54  ;;  %v1279_v35 = vmax.f32 %v1215_v58, 0.0  ;;  %2137 = vrcp.f32 %v1656_v47 }
 0x2ec   :  { %v1595_v34 = vsub.f32 %v4940_v48, %v4055_v26  ;;  %v1750_v40 = vmul.f32 %v2124_v12, %v3962_v11  ;;  %v4943_v51 = vmax.f32 %v4942_v1, 0.0  ;;  %v1539_v23 = vsub.f32 %v1475_v37, %v4944_v62  ;;  %v4952_v12 = vld [vmem:[#allocation45_spill] sm:$0xff] }
 0x2ed   :  { %v1596_v8 = vsub.f32 %v4941_v16, %v4059_v18  ;;  %v1280_v27 = vmax.f32 %v1216_v2, 0.0  ;;  %v1540_v14 = vsub.f32 %v1476_v6, %v4945_v44  ;;  %v1752_v21 = vmul.f32 %v2126_v49, %v3966_v19  ;;  %v4955_v16 = vld [vmem:[#allocation57_spill] sm:$0xff]  ;;  %v4957_v49 = vld [vmem:[#allocation107_spill] sm:$0xff] }
 0x2ee   :  { %v4073_v28 = vmul.f32 %v1279_v35, %v4943_v51  ;;  %v1659_v24 = vmax.f32 %v1595_v34, 1e-06  ;;  %v4947_v13 = vmax.f32 %v4946_v57, 0.0  ;;  %1835 = vst [vmem:[#allocation2 + $0x150] sm:$0xff] %v1750_v40  ;;  %v1603_v10 = vmax.f32 %v1539_v23, 1e-06  ;;  %v2128_v31 = vpop.eup %2127 }
 0x2ef   :  { %v1660_v60 = vmax.f32 %v1596_v8, 1e-06  ;;  %v4949_v0 = vmax.f32 %v4948_v9, 0.0  ;;  %v1477_v19 = vadd.f32 %v1355_v15, %v4754_v43  ;;  %1836 = vst [vmem:[#allocation2 + $0x158] sm:$0xff] %v1752_v21  ;;  %v4951_v47 = vmax.f32 %v4950_v22, 0.0  ;;  %v4953_v34 = vld [vmem:[#allocation15_spill] sm:$0xff] }
 0x2f0   :  { %v4080_v29 = vmul.f32 %v1280_v27, %v4947_v13  ;;  %v1599_v11 = vsub.f32 %v3855_v33, %v4073_v28  ;;  %2139 = vrcp.f32 %v1659_v24  ;;  %v1478_v33 = vadd.f32 %v1355_v15, %v4755_v59  ;;  %v4959_v23 = vld [vmem:[#allocation43_spill] sm:$0xff]  ;;  %v4961_v13 = vld [vmem:[#allocation81_spill] sm:$0xff]  ;;  %v4965_v9 = vld [vmem:[#allocation12_spill] sm:$0xff] }
 0x2f1   :  { %v4088_v54 = vmul.f32 %v1221_v7, %v4949_v0  ;;  %v4095_v41 = vmul.f32 %v1222_v55, %v4951_v47  ;;  %2141 = vrcp.f32 %v1660_v60  ;;  %v1604_v32 = vmax.f32 %v1540_v14, 1e-06  ;;  %v2130_v7 = vpop.eup %2129  ;;  %v4962_v15 = vld [vmem:[#allocation11_spill] sm:$0xff] }
 0x2f2   :  { %v1600_v3 = vsub.f32 %v3866_v53, %v4080_v29  ;;  %v1663_v58 = vmax.f32 %v1599_v11, 1e-06  ;;  %v1758_v61 = vmul.f32 %v2128_v31, %v3990_v52  ;;  %2143 = vrcp.f32 %v1603_v10  ;;  %v1363_v53 = vpop.permute.xlu1 %1362  ;;  %v2132_v39 = vpop.eup %2131  ;;  %v4964_v10 = vld [vmem:[#allocation73_spill] sm:$0xff]  ;;  %v4971_v31 = vld [vmem:[#allocation59_spill] sm:$0xff] }
 0x2f3   :  { %v1541_v25 = vsub.f32 %v1477_v19, %v4088_v54  ;;  %v1542_v38 = vsub.f32 %v1478_v33, %v4095_v41  ;;  %v1760_v55 = vmul.f32 %v2130_v7, %v3994_v56  ;;  %v1481_v2 = vadd.f32 %v1363_v53, %v4754_v43  ;;  %v2134_v45 = vpop.eup %2133 }
 0x2f4   :  { %v1664_v30 = vmax.f32 %v1600_v3, 1e-06  ;;  %2145 = vrcp.f32 %v1663_v58  ;;  %1839 = vst [vmem:[#allocation2 + $0x170] sm:$0xff] %v1758_v61  ;;  %v1766_v35 = vmul.f32 %v2132_v39, %v4005_v17  ;;  %v1482_v52 = vadd.f32 %v1363_v53, %v4755_v59  ;;  %v4958_v17 = vld [vmem:[#allocation94_spill] sm:$0xff]  ;;  %v4967_v3 = vld [vmem:[#allocation13_spill] sm:$0xff] }
 0x2f5   :  { %v1605_v20 = vmax.f32 %v1541_v25, 1e-06  ;;  %v1606_v37 = vmax.f32 %v1542_v38, 1e-06  ;;  %1840 = vst [vmem:[#allocation2 + $0x178] sm:$0xff] %v1760_v55  ;;  %v1768_v6 = vmul.f32 %v2134_v45, %v4010_v36  ;;  %v1545_v48 = vsub.f32 %v1481_v2, %v4952_v12  ;;  %v4973_v38 = vld [vmem:[#allocation74_spill] sm:$0xff] }
 0x2f6   :  { %2147 = vrcp.f32 %v1664_v30  ;;  %v4954_v56 = vmax.f32 %v4953_v34, 0.0  ;;  %v4956_v8 = vmax.f32 %v4955_v16, 0.0  ;;  %v1234_v40 = vmax.f32 %v4957_v49, 0.0  ;;  %1843 = vst [vmem:[#allocation2 + $0x190] sm:$0xff] %v1766_v35  ;;  %v1371_v51 = vpop.permute.xlu1 %1370 }
 0x2f7   :  { %2149 = vrcp.f32 %v1604_v32  ;;  %v1546_v1 = vsub.f32 %v1482_v52, %v4958_v17  ;;  %v4960_v14 = vmax.f32 %v4959_v23, 0.0  ;;  %1844 = vst [vmem:[#allocation2 + $0x198] sm:$0xff] %v1768_v6  ;;  %v1609_v21 = vmax.f32 %v1545_v48, 1e-06  ;;  %v2136_v57 = vpop.eup %2135  ;;  %v4977_v48 = vld [vmem:[#allocation109_spill] sm:$0xff] }
 0x2f8   :  { %v4111_v27 = vmul.f32 %v4956_v8, %v4954_v56  ;;  %2151 = vrcp.f32 %v1605_v20  ;;  %v1485_v24 = vadd.f32 %v1371_v51, %v4754_v43  ;;  %v1486_v60 = vadd.f32 %v1371_v51, %v4755_v59  ;;  %v2138_v25 = vpop.eup %2137  ;;  %v4974_v20 = vld [vmem:[#allocation55_spill] sm:$0xff]  ;;  %v4978_v56 = vld [vmem:[#allocation24_spill] sm:$0xff]  ;;  %v4979_v8 = vld [vmem:[#allocation70_spill] sm:$0xff] }
 0x2f9   :  { %v4119_v36 = vmul.f32 %v1230_v50, %v4960_v14  ;;  %2153 = vrcp.f32 %v1606_v37  ;;  %v4963_v11 = vmax.f32 %v4961_v13, %v4962_v15  ;;  %v4966_v0 = vmin.f32 %v4964_v10, %v4965_v9  ;;  %v4969_v50 = vld [vmem:[#allocation17_spill] sm:$0xff]  ;;  %v4976_v37 = vld [vmem:[#allocation87_spill] sm:$0xff] }
 0x2fa   :  { %v4968_v42 = vmax.f32 %v4961_v13, %v4967_v3  ;;  %v4970_v22 = vmin.f32 %v4964_v10, %v4969_v50  ;;  %v1610_v33 = vmax.f32 %v1546_v1, 1e-06  ;;  %v4972_v58 = vmax.f32 %v4971_v31, 0.0  ;;  %v1379_v55 = vpop.permute.xlu1 %1378 }
 0x2fb   :  { %v665_v19 = vsub.f32 %v4966_v0, %v4963_v11  ;;  %v1774_v7 = vmul.f32 %v2136_v57, %v4028_v4  ;;  %2155 = vrcp.f32 %v1609_v21  ;;  %v1549_v61 = vsub.f32 %v1485_v24, %v4111_v27  ;;  %v4980_v24 = vld [vmem:[#allocation27_spill] sm:$0xff] }
 0x2fc   :  { %v666_v47 = vsub.f32 %v4970_v22, %v4968_v42  ;;  %v4139_v32 = vmul.f32 %v1233_v5, %v4972_v58  ;;  %v1550_v30 = vsub.f32 %v1486_v60, %v4119_v36  ;;  %v1237_v53 = vmax.f32 %v4973_v38, 0.0 }
 0x2fd   :  { %v1776_v39 = vmul.f32 %v2138_v25, %v4032_v63  ;;  %2157 = vrcp.f32 %v1610_v33  ;;  %v4975_v2 = vmax.f32 %v4974_v20, 0.0  ;;  %1847 = vst [vmem:[#allocation2 + $0x1b0] sm:$0xff] %v1774_v7  ;;  %v1613_v46 = vmax.f32 %v1549_v61, 1e-06  ;;  %v2140_v16 = vpop.eup %2139  ;;  %v4982_v61 = vld [vmem:[#allocation25_spill] sm:$0xff] }
 0x2fe   :  { %v1614_v5 = vmax.f32 %v1550_v30, 1e-06  ;;  %v1489_v4 = vadd.f32 %v1379_v55, %v4754_v43  ;;  %v1490_v35 = vadd.f32 %v1379_v55, %v4755_v59  ;;  %v726_v52 = vmax.f32 %v4976_v37, 0.0  ;;  %v2142_v51 = vpop.eup %2141  ;;  %v1387_v21 = vpop.permute.xlu1 %1386 }
 0x2ff   :  { %v4148_v45 = vmul.f32 %v1234_v40, %v4975_v2  ;;  %v729_v6 = vmax.f32 %v665_v19, 0.0  ;;  %v1238_v34 = vmax.f32 %v4977_v48, 0.0  ;;  %v1241_v63 = vmax.f32 %v4978_v56, 0.0  ;;  %1848 = vst [vmem:[#allocation2 + $0x1b8] sm:$0xff] %v1776_v39  ;;  %v2144_v13 = vpop.eup %2143  ;;  %v4985_v56 = vld [vmem:[#allocation26_spill] sm:$0xff] }
 0x300   :  { %v1242_v49 = vmax.f32 %v4979_v8, 0.0  ;;  %2159 = vrcp.f32 %v1613_v46  ;;  %v1553_v40 = vsub.f32 %v1489_v4, %v4139_v32  ;;  %v730_v23 = vmax.f32 %v666_v47, 0.0 }
 0x301   :  { %v1554_v1 = vsub.f32 %v1490_v35, %v4148_v45  ;;  %v1782_v14 = vmul.f32 %v2140_v16, %v4055_v26  ;;  %2161 = vrcp.f32 %v1614_v5  ;;  %v4981_v60 = vmax.f32 %v4980_v24, 0.0  ;;  %v2146_v42 = vpop.eup %2145  ;;  %v4983_v5 = vld [vmem:[#allocation75_spill] sm:$0xff]  ;;  %v4986_v16 = vld [vmem:[#allocation76_spill] sm:$0xff] }
 0x302   :  { %v1784_v11 = vmul.f32 %v2142_v51, %v4059_v18  ;;  %v1617_v10 = vmax.f32 %v1553_v40, 1e-06  ;;  %v1493_v19 = vadd.f32 %v1387_v21, %v4754_v43  ;;  %v1670_v22 = vmul.f32 %v2144_v13, %v4944_v62  ;;  %v4984_v35 = vld [vmem:[#allocation79_spill] sm:$0xff]  ;;  %v4987_v40 = vld [vmem:[#allocation72_spill] sm:$0xff] }
 0x303   :  { %v4161_v57 = vmul.f32 %v1237_v53, %v4981_v60  ;;  %v1618_v0 = vmax.f32 %v1554_v1, 1e-06  ;;  %1851 = vst [vmem:[#allocation2 + $0x1d0] sm:$0xff] %v1782_v14  ;;  %v4166_v47 = vmul.f32 %v1238_v34, %v726_v52  ;;  %v1494_v26 = vadd.f32 %v1387_v21, %v4755_v59  ;;  %v2148_v31 = vpop.eup %2147  ;;  %v1395_v53 = vpop.permute.xlu1 %1394  ;;  %v4989_v24 = vld [vmem:[#allocation63_spill] sm:$0xff] }
 0x304   :  { %v4169_v33 = vmul.f32 %v1241_v63, %v729_v6  ;;  %1852 = vst [vmem:[#allocation2 + $0x1d8] sm:$0xff] %v1784_v11  ;;  %v1790_v58 = vmul.f32 %v2146_v42, %v4073_v28  ;;  %2163 = vrcp.f32 %v1617_v10  ;;  %v4173_v25 = vmul.f32 %v1242_v49, %v730_v23  ;;  %v2150_v7 = vpop.eup %2149  ;;  %1795 = vst [vmem:[#allocation2 + $0x10] sm:$0xff] %v1670_v22 }
 0x305   :  { %v1557_v18 = vsub.f32 %v1493_v19, %v4161_v57  ;;  %v1245_v30 = vmax.f32 %v4982_v61, 0.0  ;;  %v1792_v62 = vmul.f32 %v2148_v31, %v4080_v29  ;;  %2165 = vrcp.f32 %v1618_v0  ;;  %v2152_v39 = vpop.eup %2151  ;;  %v4990_v19 = vld [vmem:[#allocation95_spill] sm:$0xff]  ;;  %v4992_v31 = vld [vmem:[#allocation82_spill] sm:$0xff] }
 0x306   :  { %v1558_v38 = vsub.f32 %v1494_v26, %v4166_v47  ;;  %1855 = vst [vmem:[#allocation2 + $0x1f0] sm:$0xff] %v1790_v58  ;;  %v1672_v55 = vmul.f32 %v2150_v7, %v4945_v44  ;;  %v1497_v20 = vadd.f32 %v1395_v53, %v4754_v43  ;;  %v1498_v2 = vadd.f32 %v1395_v53, %v4755_v59  ;;  %v2154_v46 = vpop.eup %2153  ;;  %v4993_v7 = vld [vmem:[#allocation96_spill] sm:$0xff] }
 0x307   :  { %v1621_v28 = vmax.f32 %v1557_v18, 1e-06  ;;  %v1246_v4 = vmax.f32 %v4983_v5, 0.0  ;;  %v1249_v37 = vmax.f32 %v4984_v35, 0.0  ;;  %1856 = vst [vmem:[#allocation2 + $0x1f8] sm:$0xff] %v1792_v62  ;;  %v1674_v29 = vmul.f32 %v2152_v39, %v4088_v54  ;;  %v1403_v49 = vpop.permute.xlu1 %1402 }
 0x308   :  { %v1622_v52 = vmax.f32 %v1558_v38, 1e-06  ;;  %1796 = vst [vmem:[#allocation2 + $0x18] sm:$0xff] %v1672_v55  ;;  %v1676_v6 = vmul.f32 %v2154_v46, %v4095_v41  ;;  %v1561_v44 = vsub.f32 %v1497_v20, %v4169_v33  ;;  %v1562_v48 = vsub.f32 %v1498_v2, %v4173_v25  ;;  %v2156_v34 = vpop.eup %2155  ;;  %v4997_v46 = vld [vmem:[#allocation84_spill] sm:$0xff] }
 0x309   :  { %2167 = vrcp.f32 %v1621_v28  ;;  %v734_v63 = vmax.f32 %v4985_v56, 0.0  ;;  %v1250_v8 = vmax.f32 %v4986_v16, 0.0  ;;  %1797 = vst [vmem:[#allocation2 + $0x20] sm:$0xff] %v1674_v29  ;;  %v4988_v1 = vmax.f32 %v4987_v40, 0.0  ;;  %v4995_v28 = vld [vmem:[#allocation38_spill] sm:$0xff] }
 0x30a   :  { %2169 = vrcp.f32 %v1622_v52  ;;  %v2158_v51 = vpop.eup %2157  ;;  %1798 = vst [vmem:[#allocation2 + $0x28] sm:$0xff] %v1676_v6  ;;  %v1682_v41 = vmul.f32 %v2156_v34, %v4952_v12  ;;  %v1625_v23 = vmax.f32 %v1561_v44, 1e-06  ;;  %v1626_v14 = vmax.f32 %v1562_v48, 1e-06  ;;  %v5000_v34 = vld [vmem:[#allocation77_spill] sm:$0xff] }
 0x30b   :  { %v4191_v54 = vmul.f32 %v1245_v30, %v4988_v1  ;;  %v1501_v21 = vadd.f32 %v1403_v49, %v4754_v43  ;;  %v433_v60 = vmin.f32 %v4989_v24, %v4965_v9  ;;  %v1684_v13 = vmul.f32 %v2158_v51, %v4958_v17  ;;  %v1411_v18 = vpop.permute.xlu1 %1410 }
 0x30c   :  { %v4198_v11 = vmul.f32 %v1246_v4, %v734_v63  ;;  %v1502_v10 = vadd.f32 %v1403_v49, %v4755_v59  ;;  %v434_v0 = vmin.f32 %v4989_v24, %v4969_v50  ;;  %1801 = vst [vmem:[#allocation2 + $0x40] sm:$0xff] %v1682_v41  ;;  %2171 = vrcp.f32 %v1625_v23  ;;  %v5001_v63 = vld [vmem:[#allocation97_spill] sm:$0xff] }
 0x30d   :  { %v1565_v12 = vsub.f32 %v1501_v21, %v4191_v54  ;;  %v4991_v42 = vmax.f32 %v4990_v19, 0.0  ;;  %v2160_v26 = vpop.eup %2159  ;;  %v1253_v58 = vmax.f32 %v4992_v31, 0.0  ;;  %1802 = vst [vmem:[#allocation2 + $0x48] sm:$0xff] %v1684_v13  ;;  %2173 = vrcp.f32 %v1626_v14  ;;  %v5003_v21 = vld [vmem:[#allocation98_spill] sm:$0xff]  ;;  %v5008_v31 = vld [vmem:[#allocation89_spill] sm:$0xff] }
 0x30e   :  { %v1566_v17 = vsub.f32 %v1502_v10, %v4198_v11  ;;  %v4994_v61 = vmax.f32 %v4993_v7, 0.0  ;;  %v2162_v62 = vpop.eup %2161  ;;  %v1690_v38 = vmul.f32 %v2160_v26, %v4111_v27  ;;  %v1505_v39 = vadd.f32 %v1411_v18, %v4754_v43  ;;  %v5005_v10 = vld [vmem:[#allocation71_spill] sm:$0xff] }
 0x30f   :  { %v4206_v22 = vmul.f32 %v1249_v37, %v4991_v42  ;;  %v1629_v53 = vmax.f32 %v1565_v12, 1e-06  ;;  %v1506_v55 = vadd.f32 %v1411_v18, %v4755_v59  ;;  %v4996_v20 = vmax.f32 %v4995_v28, %v4962_v15  ;;  %v4998_v37 = vld [vmem:[#allocation80_spill] sm:$0xff]  ;;  %v5006_v12 = vld [vmem:[#allocation103_spill] sm:$0xff]  ;;  %v5009_v18 = vld [vmem:[#allocation37_spill] sm:$0xff] }
 0x310   :  { %v4212_v30 = vmul.f32 %v1250_v8, %v4994_v61  ;;  %v1254_v5 = vmax.f32 %v4997_v46, 0.0  ;;  %v1692_v4 = vmul.f32 %v2162_v62, %v4119_v36  ;;  %v1630_v35 = vmax.f32 %v1566_v17, 1e-06  ;;  %1805 = vst [vmem:[#allocation2 + $0x60] sm:$0xff] %v1690_v38  ;;  %v1419_v36 = vpop.permute.xlu1 %1418 }
 0x311   :  { %v4220_v2 = vsub.f32 %v433_v60, %v4996_v20  ;;  %v1257_v29 = vmax.f32 %v4998_v37, 0.0  ;;  %2175 = vrcp.f32 %v1629_v53  ;;  %v1569_v27 = vsub.f32 %v1505_v39, %v4206_v22  ;;  %v2164_v6 = vpop.eup %2163 }
 0x312   :  { %v1570_v52 = vsub.f32 %v1506_v55, %v4212_v30  ;;  %v4999_v44 = vmax.f32 %v4995_v28, %v4967_v3  ;;  %v1258_v56 = vmax.f32 %v5000_v34, 0.0  ;;  %1806 = vst [vmem:[#allocation2 + $0x68] sm:$0xff] %v1692_v4  ;;  %2177 = vrcp.f32 %v1630_v35  ;;  %v2166_v49 = vpop.eup %2165  ;;  %v5011_v28 = vld [vmem:[#allocation78_spill] sm:$0xff] }
 0x313   :  { %v5002_v16 = vmax.f32 %v5001_v63, 0.0  ;;  %v1698_v40 = vmul.f32 %v2164_v6, %v4139_v32  ;;  %v1633_v1 = vmax.f32 %v1569_v27, 1e-06  ;;  %v1509_v41 = vadd.f32 %v1419_v36, %v4754_v43  ;;  %v5013_v27 = vld [vmem:[#allocation85_spill] sm:$0xff]  ;;  %v5014_v6 = vld [vmem:[#allocation42_spill] sm:$0xff] }
 0x314   :  { %v4230_v48 = vsub.f32 %v434_v0, %v4999_v44  ;;  %v1634_v51 = vmax.f32 %v1570_v52, 1e-06  ;;  %v753_v23 = vmax.f32 %v4220_v2, 0.0  ;;  %v1700_v14 = vmul.f32 %v2166_v49, %v4148_v45  ;;  %v1427_v17 = vpop.permute.xlu1 %1426  ;;  %v5016_v49 = vld [vmem:[#allocation39_spill] sm:$0xff] }
 0x315   :  { %v4235_v8 = vmul.f32 %v1253_v58, %v5002_v16  ;;  %v5004_v24 = vmax.f32 %v5003_v21, 0.0  ;;  %v1510_v13 = vadd.f32 %v1419_v36, %v4755_v59  ;;  %v437_v0 = vmin.f32 %v5005_v10, %v4965_v9  ;;  %1809 = vst [vmem:[#allocation2 + $0x80] sm:$0xff] %v1698_v40 }
 0x316   :  { %2179 = vrcp.f32 %v1633_v1  ;;  %v5007_v19 = vmax.f32 %v5006_v12, 0.0  ;;  %v2168_v26 = vpop.eup %2167  ;;  %v1261_v45 = vmax.f32 %v5008_v31, 0.0  ;;  %1810 = vst [vmem:[#allocation2 + $0x88] sm:$0xff] %v1700_v14  ;;  %v5010_v7 = vmax.f32 %v5009_v18, 0.0 }
 0x317   :  { %v4243_v60 = vmul.f32 %v1254_v5, %v5004_v24  ;;  %v1573_v32 = vsub.f32 %v1509_v41, %v4235_v8  ;;  %2181 = vrcp.f32 %v1634_v51  ;;  %v2170_v9 = vpop.eup %2169  ;;  %v1706_v62 = vmul.f32 %v2168_v26, %v4161_v57  ;;  %v5012_v5 = vld [vmem:[#allocation28_spill] sm:$0xff]  ;;  %v5018_v51 = vld [vmem:[#allocation41_spill] sm:$0xff] }
 0x318   :  { %v4251_v42 = vmul.f32 %v1257_v29, %v5007_v19  ;;  %v4257_v61 = vmul.f32 %v1258_v56, %v5010_v7  ;;  %v1513_v53 = vadd.f32 %v1427_v17, %v4754_v43  ;;  %v1514_v39 = vadd.f32 %v1427_v17, %v4755_v59  ;;  %v5022_v17 = vld [vmem:[#allocation90_spill] sm:$0xff] }
 0x319   :  { %v1574_v58 = vsub.f32 %v1510_v13, %v4243_v60  ;;  %v1637_v38 = vmax.f32 %v1573_v32, 1e-06  ;;  %v438_v55 = vmin.f32 %v5005_v10, %v4969_v50  ;;  %v1262_v20 = vmax.f32 %v5011_v28, 0.0  ;;  %1813 = vst [vmem:[#allocation2 + $0xa0] sm:$0xff] %v1706_v62  ;;  %v2172_v37 = vpop.eup %2171  ;;  %v1435_v50 = vpop.permute.xlu1 %1434 }
 0x31a   :  { %v1708_v2 = vmul.f32 %v2170_v9, %v4166_v47  ;;  %v1265_v4 = vmax.f32 %v5012_v5, 0.0  ;;  %v1577_v35 = vsub.f32 %v1513_v53, %v4251_v42  ;;  %v1578_v57 = vsub.f32 %v1514_v39, %v4257_v61  ;;  %v2174_v34 = vpop.eup %2173 }
 0x31b   :  { %v1638_v46 = vmax.f32 %v1574_v58, 1e-06  ;;  %2183 = vrcp.f32 %v1637_v38  ;;  %v754_v29 = vmax.f32 %v4230_v48, 0.0  ;;  %v1266_v52 = vmax.f32 %v5013_v27, 0.0 }
 0x31c   :  { %1814 = vst [vmem:[#allocation2 + $0xa8] sm:$0xff] %v1708_v2  ;;  %v5015_v44 = vmax.f32 %v5014_v6, 0.0  ;;  %v1714_v56 = vmul.f32 %v2172_v37, %v4169_v33  ;;  %v1641_v36 = vmax.f32 %v1577_v35, 1e-06  ;;  %v1642_v63 = vmax.f32 %v1578_v57, 1e-06 }
 0x31d   :  { %2185 = vrcp.f32 %v1638_v46  ;;  %v1517_v16 = vadd.f32 %v1435_v50, %v4754_v43  ;;  %v5017_v40 = vmax.f32 %v5016_v49, %v4962_v15  ;;  %v1716_v1 = vmul.f32 %v2174_v34, %v4173_v25  ;;  %v1443_v12 = vpop.permute.xlu1 %1442 }
 0x31e   :  { %v4273_v47 = vmul.f32 %v1261_v45, %v5015_v44  ;;  %v5019_v41 = vmax.f32 %v5018_v51, 0.0  ;;  %v1518_v21 = vadd.f32 %v1435_v50, %v4755_v59  ;;  %v5020_v24 = vmax.f32 %v5016_v49, %v4967_v3  ;;  %1817 = vst [vmem:[#allocation2 + $0xc0] sm:$0xff] %v1714_v56  ;;  %v2176_v15 = vpop.eup %2175  ;;  %v5023_v56 = vld [vmem:[#allocation32_spill] sm:$0xff] }
 0x31f   :  { %v693_v48 = vsub.f32 %v437_v0, %v5017_v40  ;;  %2187 = vrcp.f32 %v1641_v36  ;;  %v4290_v10 = vmul.f32 %v1265_v4, %v753_v23  ;;  %v5021_v0 = vld [vmem:[#allocation88_spill] sm:$0xff]  ;;  %1818 = vst [vmem:[#allocation2 + $0xc8] sm:$0xff] %v1716_v1  ;;  %v4294_v19 = vmul.f32 %v1266_v52, %v754_v29  ;;  %v2178_v26 = vpop.eup %2177 }
 0x320   :  { %v4283_v14 = vmul.f32 %v1262_v20, %v5019_v41  ;;  %v694_v33 = vsub.f32 %v438_v55, %v5020_v24  ;;  %v1581_v13 = vsub.f32 %v1517_v16, %v4273_v47  ;;  %v1269_v32 = vmax.f32 %v5021_v0, 0.0  ;;  %v5025_v24 = vld [vmem:[#allocation35_spill] sm:$0xff] }
 0x321   :  { %2189 = vrcp.f32 %v1642_v63  ;;  %v1722_v3 = vmul.f32 %v2176_v15, %v4191_v54  ;;  %v1521_v45 = vadd.f32 %v1443_v12, %v4754_v43  ;;  %v1522_v58 = vadd.f32 %v1443_v12, %v4755_v59  ;;  %v1451_v54 = vpop.permute.xlu1 %1450  ;;  %v5024_v63 = vld [vmem:[#allocation33_spill] sm:$0xff]  ;;  %v5026_v15 = vld [vmem:[#allocation111_spill] sm:$0xff] }
 0x322   :  { %v1582_v25 = vsub.f32 %v1518_v21, %v4283_v14  ;;  %v1645_v31 = vmax.f32 %v1581_v13, 1e-06  ;;  %v757_v23 = vmax.f32 %v693_v48, 0.0  ;;  %v1270_v18 = vmax.f32 %v5022_v17, 0.0 }
 0x323   :  { %v1724_v7 = vmul.f32 %v2178_v26, %v4198_v11  ;;  %1821 = vst [vmem:[#allocation2 + $0xe0] sm:$0xff] %v1722_v3  ;;  %v1585_v62 = vsub.f32 %v1521_v45, %v4290_v10  ;;  %v1586_v38 = vsub.f32 %v1522_v58, %v4294_v19  ;;  %v2180_v53 = vpop.eup %2179  ;;  %v758_v39 = vmax.f32 %v694_v33, 0.0 }
 0x324   :  { %v1646_v9 = vmax.f32 %v1582_v25, 1e-06  ;;  %2191 = vrcp.f32 %v1645_v31  ;;  %v4303_v55 = vmul.f32 %v1269_v32, %v757_v23  ;;  %v2182_v28 = vpop.eup %2181  ;;  %v1730_v20 = vmul.f32 %v2180_v53, %v4206_v22 }
 0x325   :  { %1822 = vst [vmem:[#allocation2 + $0xe8] sm:$0xff] %v1724_v7  ;;  %v1649_v2 = vmax.f32 %v1585_v62, 1e-06  ;;  %v1650_v46 = vmax.f32 %v1586_v38, 1e-06  ;;  %v1525_v11 = vadd.f32 %v1451_v54, %v4754_v43  ;;  %v1732_v5 = vmul.f32 %v2182_v28, %v4212_v30  ;;  %v1459_v27 = vpop.permute.xlu1 %1458 }
 0x326   :  { %2193 = vrcp.f32 %v1646_v9  ;;  %v1334_v4 = vmul.f32 %v1270_v18, %v758_v39  ;;  %v1526_v35 = vadd.f32 %v1451_v54, %v4755_v59  ;;  %1825 = vst [vmem:[#allocation2 + $0x100] sm:$0xff] %v1730_v20  ;;  %v1529_v6 = vadd.f32 %v1459_v27, %v4754_v43 }
 0x327   :  { %2195 = vrcp.f32 %v1649_v2  ;;  %v1589_v57 = vsub.f32 %v1525_v11, %v4303_v55  ;;  %1826 = vst [vmem:[#allocation2 + $0x108] sm:$0xff] %v1732_v5  ;;  %v1530_v30 = vadd.f32 %v1459_v27, %v4755_v59  ;;  %v2237_v62 = vmov 0.0  }
 0x328   :  { %v2184_v37 = vpop.eup %2183  ;;  %2197 = vrcp.f32 %v1650_v46  ;;  %v1590_v29 = vsub.f32 %v1526_v35, %v1334_v4  ;;  %v1593_v36 = vsub.f32 %v1529_v6, %v5023_v56  ;;  %v2241_v38 = vmov 0.0  }
 0x329   :  { %v1738_v22 = vmul.f32 %v2184_v37, %v4235_v8  ;;  %v1653_v50 = vmax.f32 %v1589_v57, 1e-06  ;;  %v1594_v16 = vsub.f32 %v1530_v30, %v5024_v63  ;;  %v1467_v40 = vpop.permute.xlu1 %1466 }
 0x32a   :  { %v2186_v52 = vpop.eup %2185  ;;  %v1654_v34 = vmax.f32 %v1590_v29, 1e-06  ;;  %v1657_v1 = vmax.f32 %v1593_v36, 1e-06  ;;  %v1533_v41 = vadd.f32 %v1467_v40, %v4754_v43  ;;  %v1534_v21 = vadd.f32 %v1467_v40, %v4755_v59 }
 0x32b   :  { %v1740_v44 = vmul.f32 %v2186_v52, %v4243_v60  ;;  %1829 = vst [vmem:[#allocation2 + $0x120] sm:$0xff] %v1738_v22  ;;  %2199 = vrcp.f32 %v1653_v50  ;;  %v1658_v51 = vmax.f32 %v1594_v16, 1e-06 }
 0x32c   :  { %v2188_v49 = vpop.eup %2187  ;;  %2201 = vrcp.f32 %v1654_v34  ;;  %v1597_v33 = vsub.f32 %v1533_v41, %v5025_v24  ;;  %v1598_v0 = vsub.f32 %v1534_v21, %v5026_v15 }
 0x32d   :  { %1830 = vst [vmem:[#allocation2 + $0x128] sm:$0xff] %v1740_v44  ;;  %v1746_v8 = vmul.f32 %v2188_v49, %v4251_v42  ;;  %2203 = vrcp.f32 %v1657_v1 }
 0x32e   :  { %v2190_v48 = vpop.eup %2189  ;;  %2205 = vrcp.f32 %v1658_v51  ;;  %v1661_v25 = vmax.f32 %v1597_v33, 1e-06  ;;  %v1662_v43 = vmax.f32 %v1598_v0, 1e-06 }
 0x32f   :  { %v1748_v60 = vmul.f32 %v2190_v48, %v4257_v61  ;;  %1833 = vst [vmem:[#allocation2 + $0x140] sm:$0xff] %v1746_v8 }
 0x330   :  { %2207 = vrcp.f32 %v1661_v25 }
 0x331   :  { %v2192_v13 = vpop.eup %2191  ;;  %1834 = vst [vmem:[#allocation2 + $0x148] sm:$0xff] %v1748_v60  ;;  %2209 = vrcp.f32 %v1662_v43 }
 0x332   :  { %v1754_v42 = vmul.f32 %v2192_v13, %v4273_v47 }
 0x333   :  { %v2194_v32 = vpop.eup %2193 }
 0x334   :  { %v1756_v12 = vmul.f32 %v2194_v32, %v4283_v14  ;;  %1837 = vst [vmem:[#allocation2 + $0x160] sm:$0xff] %v1754_v42  ;;  %v2196_v61 = vpop.eup %2195 }
 0x335   :  { %v2198_v59 = vpop.eup %2197  ;;  %v1762_v26 = vmul.f32 %v2196_v61, %v4290_v10 }
 0x336   :  { %1838 = vst [vmem:[#allocation2 + $0x168] sm:$0xff] %v1756_v12  ;;  %v1764_v3 = vmul.f32 %v2198_v59, %v4294_v19 }
 0x337   :  { %1841 = vst [vmem:[#allocation2 + $0x180] sm:$0xff] %v1762_v26 }
 0x338   :  { %v2200_v31 = vpop.eup %2199  ;;  %1842 = vst [vmem:[#allocation2 + $0x188] sm:$0xff] %v1764_v3 }
 0x339   :  { %v2202_v45 = vpop.eup %2201  ;;  %v1770_v47 = vmul.f32 %v2200_v31, %v4303_v55 }
 0x33a   :  { %v1772_v58 = vmul.f32 %v2202_v45, %v1334_v4  ;;  %v2204_v14 = vpop.eup %2203 }
 0x33b   :  { %1845 = vst [vmem:[#allocation2 + $0x1a0] sm:$0xff] %v1770_v47  ;;  %v2206_v23 = vpop.eup %2205  ;;  %v1778_v17 = vmul.f32 %v2204_v14, %v5023_v56 }
 0x33c   :  { %1846 = vst [vmem:[#allocation2 + $0x1a8] sm:$0xff] %v1772_v58  ;;  %v1780_v18 = vmul.f32 %v2206_v23, %v5024_v63 }
 0x33d   :  { %1849 = vst [vmem:[#allocation2 + $0x1c0] sm:$0xff] %v1778_v17  ;;  %v2208_v7 = vpop.eup %2207 }
 0x33e   :  { %1850 = vst [vmem:[#allocation2 + $0x1c8] sm:$0xff] %v1780_v18  ;;  %v2210_v10 = vpop.eup %2209  ;;  %v1786_v19 = vmul.f32 %v2208_v7, %v5025_v24 }
 0x33f   :  { %v1788_v9 = vmul.f32 %v2210_v10, %v5026_v15 }
 0x340   :  { %1853 = vst [vmem:[#allocation2 + $0x1e0] sm:$0xff] %v1786_v19 }
 0x341   :  { %1854 = vst [vmem:[#allocation2 + $0x1e8] sm:$0xff] %v1788_v9 }
 0x342 LB: > { %v2256_v53 = vmov 1966171168   ;;  %s1868_s11 = sshra.s32 %s2247_s3, 3  ;;  %s1871_s12 = sand.u32 7, %s2247_s3  ;;  %vm1878_vm8 = vcmp.gt.f32.partialorder %v2243_v38, 0.5  ;;  %vm1879_vm9 = vcmp.gt.f32.partialorder %v2239_v62, 0.5  ;;  %v1899_v54 = vstv %s2247_s3  ;;  %s2247_s3 = sphi %s4331_s3, %s1865_s3   ;;  %v2243_v38 = vphi %v2241_v38, %v2242_v38   ;;  %v2239_v62 = vphi %v2237_v62, %v2238_v62  }
 0x343   : > { %v1884_v39 = vunpack.c.l.s4 %v2256_v53  ;;  %s2016_s13 = sshll.u32 %s1868_s11, 4  ;;  %v2257_v55 = vmov 0   ;;  %v5027_v46 = vld [vmem:[#allocation6_spill] sm:$0xff]  ;;  %v5028_v5 = vld [vmem:[#allocation7_spill] sm:$0xff]  ;;  %v5029_v35 = vld [vmem:[#allocation8_spill] sm:$0xff]  ;;  %v2258_v30 = vmov 0.0  }
 0x344   : > { %v1880_v28 = vsel %vm1878_vm8, 1, %v2257_v55  ;;  %v1881_v20 = vsel %vm1879_vm9, 1, %v2257_v55  ;;  %vm1900_vm10 = vcmp.lt.s32.totalorder %v5027_v46, %v1899_v54  ;;  %s1874_s14 = sadd.s32 %s2016_s13, %s1871_s12  ;;  %vm1901_vm11 = vcmp.lt.s32.totalorder %v5028_v5, %v1899_v54  ;;  %v5030_v34 = vld [vmem:[#allocation9_spill] sm:$0xff]  ;;  %v5031_v36 = vld [vmem:[#allocation10_spill] sm:$0xff]  ;;  %v5032_v51 = vld [vmem:[#allocation19_spill] sm:$0xff]  ;;  %s1865_s3 = sadd.s32 1, %s2247_s3  }
 0x345   : > { %v1885_v2 = vunpack.c.0.s8 %v1884_v39  ;;  %v1882_v11 = vcombine.low %v1880_v28, %v1881_v20  ;;  %v1902_v4 = vsel %vm1900_vm10, 1, %v2257_v55  ;;  %v1903_v37 = vsel %vm1901_vm11, 1, %v2257_v55  ;;  %s1875_s15 = scalar_lea.vmem [#allocation2], %s1874_s14  ;;  %p1862_p5 = scmp.ge.s32.totalorder %s1865_s3, 256  }
 0x346   : > { %v1904_v27 = vcombine.low %v1902_v4, %v1903_v37  ;;  %vm1946_vm2 = vcmp.eq.s32.totalorder %v5027_v46, %v1899_v54  ;;  %vm1947_vm3 = vcmp.eq.s32.totalorder %v5028_v5, %v1899_v54  ;;  %v5033_v0 = vlaneseq (%p1862_p5) }
 0x347   : > { %v1888_v57 = vsub.s32 %v1885_v2, %v5029_v35 }
 0x348   : > { %v1876_v29 = vld [vmem:[%s1875_s15] ss:$8 sm:$0x3]  ;;  %vm1981_vm4 = vcmp.lt.s32.totalorder (%p1862_p5), %v5033_v0, 256 }
 0x349   : > { %v1889_v52 = vrot.slane %v1882_v11, %v1888_v57  ;;  %v1911_v22 = vrot.slane %v1904_v27, %v1888_v57  ;;  %vm1877_vm12 = vcmp.gt.f32.partialorder %v1876_v29, 0.7 }
 0x34b   : > { %v1896_v50 = vrot.slane %v1889_v52, %v1888_v57  ;;  %v1918_v6 = vrot.slane %v1911_v22, %v1888_v57 }
 0x34d   : > { %vm1897_vm13 = vcmp.ne.s32.totalorder %v1896_v50, 0  ;;  %vm1919_vm15 = vcmp.ne.s32.totalorder %v1918_v6, 0 }
 0x34e   : > { %vm1898_vm14 = vmand %vm1877_vm12, %vm1897_vm13 }
 0x34f   : > { %vm1920_vm1 = vmand %vm1898_vm14, %vm1919_vm15 }
 0x350   : > { %v1921_v44 = vsel %vm1920_vm1, 1.0, %v2258_v30 }
 0x351   : > { %v1926_v56 = vrot.slane %v1921_v44, %v5030_v34  ;;  %v1930_v63 = vrot.slane %v1921_v44, %v5031_v36 }
 0x353   : > { %v1933_v16 = vsel %vm123_vm0, %v1926_v56, -inf  ;;  %v1934_v49 = vsel %vm123_vm0, %v1930_v63, -inf }
 0x354   : > { %v1935_v40 = vmax.f32 %v1933_v16, %v1934_v49 }
 0x356   : > { %1936 = vmax.xlane.f32.xlu0 %v1935_v40 }
 0x3df   : > { %v1937_v48 = vpop.xlane.xlu0 %1936 }
 0x3e0   : > { %v1938_v8 = vsub.f32 1.0, %v1937_v48 }
 0x3e2   : > { %v1943_v1 = vrot.slane %v1938_v8, %v5030_v34 }
 0x3e4   : > { %v1945_v41 = vmul.f32 %v1943_v1, %v5032_v51 }
 0x3e5   :  { %1864 = sbr.rel (!%p1862_p5) target bundleno = 834 (0x342), region = 58 }
 0x3e6   : > { %v1952_v60 = vrot.slane %v1945_v41, %v5030_v34  ;;  %v1956_v21 = vrot.slane %v1945_v41, %v5031_v36 }
 0x3e8   : > { %v1959_v24 = vsel %vm1946_vm2, %v1952_v60, %v2243_v38   ;;  %v1960_v33 = vsel %vm1947_vm3, %v1956_v21, %v2239_v62  }
 0x3e9   : > { %v2238_v62 = vmov %v1960_v33   ;;  %v2242_v38 = vmov %v1959_v24   ;;  %v1963_v13 = vcombine.low (%p1862_p5), %v1959_v24, %v1960_v33 }
 0x3eb   :  { %v1970_v15 = vrot.slane %v1963_v13, %v1888_v57 }
 0x3ed   :  { %v1977_v32 = vrot.slane %v1970_v15, %v1888_v57 }
 0x3ef   :  { %1983 = vst.msk [vmem:[%s4363_s4] sm:$0x3] %vm1981_vm4, %v1977_v32 }
 0x3f0   :  { %1992 = vsyncpa [#allocation4], 1 }

</bundles_post_ra>
